<compile_context>
chip_gen: v7x
topology: tpu7x:2x2x1
jax: 0.10.0
libtpu: 0.0.40
codegen_flags: <defaults>
</compile_context>

<pallas_src>
import functools
import math

import jax
import jax.numpy as jnp
from jax.experimental import pallas as pl
from jax.experimental.pallas import tpu as pltpu


# ----------------------------------------------------------------------------
# Shared math helpers
# ----------------------------------------------------------------------------
def _layernorm(y, gamma, beta, eps=1e-5):
    mu = jnp.mean(y, axis=-1, keepdims=True)
    var = jnp.mean((y - mu) ** 2, axis=-1, keepdims=True)
    return (y - mu) * jax.lax.rsqrt(var + eps) * gamma + beta


# ----------------------------------------------------------------------------
# Pallas kernel: ONE transformer block applied to one token tile.  The layer
# index is grid axis 1; the output block is the residual carried across layers.
# ----------------------------------------------------------------------------
def _block_kernel(x_ref, wqkv_ref, bqkv_ref, w1_ref, b1_ref, w2_ref, b2_ref,
                  g1_ref, be1_ref, g2_ref, be2_ref,
                  ssum_ref, ebc_ref, perm_ref, o_ref, *, num_heads):
    l = pl.program_id(1)
    D = x_ref.shape[-1]
    H = num_heads
    dh = D // H
    scale = 1.0 / math.sqrt(dh)

    # First layer for this token tile: seed the carried residual from x.
    @pl.when(l == 0)
    def _():
        o_ref[...] = x_ref[...]

    x = o_ref[...]                                   # (TB, D) f32 residual stream

    # ---- fused QKV projection: bf16 inputs, f32 accumulation on the MXU ------
    qkv = jnp.dot(x.astype(jnp.bfloat16), wqkv_ref[...],
                  preferred_element_type=jnp.float32) + bqkv_ref[...]   # (TB, 3D)
    q = qkv[:, :D] * scale            # fold 1/sqrt(dh) into q once (f32)
    k = qkv[:, D:2 * D]
    v = qkv[:, 2 * D:]

    # ---- tanh attention across heads, independently per token ---------------
    # Offset g pairs head h with head (h-g) mod H by lane-rolling k (XLU).  All
    # H offsets' q*k products are concatenated along lanes and reduced to
    # per-head scores with ONE block-diagonal segmented-sum matmul; one tanh
    # over the (TB, H*H) tile; ONE block-diagonal expand matmul broadcasts the
    # probs back over each head's dh-wide segment; the H slabs are then
    # multiplied by the matching rolled v and accumulated with VPU adds.
    prods = [q * k] + [q * pltpu.roll(k, shift=g * dh, axis=1) for g in range(1, H)]
    # TODO(synk): products are cast to bf16 before the score reduction (mirrored
    #             in the reference); keep in f32 if higher fidelity vs the fp32
    #             torch module is required.
    prod_cat = jnp.concatenate(prods, axis=1).astype(jnp.bfloat16)      # (TB, H*D)
    scores = jnp.dot(prod_cat, ssum_ref[...],
                     preferred_element_type=jnp.float32)                # (TB, H*H)
    probs = jnp.tanh(scores)
    bcast = jnp.dot(probs.astype(jnp.bfloat16), ebc_ref[...],
                    preferred_element_type=jnp.float32)                 # (TB, H*D)

    ctx = bcast[:, :D] * v                                              # (TB, D)
    for g in range(1, H):
        ctx = ctx + bcast[:, g * D:(g + 1) * D] * pltpu.roll(v, shift=g * dh, axis=1)

    # torch: context.transpose(1, 2).contiguous().view(T, N, D)  (head interleave)
    attn = jnp.dot(ctx.astype(jnp.bfloat16), perm_ref[...],
                   preferred_element_type=jnp.float32)

    # ---- residual + LayerNorm 1 (dropout == identity in eval mode) ----------
    y = _layernorm(x + attn, g1_ref[...], be1_ref[...])

    # ---- feed-forward: Linear -> ReLU -> Linear ------------------------------
    h = jnp.dot(y.astype(jnp.bfloat16), w1_ref[...],
                preferred_element_type=jnp.float32) + b1_ref[...]
    h = jnp.maximum(h, 0.0)
    f = jnp.dot(h.astype(jnp.bfloat16), w2_ref[...],
                preferred_element_type=jnp.float32) + b2_ref[...]

    # ---- residual + LayerNorm 2 ----------------------------------------------
    o_ref[...] = _layernorm(y + f, g2_ref[...], be2_ref[...])


# ----------------------------------------------------------------------------
# Wrapper: BlockSpecs / grid
# ----------------------------------------------------------------------------
def _round_up(a, b):
    return (a + b - 1) // b * b


def _attention_constants(D, H):
    """0/1 structural matrices (exact in bf16)."""
    dh = D // H
    col = jnp.arange(D)
    head = col // dh                       # head id of head-major column h*dh + d
    dim = col % dh                         # within-head index d
    ssum1 = (head[:, None] == jnp.arange(H)[None, :]).astype(jnp.float32)   # (D, H)
    ebc1 = ssum1.T                                                          # (H, D)
    eye = jnp.eye(H, dtype=jnp.float32)
    ssum_big = jnp.kron(eye, ssum1).astype(jnp.bfloat16)   # (H*D, H*H) block-diag
    ebc_big = jnp.kron(eye, ebc1).astype(jnp.bfloat16)     # (H*H, H*D) block-diag
    perm = (dim[:, None] * H + head[:, None] == col[None, :]).astype(jnp.bfloat16)  # (D, D)
    return ssum_big, ebc_big, perm


def cross_attention_block_stack(x, params, num_heads, *, max_token_tile=1024):
    """Runs a stack of CrossAttentionTransformerBlock('tanh', eval mode) layers
    fused in a single pallas_call.  x: (num_task, num_samples, emb_dim) f32."""
    T, N, D = x.shape
    assert D % num_heads == 0
    B = T * N
    tokens = x.reshape(B, D)

    tile_b = min(max_token_tile, _round_up(B, 8))
    B_pad = _round_up(B, tile_b)
    if B_pad != B:
        tokens = jnp.pad(tokens, ((0, B_pad - B), (0, 0)))
    n_tiles = B_pad // tile_b

    L = params["wqkv"].shape[0]
    ssum, ebc, perm = _attention_constants(D, num_heads)

    def layer_spec(shape):
        # Stacked (L, ...) weights: stream one layer per grid step along axis 1.
        nd_rest = len(shape) - 1
        return pl.BlockSpec((None,) + shape[1:],
                            lambda i, l, _n=nd_rest: (l,) + (0,) * _n)

    def const_spec(shape):
        nd = len(shape)
        return pl.BlockSpec(shape, lambda i, l, _n=nd: (0,) * _n)

    names = ("wqkv", "bqkv", "w1", "b1", "w2", "b2", "g1", "be1", "g2", "be2")
    weight_args = [params[n] for n in names]
    const_args = [ssum, ebc, perm]

    out = pl.pallas_call(
        functools.partial(_block_kernel, num_heads=num_heads),
        out_shape=jax.ShapeDtypeStruct((B_pad, D), jnp.float32),
        grid=(n_tiles, L),
        in_specs=([pl.BlockSpec((tile_b, D), lambda i, l: (i, 0))]
                  + [layer_spec(a.shape) for a in weight_args]
                  + [const_spec(a.shape) for a in const_args]),
        out_specs=pl.BlockSpec((tile_b, D), lambda i, l: (i, 0)),
        compiler_params=pltpu.CompilerParams(
            dimension_semantics=("parallel", "arbitrary"),
            vmem_limit_bytes=60 * 1024 * 1024),
    )(tokens, *weight_args, *const_args)

    return out[:B].reshape(T, N, D)


# ----------------------------------------------------------------------------
# Deterministic parameter init (xavier_uniform weights, small random biases/LN
# params so every term of the block is exercised).  Matmul weights in bf16.
# ----------------------------------------------------------------------------
def _xavier(key, fan_in, fan_out):
    bound = math.sqrt(6.0 / (fan_in + fan_out))
    return jax.random.uniform(key, (fan_in, fan_out), jnp.float32, -bound, bound)


def init_block_params(key, emb_dim, ff_dim):
    D, F = emb_dim, ff_dim
    ks = jax.random.split(key, 12)
    small = lambda k, n: 0.05 * jax.random.normal(k, (1, n), jnp.float32)
    wq, wk, wv = (_xavier(k, D, D) for k in ks[:3])
    return {
        "wqkv": jnp.concatenate([wq, wk, wv], axis=1).astype(jnp.bfloat16),  # (D, 3D)
        "bqkv": small(ks[3], 3 * D),
        "w1": _xavier(ks[4], D, F).astype(jnp.bfloat16),
        "b1": small(ks[5], F),
        "w2": _xavier(ks[6], F, D).astype(jnp.bfloat16),
        "b2": small(ks[7], D),
        "g1": 1.0 + small(ks[8], D), "be1": small(ks[9], D),
        "g2": 1.0 + small(ks[10], D), "be2": small(ks[11], D),
    }


def init_stacked_params(key, num_blocks, emb_dim, ff_dim):
    blocks = [init_block_params(k, emb_dim, ff_dim)
              for k in jax.random.split(key, num_blocks)]
    return {n: jnp.stack([b[n] for b in blocks], axis=0) for n in blocks[0]}


# ----------------------------------------------------------------------------
# Pure-JAX reference: straightforward torch-style formulation (explicit head
# reshapes), with the same bf16-input / f32-accumulation matmul precision as
# the kernel so the comparison is tight.
# ----------------------------------------------------------------------------
def reference_block(x, p, num_heads):
    B, D = x.shape
    H = num_heads
    dh = D // H
    bf = lambda a: a.astype(jnp.bfloat16)
    f32 = jnp.float32
    qkv = jnp.dot(bf(x), p["wqkv"], preferred_element_type=f32) + p["bqkv"]
    q = qkv[:, :D].reshape(B, H, dh) / math.sqrt(dh)
    k = qkv[:, D:2 * D].reshape(B, H, dh)
    v = qkv[:, 2 * D:].reshape(B, H, dh)
    prod = bf(q[:, :, None, :] * k[:, None, :, :]).astype(f32)       # (B,H,H,dh)
    scores = prod.sum(-1)                                            # (B,H,H)
    probs = bf(jnp.tanh(scores)).astype(f32)
    ctx = (probs[:, :, :, None] * v[:, None, :, :]).sum(axis=2)      # (B,H,dh)
    attn = bf(jnp.transpose(ctx, (0, 2, 1)).reshape(B, D)).astype(f32)
    y = _layernorm(x + attn, p["g1"], p["be1"])
    h = jnp.maximum(jnp.dot(bf(y), p["w1"], preferred_element_type=f32) + p["b1"], 0.0)
    f = jnp.dot(bf(h), p["w2"], preferred_element_type=f32) + p["b2"]
    return _layernorm(y + f, p["g2"], p["be2"])


def reference_forward(x, params, num_heads):
    T, N, D = x.shape
    tokens = x.reshape(T * N, D)
    for l in range(params["wqkv"].shape[0]):
        p = {name: arr[l] for name, arr in params.items()}
        tokens = reference_block(tokens, p, num_heads)
    return tokens.reshape(T, N, D)


# ----------------------------------------------------------------------------
if __name__ == "__main__":
    NUM_TASK, NUM_SAMPLES = 4, 16          # -> 64 tokens
    EMB_DIM, NUM_HEADS, FF_DIM = 128, 8, 256
    NUM_BLOCKS = 2

    key = jax.random.PRNGKey(0)
    kx, kp = jax.random.split(key)
    x = jax.random.normal(kx, (NUM_TASK, NUM_SAMPLES, EMB_DIM), jnp.float32)
    params = init_stacked_params(kp, NUM_BLOCKS, EMB_DIM, FF_DIM)

    out = cross_attention_block_stack(x, params, NUM_HEADS)
    out = jax.block_until_ready(out)

    ref = reference_forward(x, params, NUM_HEADS)
    diff = jnp.abs(out - ref)
    max_err = float(jnp.max(diff))
    mean_err = float(jnp.mean(diff))

    assert out.shape == (NUM_TASK, NUM_SAMPLES, EMB_DIM)
    # bf16 matmul inputs (f32 accumulation) are mirrored in the reference; the
    # loose bounds only allow for bf16 rounding / accumulation-order noise,
    # while structural errors would be O(0.1 .. 1).
    assert max_err < 5e-2 and mean_err < 5e-3, \
        f"mismatch vs reference: max={max_err}, mean={mean_err}"
    print("KERNEL_OK")
</pallas_src>

<mosaic_0001>
module attributes {stable_mosaic.version = 11 : i64} {
  func.func @_block_kernel(%arg0: i32, %arg1: i32, %arg2: memref<64x128xf32, #tpu.memory_space<vmem>>, %arg3: memref<1x128x384xbf16, #tpu.memory_space<vmem>>, %arg4: memref<1x1x384xf32, #tpu.memory_space<vmem>>, %arg5: memref<1x128x256xbf16, #tpu.memory_space<vmem>>, %arg6: memref<1x1x256xf32, #tpu.memory_space<vmem>>, %arg7: memref<1x256x128xbf16, #tpu.memory_space<vmem>>, %arg8: memref<1x1x128xf32, #tpu.memory_space<vmem>>, %arg9: memref<1x1x128xf32, #tpu.memory_space<vmem>>, %arg10: memref<1x1x128xf32, #tpu.memory_space<vmem>>, %arg11: memref<1x1x128xf32, #tpu.memory_space<vmem>>, %arg12: memref<1x1x128xf32, #tpu.memory_space<vmem>>, %arg13: memref<1024x64xbf16, #tpu.memory_space<vmem>>, %arg14: memref<64x1024xbf16, #tpu.memory_space<vmem>>, %arg15: memref<128x128xbf16, #tpu.memory_space<vmem>>, %arg16: memref<64x128xf32, #tpu.memory_space<vmem>>) attributes {dimension_semantics = [#tpu.dimension_semantics<parallel>, #tpu.dimension_semantics<arbitrary>], iteration_bounds = array<i64: 1, 2>, scalar_prefetch = 0 : i64, scratch_operands = 0 : i64, tpu.core_type = #tpu.core_type<tc>, window_params = [{transform_indices = @transform_0, window_bounds = array<i64: 64, 128>}, {transform_indices = @transform_1, window_bounds = array<i64: 1, 128, 384>}, {transform_indices = @transform_2, window_bounds = array<i64: 1, 1, 384>}, {transform_indices = @transform_3, window_bounds = array<i64: 1, 128, 256>}, {transform_indices = @transform_4, window_bounds = array<i64: 1, 1, 256>}, {transform_indices = @transform_5, window_bounds = array<i64: 1, 256, 128>}, {transform_indices = @transform_6, window_bounds = array<i64: 1, 1, 128>}, {transform_indices = @transform_7, window_bounds = array<i64: 1, 1, 128>}, {transform_indices = @transform_8, window_bounds = array<i64: 1, 1, 128>}, {transform_indices = @transform_9, window_bounds = array<i64: 1, 1, 128>}, {transform_indices = @transform_10, window_bounds = array<i64: 1, 1, 128>}, {pipeline_mode = #tpu.pipeline_mode<synchronous>, transform_indices = @transform_11, window_bounds = array<i64: 1024, 64>}, {pipeline_mode = #tpu.pipeline_mode<synchronous>, transform_indices = @transform_12, window_bounds = array<i64: 64, 1024>}, {pipeline_mode = #tpu.pipeline_mode<synchronous>, transform_indices = @transform_13, window_bounds = array<i64: 128, 128>}, {transform_indices = @transform_14, window_bounds = array<i64: 64, 128>}]} {
    %c0_i32 = arith.constant 0 : i32
    %0 = arith.cmpi eq, %arg1, %c0_i32 : i32
    %1 = arith.extui %0 : i1 to i32
    %c0_i32_0 = arith.constant 0 : i32
    %2 = arith.cmpi ne, %1, %c0_i32_0 : i32
    scf.if %2 {
      %c0_64 = arith.constant 0 : index
      %c0_65 = arith.constant 0 : index
      %146 = vector.load %arg2[%c0_64, %c0_65] : memref<64x128xf32, #tpu.memory_space<vmem>>, vector<64x128xf32>
      %c0_66 = arith.constant 0 : index
      %c0_67 = arith.constant 0 : index
      %147 = vector.load %arg16[%c0_66, %c0_67] : memref<64x128xf32, #tpu.memory_space<vmem>>, vector<64x128xf32>
      tpu.vector_store %arg16[%c0_66, %c0_67], %146 {strides = array<i32>} : memref<64x128xf32, #tpu.memory_space<vmem>>, vector<64x128xf32>,
    } else {
    }
    %c0 = arith.constant 0 : index
    %c0_1 = arith.constant 0 : index
    %3 = vector.load %arg16[%c0, %c0_1] : memref<64x128xf32, #tpu.memory_space<vmem>>, vector<64x128xf32>
    %4 = arith.truncf %3 : vector<64x128xf32> to vector<64x128xbf16>
    %c0_2 = arith.constant 0 : index
    %c0_3 = arith.constant 0 : index
    %c0_4 = arith.constant 0 : index
    %5 = vector.load %arg3[%c0_2, %c0_3, %c0_4] : memref<1x128x384xbf16, #tpu.memory_space<vmem>>, vector<1x128x384xbf16>
    %6 = vector.shape_cast %5 : vector<1x128x384xbf16> to vector<128x384xbf16>
    %cst = arith.constant dense<0.000000e+00> : vector<64x384xf32>
    %7 = tpu.matmul %4, %6, %cst {dimension_numbers = #tpu.dot_dimension_numbers<[1], [0], [0], [1], [0, 0, 1, 1], [], []>} : vector<64x128xbf16>, vector<128x384xbf16>, vector<64x384xf32> -> vector<64x384xf32>
    %c0_5 = arith.constant 0 : index
    %c0_6 = arith.constant 0 : index
    %c0_7 = arith.constant 0 : index
    %8 = vector.load %arg4[%c0_5, %c0_6, %c0_7] : memref<1x1x384xf32, #tpu.memory_space<vmem>>, vector<1x1x384xf32>
    %9 = vector.shape_cast %8 : vector<1x1x384xf32> to vector<1x384xf32>
    %10 = vector.broadcast %9 : vector<1x384xf32> to vector<64x384xf32>
    %11 = arith.addf %7, %10 : vector<64x384xf32>
    %12 = vector.extract_strided_slice %11 {offsets = [0, 0], sizes = [64, 128], strides = [1, 1]} : vector<64x384xf32> to vector<64x128xf32>
    %cst_8 = arith.constant 2.500000e-01 : f32
    %13 = vector.broadcast %cst_8 : f32 to vector<64x128xf32>
    %14 = arith.mulf %12, %13 : vector<64x128xf32>
    %15 = vector.extract_strided_slice %11 {offsets = [0, 128], sizes = [64, 128], strides = [1, 1]} : vector<64x384xf32> to vector<64x128xf32>
    %16 = vector.extract_strided_slice %11 {offsets = [0, 256], sizes = [64, 128], strides = [1, 1]} : vector<64x384xf32> to vector<64x128xf32>
    %17 = arith.mulf %14, %15 : vector<64x128xf32>
    %c16_i32 = arith.constant 16 : i32
    %18 = tpu.dynamic_rotate %15 by %c16_i32 dim 1 : vector<64x128xf32>, i32 -> vector<64x128xf32>
    %19 = arith.mulf %14, %18 : vector<64x128xf32>
    %c32_i32 = arith.constant 32 : i32
    %20 = tpu.dynamic_rotate %15 by %c32_i32 dim 1 : vector<64x128xf32>, i32 -> vector<64x128xf32>
    %21 = arith.mulf %14, %20 : vector<64x128xf32>
    %c48_i32 = arith.constant 48 : i32
    %22 = tpu.dynamic_rotate %15 by %c48_i32 dim 1 : vector<64x128xf32>, i32 -> vector<64x128xf32>
    %23 = arith.mulf %14, %22 : vector<64x128xf32>
    %c64_i32 = arith.constant 64 : i32
    %24 = tpu.dynamic_rotate %15 by %c64_i32 dim 1 : vector<64x128xf32>, i32 -> vector<64x128xf32>
    %25 = arith.mulf %14, %24 : vector<64x128xf32>
    %c80_i32 = arith.constant 80 : i32
    %26 = tpu.dynamic_rotate %15 by %c80_i32 dim 1 : vector<64x128xf32>, i32 -> vector<64x128xf32>
    %27 = arith.mulf %14, %26 : vector<64x128xf32>
    %c96_i32 = arith.constant 96 : i32
    %28 = tpu.dynamic_rotate %15 by %c96_i32 dim 1 : vector<64x128xf32>, i32 -> vector<64x128xf32>
    %29 = arith.mulf %14, %28 : vector<64x128xf32>
    %c112_i32 = arith.constant 112 : i32
    %30 = tpu.dynamic_rotate %15 by %c112_i32 dim 1 : vector<64x128xf32>, i32 -> vector<64x128xf32>
    %31 = arith.mulf %14, %30 : vector<64x128xf32>
    %32 = tpu.concatenate %17, %19, %21, %23, %25, %27, %29, %31 in 1 : vector<64x128xf32>, vector<64x128xf32>, vector<64x128xf32>, vector<64x128xf32>, vector<64x128xf32>, vector<64x128xf32>, vector<64x128xf32>, vector<64x128xf32> -> vector<64x1024xf32>
    %33 = arith.truncf %32 : vector<64x1024xf32> to vector<64x1024xbf16>
    %c0_9 = arith.constant 0 : index
    %c0_10 = arith.constant 0 : index
    %34 = vector.load %arg13[%c0_9, %c0_10] : memref<1024x64xbf16, #tpu.memory_space<vmem>>, vector<1024x64xbf16>
    %cst_11 = arith.constant dense<0.000000e+00> : vector<64x64xf32>
    %35 = tpu.matmul %33, %34, %cst_11 {dimension_numbers = #tpu.dot_dimension_numbers<[1], [0], [0], [1], [0, 0, 1, 1], [], []>} : vector<64x1024xbf16>, vector<1024x64xbf16>, vector<64x64xf32> -> vector<64x64xf32>
    %36 = math.tanh %35 : vector<64x64xf32>
    %37 = arith.truncf %36 : vector<64x64xf32> to vector<64x64xbf16>
    %c0_12 = arith.constant 0 : index
    %c0_13 = arith.constant 0 : index
    %38 = vector.load %arg14[%c0_12, %c0_13] : memref<64x1024xbf16, #tpu.memory_space<vmem>>, vector<64x1024xbf16>
    %cst_14 = arith.constant dense<0.000000e+00> : vector<64x1024xf32>
    %39 = tpu.matmul %37, %38, %cst_14 {dimension_numbers = #tpu.dot_dimension_numbers<[1], [0], [0], [1], [0, 0, 1, 1], [], []>} : vector<64x64xbf16>, vector<64x1024xbf16>, vector<64x1024xf32> -> vector<64x1024xf32>
    %40 = vector.extract_strided_slice %39 {offsets = [0, 0], sizes = [64, 128], strides = [1, 1]} : vector<64x1024xf32> to vector<64x128xf32>
    %41 = arith.mulf %40, %16 : vector<64x128xf32>
    %42 = vector.extract_strided_slice %39 {offsets = [0, 128], sizes = [64, 128], strides = [1, 1]} : vector<64x1024xf32> to vector<64x128xf32>
    %c16_i32_15 = arith.constant 16 : i32
    %43 = tpu.dynamic_rotate %16 by %c16_i32_15 dim 1 : vector<64x128xf32>, i32 -> vector<64x128xf32>
    %44 = arith.mulf %42, %43 : vector<64x128xf32>
    %45 = arith.addf %41, %44 : vector<64x128xf32>
    %46 = vector.extract_strided_slice %39 {offsets = [0, 256], sizes = [64, 128], strides = [1, 1]} : vector<64x1024xf32> to vector<64x128xf32>
    %c32_i32_16 = arith.constant 32 : i32
    %47 = tpu.dynamic_rotate %16 by %c32_i32_16 dim 1 : vector<64x128xf32>, i32 -> vector<64x128xf32>
    %48 = arith.mulf %46, %47 : vector<64x128xf32>
    %49 = arith.addf %45, %48 : vector<64x128xf32>
    %50 = vector.extract_strided_slice %39 {offsets = [0, 384], sizes = [64, 128], strides = [1, 1]} : vector<64x1024xf32> to vector<64x128xf32>
    %c48_i32_17 = arith.constant 48 : i32
    %51 = tpu.dynamic_rotate %16 by %c48_i32_17 dim 1 : vector<64x128xf32>, i32 -> vector<64x128xf32>
    %52 = arith.mulf %50, %51 : vector<64x128xf32>
    %53 = arith.addf %49, %52 : vector<64x128xf32>
    %54 = vector.extract_strided_slice %39 {offsets = [0, 512], sizes = [64, 128], strides = [1, 1]} : vector<64x1024xf32> to vector<64x128xf32>
    %c64_i32_18 = arith.constant 64 : i32
    %55 = tpu.dynamic_rotate %16 by %c64_i32_18 dim 1 : vector<64x128xf32>, i32 -> vector<64x128xf32>
    %56 = arith.mulf %54, %55 : vector<64x128xf32>
    %57 = arith.addf %53, %56 : vector<64x128xf32>
    %58 = vector.extract_strided_slice %39 {offsets = [0, 640], sizes = [64, 128], strides = [1, 1]} : vector<64x1024xf32> to vector<64x128xf32>
    %c80_i32_19 = arith.constant 80 : i32
    %59 = tpu.dynamic_rotate %16 by %c80_i32_19 dim 1 : vector<64x128xf32>, i32 -> vector<64x128xf32>
    %60 = arith.mulf %58, %59 : vector<64x128xf32>
    %61 = arith.addf %57, %60 : vector<64x128xf32>
    %62 = vector.extract_strided_slice %39 {offsets = [0, 768], sizes = [64, 128], strides = [1, 1]} : vector<64x1024xf32> to vector<64x128xf32>
    %c96_i32_20 = arith.constant 96 : i32
    %63 = tpu.dynamic_rotate %16 by %c96_i32_20 dim 1 : vector<64x128xf32>, i32 -> vector<64x128xf32>
    %64 = arith.mulf %62, %63 : vector<64x128xf32>
    %65 = arith.addf %61, %64 : vector<64x128xf32>
    %66 = vector.extract_strided_slice %39 {offsets = [0, 896], sizes = [64, 128], strides = [1, 1]} : vector<64x1024xf32> to vector<64x128xf32>
    %c112_i32_21 = arith.constant 112 : i32
    %67 = tpu.dynamic_rotate %16 by %c112_i32_21 dim 1 : vector<64x128xf32>, i32 -> vector<64x128xf32>
    %68 = arith.mulf %66, %67 : vector<64x128xf32>
    %69 = arith.addf %65, %68 : vector<64x128xf32>
    %70 = arith.truncf %69 : vector<64x128xf32> to vector<64x128xbf16>
    %c0_22 = arith.constant 0 : index
    %c0_23 = arith.constant 0 : index
    %71 = vector.load %arg15[%c0_22, %c0_23] : memref<128x128xbf16, #tpu.memory_space<vmem>>, vector<128x128xbf16>
    %cst_24 = arith.constant dense<0.000000e+00> : vector<64x128xf32>
    %72 = tpu.matmul %70, %71, %cst_24 {dimension_numbers = #tpu.dot_dimension_numbers<[1], [0], [0], [1], [0, 0, 1, 1], [], []>} : vector<64x128xbf16>, vector<128x128xbf16>, vector<64x128xf32> -> vector<64x128xf32>
    %73 = arith.addf %3, %72 : vector<64x128xf32>
    %c0_25 = arith.constant 0 : index
    %c0_26 = arith.constant 0 : index
    %c0_27 = arith.constant 0 : index
    %74 = vector.load %arg9[%c0_25, %c0_26, %c0_27] : memref<1x1x128xf32, #tpu.memory_space<vmem>>, vector<1x1x128xf32>
    %75 = vector.shape_cast %74 : vector<1x1x128xf32> to vector<1x128xf32>
    %c0_28 = arith.constant 0 : index
    %c0_29 = arith.constant 0 : index
    %c0_30 = arith.constant 0 : index
    %76 = vector.load %arg10[%c0_28, %c0_29, %c0_30] : memref<1x1x128xf32, #tpu.memory_space<vmem>>, vector<1x1x128xf32>
    %77 = vector.shape_cast %76 : vector<1x1x128xf32> to vector<1x128xf32>
    %cst_31 = arith.constant dense<0.000000e+00> : vector<64xf32>
    %78 = vector.multi_reduction <add>, %73, %cst_31 [1] : vector<64x128xf32> to vector<64xf32>
    %79 = vector.shape_cast %78 : vector<64xf32> to vector<64x1xf32>
    %cst_32 = arith.constant 1.280000e+02 : f32
    %80 = vector.broadcast %cst_32 : f32 to vector<64x1xf32>
    %81 = arith.divf %79, %80 : vector<64x1xf32>
    %82 = vector.broadcast %81 : vector<64x1xf32> to vector<64x128xf32>
    %83 = arith.subf %73, %82 : vector<64x128xf32>
    %84 = arith.mulf %83, %83 : vector<64x128xf32>
    %cst_33 = arith.constant dense<0.000000e+00> : vector<64xf32>
    %85 = vector.multi_reduction <add>, %84, %cst_33 [1] : vector<64x128xf32> to vector<64xf32>
    %86 = vector.shape_cast %85 : vector<64xf32> to vector<64x1xf32>
    %cst_34 = arith.constant 1.280000e+02 : f32
    %87 = vector.broadcast %cst_34 : f32 to vector<64x1xf32>
    %88 = arith.divf %86, %87 : vector<64x1xf32>
    %89 = vector.broadcast %81 : vector<64x1xf32> to vector<64x128xf32>
    %90 = arith.subf %73, %89 : vector<64x128xf32>
    %cst_35 = arith.constant 9.99999974E-6 : f32
    %91 = vector.broadcast %cst_35 : f32 to vector<64x1xf32>
    %92 = arith.addf %88, %91 : vector<64x1xf32>
    %93 = math.rsqrt %92 : vector<64x1xf32>
    %94 = vector.broadcast %93 : vector<64x1xf32> to vector<64x128xf32>
    %95 = arith.mulf %90, %94 : vector<64x128xf32>
    %96 = vector.broadcast %75 : vector<1x128xf32> to vector<64x128xf32>
    %97 = arith.mulf %95, %96 : vector<64x128xf32>
    %98 = vector.broadcast %77 : vector<1x128xf32> to vector<64x128xf32>
    %99 = arith.addf %97, %98 : vector<64x128xf32>
    %100 = arith.truncf %99 : vector<64x128xf32> to vector<64x128xbf16>
    %c0_36 = arith.constant 0 : index
    %c0_37 = arith.constant 0 : index
    %c0_38 = arith.constant 0 : index
    %101 = vector.load %arg5[%c0_36, %c0_37, %c0_38] : memref<1x128x256xbf16, #tpu.memory_space<vmem>>, vector<1x128x256xbf16>
    %102 = vector.shape_cast %101 : vector<1x128x256xbf16> to vector<128x256xbf16>
    %cst_39 = arith.constant dense<0.000000e+00> : vector<64x256xf32>
    %103 = tpu.matmul %100, %102, %cst_39 {dimension_numbers = #tpu.dot_dimension_numbers<[1], [0], [0], [1], [0, 0, 1, 1], [], []>} : vector<64x128xbf16>, vector<128x256xbf16>, vector<64x256xf32> -> vector<64x256xf32>
    %c0_40 = arith.constant 0 : index
    %c0_41 = arith.constant 0 : index
    %c0_42 = arith.constant 0 : index
    %104 = vector.load %arg6[%c0_40, %c0_41, %c0_42] : memref<1x1x256xf32, #tpu.memory_space<vmem>>, vector<1x1x256xf32>
    %105 = vector.shape_cast %104 : vector<1x1x256xf32> to vector<1x256xf32>
    %106 = vector.broadcast %105 : vector<1x256xf32> to vector<64x256xf32>
    %107 = arith.addf %103, %106 : vector<64x256xf32>
    %cst_43 = arith.constant 0.000000e+00 : f32
    %108 = vector.broadcast %cst_43 : f32 to vector<64x256xf32>
    %109 = arith.maximumf %107, %108 : vector<64x256xf32>
    %110 = arith.truncf %109 : vector<64x256xf32> to vector<64x256xbf16>
    %c0_44 = arith.constant 0 : index
    %c0_45 = arith.constant 0 : index
    %c0_46 = arith.constant 0 : index
    %111 = vector.load %arg7[%c0_44, %c0_45, %c0_46] : memref<1x256x128xbf16, #tpu.memory_space<vmem>>, vector<1x256x128xbf16>
    %112 = vector.shape_cast %111 : vector<1x256x128xbf16> to vector<256x128xbf16>
    %cst_47 = arith.constant dense<0.000000e+00> : vector<64x128xf32>
    %113 = tpu.matmul %110, %112, %cst_47 {dimension_numbers = #tpu.dot_dimension_numbers<[1], [0], [0], [1], [0, 0, 1, 1], [], []>} : vector<64x256xbf16>, vector<256x128xbf16>, vector<64x128xf32> -> vector<64x128xf32>
    %c0_48 = arith.constant 0 : index
    %c0_49 = arith.constant 0 : index
    %c0_50 = arith.constant 0 : index
    %114 = vector.load %arg8[%c0_48, %c0_49, %c0_50] : memref<1x1x128xf32, #tpu.memory_space<vmem>>, vector<1x1x128xf32>
    %115 = vector.shape_cast %114 : vector<1x1x128xf32> to vector<1x128xf32>
    %116 = vector.broadcast %115 : vector<1x128xf32> to vector<64x128xf32>
    %117 = arith.addf %113, %116 : vector<64x128xf32>
    %118 = arith.addf %99, %117 : vector<64x128xf32>
    %c0_51 = arith.constant 0 : index
    %c0_52 = arith.constant 0 : index
    %c0_53 = arith.constant 0 : index
    %119 = vector.load %arg11[%c0_51, %c0_52, %c0_53] : memref<1x1x128xf32, #tpu.memory_space<vmem>>, vector<1x1x128xf32>
    %120 = vector.shape_cast %119 : vector<1x1x128xf32> to vector<1x128xf32>
    %c0_54 = arith.constant 0 : index
    %c0_55 = arith.constant 0 : index
    %c0_56 = arith.constant 0 : index
    %121 = vector.load %arg12[%c0_54, %c0_55, %c0_56] : memref<1x1x128xf32, #tpu.memory_space<vmem>>, vector<1x1x128xf32>
    %122 = vector.shape_cast %121 : vector<1x1x128xf32> to vector<1x128xf32>
    %cst_57 = arith.constant dense<0.000000e+00> : vector<64xf32>
    %123 = vector.multi_reduction <add>, %118, %cst_57 [1] : vector<64x128xf32> to vector<64xf32>
    %124 = vector.shape_cast %123 : vector<64xf32> to vector<64x1xf32>
    %cst_58 = arith.constant 1.280000e+02 : f32
    %125 = vector.broadcast %cst_58 : f32 to vector<64x1xf32>
    %126 = arith.divf %124, %125 : vector<64x1xf32>
    %127 = vector.broadcast %126 : vector<64x1xf32> to vector<64x128xf32>
    %128 = arith.subf %118, %127 : vector<64x128xf32>
    %129 = arith.mulf %128, %128 : vector<64x128xf32>
    %cst_59 = arith.constant dense<0.000000e+00> : vector<64xf32>
    %130 = vector.multi_reduction <add>, %129, %cst_59 [1] : vector<64x128xf32> to vector<64xf32>
    %131 = vector.shape_cast %130 : vector<64xf32> to vector<64x1xf32>
    %cst_60 = arith.constant 1.280000e+02 : f32
    %132 = vector.broadcast %cst_60 : f32 to vector<64x1xf32>
    %133 = arith.divf %131, %132 : vector<64x1xf32>
    %134 = vector.broadcast %126 : vector<64x1xf32> to vector<64x128xf32>
    %135 = arith.subf %118, %134 : vector<64x128xf32>
    %cst_61 = arith.constant 9.99999974E-6 : f32
    %136 = vector.broadcast %cst_61 : f32 to vector<64x1xf32>
    %137 = arith.addf %133, %136 : vector<64x1xf32>
    %138 = math.rsqrt %137 : vector<64x1xf32>
    %139 = vector.broadcast %138 : vector<64x1xf32> to vector<64x128xf32>
    %140 = arith.mulf %135, %139 : vector<64x128xf32>
    %141 = vector.broadcast %120 : vector<1x128xf32> to vector<64x128xf32>
    %142 = arith.mulf %140, %141 : vector<64x128xf32>
    %143 = vector.broadcast %122 : vector<1x128xf32> to vector<64x128xf32>
    %144 = arith.addf %142, %143 : vector<64x128xf32>
    %c0_62 = arith.constant 0 : index
    %c0_63 = arith.constant 0 : index
    %145 = vector.load %arg16[%c0_62, %c0_63] : memref<64x128xf32, #tpu.memory_space<vmem>>, vector<64x128xf32>
    tpu.vector_store %arg16[%c0_62, %c0_63], %144 {strides = array<i32>} : memref<64x128xf32, #tpu.memory_space<vmem>>, vector<64x128xf32>,
    return
  }
  func.func @transform_0(%arg0: i32, %arg1: i32) -> (i32, i32) {
    %c0_i32 = arith.constant 0 : i32
    %c0_i32_0 = arith.constant 0 : i32
    return %arg0, %c0_i32 : i32, i32
  }
  func.func @transform_1(%arg0: i32, %arg1: i32) -> (i32, i32, i32) {
    %c0_i32 = arith.constant 0 : i32
    %c0_i32_0 = arith.constant 0 : i32
    %c0_i32_1 = arith.constant 0 : i32
    return %arg1, %c0_i32, %c0_i32_0 : i32, i32, i32
  }
  func.func @transform_2(%arg0: i32, %arg1: i32) -> (i32, i32, i32) {
    %c0_i32 = arith.constant 0 : i32
    %c0_i32_0 = arith.constant 0 : i32
    %c0_i32_1 = arith.constant 0 : i32
    return %arg1, %c0_i32, %c0_i32_0 : i32, i32, i32
  }
  func.func @transform_3(%arg0: i32, %arg1: i32) -> (i32, i32, i32) {
    %c0_i32 = arith.constant 0 : i32
    %c0_i32_0 = arith.constant 0 : i32
    %c0_i32_1 = arith.constant 0 : i32
    return %arg1, %c0_i32, %c0_i32_0 : i32, i32, i32
  }
  func.func @transform_4(%arg0: i32, %arg1: i32) -> (i32, i32, i32) {
    %c0_i32 = arith.constant 0 : i32
    %c0_i32_0 = arith.constant 0 : i32
    %c0_i32_1 = arith.constant 0 : i32
    return %arg1, %c0_i32, %c0_i32_0 : i32, i32, i32
  }
  func.func @transform_5(%arg0: i32, %arg1: i32) -> (i32, i32, i32) {
    %c0_i32 = arith.constant 0 : i32
    %c0_i32_0 = arith.constant 0 : i32
    %c0_i32_1 = arith.constant 0 : i32
    return %arg1, %c0_i32, %c0_i32_0 : i32, i32, i32
  }
  func.func @transform_6(%arg0: i32, %arg1: i32) -> (i32, i32, i32) {
    %c0_i32 = arith.constant 0 : i32
    %c0_i32_0 = arith.constant 0 : i32
    %c0_i32_1 = arith.constant 0 : i32
    return %arg1, %c0_i32, %c0_i32_0 : i32, i32, i32
  }
  func.func @transform_7(%arg0: i32, %arg1: i32) -> (i32, i32, i32) {
    %c0_i32 = arith.constant 0 : i32
    %c0_i32_0 = arith.constant 0 : i32
    %c0_i32_1 = arith.constant 0 : i32
    return %arg1, %c0_i32, %c0_i32_0 : i32, i32, i32
  }
  func.func @transform_8(%arg0: i32, %arg1: i32) -> (i32, i32, i32) {
    %c0_i32 = arith.constant 0 : i32
    %c0_i32_0 = arith.constant 0 : i32
    %c0_i32_1 = arith.constant 0 : i32
    return %arg1, %c0_i32, %c0_i32_0 : i32, i32, i32
  }
  func.func @transform_9(%arg0: i32, %arg1: i32) -> (i32, i32, i32) {
    %c0_i32 = arith.constant 0 : i32
    %c0_i32_0 = arith.constant 0 : i32
    %c0_i32_1 = arith.constant 0 : i32
    return %arg1, %c0_i32, %c0_i32_0 : i32, i32, i32
  }
  func.func @transform_10(%arg0: i32, %arg1: i32) -> (i32, i32, i32) {
    %c0_i32 = arith.constant 0 : i32
    %c0_i32_0 = arith.constant 0 : i32
    %c0_i32_1 = arith.constant 0 : i32
    return %arg1, %c0_i32, %c0_i32_0 : i32, i32, i32
  }
  func.func @transform_11(%arg0: i32, %arg1: i32) -> (i32, i32) {
    %c0_i32 = arith.constant 0 : i32
    %c0_i32_0 = arith.constant 0 : i32
    %c0_i32_1 = arith.constant 0 : i32
    return %c0_i32, %c0_i32_0 : i32, i32
  }
  func.func @transform_12(%arg0: i32, %arg1: i32) -> (i32, i32) {
    %c0_i32 = arith.constant 0 : i32
    %c0_i32_0 = arith.constant 0 : i32
    %c0_i32_1 = arith.constant 0 : i32
    return %c0_i32, %c0_i32_0 : i32, i32
  }
  func.func @transform_13(%arg0: i32, %arg1: i32) -> (i32, i32) {
    %c0_i32 = arith.constant 0 : i32
    %c0_i32_0 = arith.constant 0 : i32
    %c0_i32_1 = arith.constant 0 : i32
    return %c0_i32, %c0_i32_0 : i32, i32
  }
  func.func @transform_14(%arg0: i32, %arg1: i32) -> (i32, i32) {
    %c0_i32 = arith.constant 0 : i32
    %c0_i32_0 = arith.constant 0 : i32
    return %arg0, %c0_i32 : i32, i32
  }
}

</mosaic_0001>

<bundles_post_ra>
// kernel: tpu_custom_call.1
= control target key start
LH: loop header
LB: loop body
LE: loop exit
PB: predicated region body
PF: predicated region fallthrough
CT: control target
= control target key end

     0   :  { %s6207_s0 = inlined_call_operand.vmem [shape: f32[64,128], index: 0, kind: input, shape index: {}]   ;;  %s6208_s1 = inlined_call_operand.vmem [shape: bf16[2,128,384], index: 1, kind: input, shape index: {}]   ;;  %s6209_s2 = inlined_call_operand.hbm [shape: f32[2,1,384], index: 2, kind: input, shape index: {}]   ;;  %s6210_s3 = inlined_call_operand.vmem [shape: bf16[2,128,256], index: 3, kind: input, shape index: {}]   ;;  %s6211_s4 = inlined_call_operand.vmem [shape: f32[2,1,256], index: 4, kind: input, shape index: {}]   ;;  %s6212_s5 = inlined_call_operand.hbm [shape: bf16[2,256,128], index: 5, kind: input, shape index: {}]   ;;  %s6213_s6 = inlined_call_operand.vmem [shape: f32[2,1,128], index: 6, kind: input, shape index: {}]   ;;  %s6214_s7 = inlined_call_operand.vmem [shape: f32[2,1,128], index: 7, kind: input, shape index: {}]   ;;  %s6215_s8 = inlined_call_operand.vmem [shape: f32[2,1,128], index: 8, kind: input, shape index: {}]   ;;  %s6216_s9 = inlined_call_operand.vmem [shape: f32[2,1,128], index: 9, kind: input, shape index: {}]   ;;  %s6217_s10 = inlined_call_operand.vmem [shape: f32[2,1,128], index: 10, kind: input, shape index: {}]   ;;  %s6218_s11 = inlined_call_operand.vmem [shape: bf16[1024,64], index: 11, kind: input, shape index: {}]   ;;  %s6219_s12 = inlined_call_operand.hbm [shape: bf16[64,1024], index: 12, kind: input, shape index: {}]   ;;  %s6220_s13 = inlined_call_operand.vmem [shape: bf16[128,128], index: 13, kind: input, shape index: {}]   ;;  %s6221_s14 = inlined_call_operand.hbm [shape: f32[64,128], index: 14, kind: output, shape index: {}]  }
   0x1   :  { %6239 = sst [smem:[#allocation20_spill]] %s6207_s0 }
   0x2   :  { %6240 = sst [smem:[#allocation21_spill]] %s6208_s1 }
   0x3   :  { %6241 = sst [smem:[#allocation22_spill]] %s6209_s2 }
   0x4   :  { %6242 = sst [smem:[#allocation23_spill]] %s6210_s3 }
   0x5   :  { %6243 = sst [smem:[#allocation24_spill]] %s6212_s5 }
   0x6   :  { %6244 = sst [smem:[#allocation25_spill]] %s6218_s11 }
   0x7   :  { %6245 = sst [smem:[#allocation26_spill]] %s6219_s12 }
   0x8   :  { %6246 = sst [smem:[#allocation27_spill]] %s6220_s13 }
   0x9   :  { %6247 = sst [smem:[#allocation28_spill]] %s6221_s14 }
   0xa   :  { %19 = vsyncpa [#allocation3], 0 }
   0xb   :  { %21 = vsyncpa [#allocation3 + $0x1], 0 }
   0xc   :  { %22 = vsyncpa [#allocation6], 0 }
   0xd   :  { %24 = vsyncpa [#allocation6 + $0x1], 0 }
   0xe   :  { %25 = vsyncpa [#allocation4], 0  ;;  %s4825_s29 = smov 0   ;;  %s4827_s30 = smov 0  }
   0xf   :  { %s4829_s15 = smov 0   ;;  %s4831_s16 = smov 0  }
  0x10   :  { %s4833_s17 = smov 0   ;;  %s4835_s18 = smov 0  }
  0x11 LB: > { %6248 = sst [smem:[#allocation13_spill]] %s4714_s30  ;;  %s4854_s19 = sadd.s32 4294967295, %s4730_s18   ;;  %s4730_s18 = sphi %s4835_s18, %s31_s18   ;;  %s4726_s17 = sphi %s4833_s17, %s6287_s17   ;;  %s4722_s16 = sphi %s4831_s16, %s6286_s16   ;;  %s4718_s15 = sphi %s4829_s15, %s6285_s15   ;;  %s4714_s30 = sphi %s4827_s30, %s6284_s30   ;;  %s4710_s29 = sphi %s4825_s29, %s6283_s29  }
  0x12   : > { %6249 = sst [smem:[#allocation14_spill]] %s4718_s15  ;;  %p115_p0 = scmp.ne.s32.totalorder %s4714_s30, %s4710_s29 }
  0x13   : > { %6250 = sst [smem:[#allocation15_spill]] %s4726_s17  ;;  %p6225_p1 = scmp.eq.s32.totalorder %s4854_s19, 0 }
  0x14   : > { %p3775_p2 = scmp.ge.s32.totalorder %s4730_s18, 1  ;;  %p423_p3 = scmp.lt.s32.totalorder %s4730_s18, 3 }
  0x15   : > { %p4862_p4 = por %p6225_p1, %p115_p0  ;;  %s4732_s22 = smov [#allocation7]  }
  0x16   : > { %p4866_p5 = pnand %p3775_p2, %p423_p3  ;;  %s447_s23 = sshll.u32 %s4732_s22, 4  ;;  %s448_s23 = int_to_ptr.vmem [resolvable:$true] %s447_s23 }
  0x17   : > { %s6251_s20 = scalar_select %p4862_p4, 1, 0 }
  0x18   : > { %s6252_s21 = scalar_select %p4866_p5, 1, 0 }
  0x19   : > { %p4274_p6 = pneg %p4866_p5  ;;  %s40_s25 = sadd.s32 1, %s4726_s17 }
  0x1a   : > { %s6254_s12 = sld [smem:[#allocation26_spill]] }
  0x1b   : > { %p4874_p7 = pnand %p4274_p6, %p6225_p1 }
  0x1d   : > { %p4556_p9 = pneg %p4874_p7 }
  0x20   : > { %s4554_s28 = scalar_lea.hbm %s6254_s12, 4096 }
  0x21   : > { %p4555_p8 = scmp.ne.s32.totalorder %s6254_s12, %s4554_s28  ;;  %p4561_p12 = scmp.lt.u32.totalorder %s4554_s28, %s6254_s12 }
  0x23   : > { %p4557_p10 = pnand %p4556_p9, %p4555_p8 }
  0x25   : > { %p4558_p11 = pneg %p4557_p10 }
  0x27   : > { %p4563_p13 = pnand %p4561_p12, %p4558_p11 }
  0x29   : > { %4566 = shalt.err (!%p4563_p13)
}
  0x2a   : > { %s4567_s11 = scalar_lea.vmem %s448_s23, 4096  ;;  %p4575_p6 = scmp.lt.s32.totalorder %s448_s23, %s448_s23 }
  0x2b   : > { %p4568_p0 = scmp.ne.s32.totalorder %s448_s23, %s4567_s11  ;;  %p4576_p1 = scmp.lt.s32.totalorder %s4567_s11, %s4567_s11 }
  0x2d   : > { %p4570_p2 = pnand %p4568_p0, %p4556_p9  ;;  %p4577_p4 = por %p4576_p1, %p4575_p6 }
  0x2f   : > { %p4571_p3 = pneg %p4570_p2 }
  0x31   : > { %p4578_p5 = pnand %p4577_p4, %p4571_p3 }
  0x33   : > { %4581 = shalt.err (!%p4578_p5)
}
  0x34   : > { %s4733_s14 = smov 512   ;;  %s4734_s13 = smov 32  }
  0x35   : > { %4277 = dma.hbm_to_vmem [thread:$0]  (!%p4874_p7), %s6254_s12, 4096, %s448_s23, [#allocation6], %s4733_s14, %s4733_s14, %s4734_s13  }
  0x36   : > { %p41_p1 = scmp.ge.s32.totalorder %s40_s25, 2  ;;  %s102_s11 = sadd.s32 1, %s4718_s15 }
  0x37   : > { %p109_p4 = scmp.ne.s32.totalorder %s4718_s15, %s4714_s30  ;;  %p110_p5 = scmp.eq.s32.totalorder %s4730_s18, 0 }
  0x38   : > { %s6289_s25 = smov (%p41_p1, %s40_s25), 0  ;;  %p4286_p9 = scmp.lt.s32.totalorder %s4730_s18, 2 }
  0x39   : > { %6255 = sst [smem:[#allocation16_spill]] %s6289_s25  ;;  %p111_p8 = por %p110_p5, %p109_p4 }
  0x3a   : > { %s99_s28 = ssub.s32 %s4726_s17, %s6289_s25  ;;  %s4905_s29 = sand.u32 1, %s4718_s15  }
  0x3b   : > { %p100_p10 = scmp.eq.s32.totalorder %s99_s28, 0  ;;  %s4258_s24 = smul.u32 3, %s4905_s29 }
  0x3c   : > { %p4908_p11 = pnand %p4286_p9, %p111_p8  ;;  %s4259_s14 = smul.u32 48, %s4726_s17 }
  0x3d   : > { %s4913_s23 = scalar_select %p100_p10, %s4718_s15, %s102_s11  }
  0x3e   : > { %s476_s13 = scalar_lea.vmem [#allocation2], %s4258_s24  ;;  %s6258_s2 = sld [smem:[#allocation22_spill]] }
  0x3f   : > { %6257 = sst [smem:[#allocation17_spill]] %s4913_s23  ;;  %s484_s26 = sshll.u32 %s476_s13, 4  ;;  %s4921_s26 = int_to_ptr.vmem [resolvable:$true] %s484_s26 }
  0x40   : > { %s473_s28 = scalar_lea.sflag [#allocation3], %s4905_s29  ;;  %p4584_p12 = pneg %p4908_p11 }
  0x44   : > { %s4919_s25 = scalar_lea.hbm %s6258_s2, %s4259_s14  ;;  %s4587_s12 = scalar_lea.hbm %s6258_s2, 96 }
  0x45   : > { %s4582_s0 = scalar_lea.hbm %s4919_s25, 48  ;;  %p4588_p2 = scmp.lt.u32.totalorder %s4919_s25, %s6258_s2 }
  0x46   : > { %p4583_p7 = scmp.ne.s32.totalorder %s4919_s25, %s4582_s0  ;;  %p4589_p3 = scmp.lt.u32.totalorder %s4587_s12, %s4582_s0 }
  0x47   : > { %p4591_p1 = scmp.lt.u32.totalorder %s4582_s0, %s4919_s25 }
  0x48   : > { %p4585_p13 = pnand %p4584_p12, %p4583_p7  ;;  %p4590_p6 = por %p4589_p3, %p4588_p2 }
  0x4a   : > { %p4586_p0 = pneg %p4585_p13  ;;  %p4592_p4 = por %p4591_p1, %p4590_p6 }
  0x4c   : > { %p4593_p5 = pnand %p4592_p4, %p4586_p0 }
  0x4e   : > { %4596 = shalt.err (!%p4593_p5)
}
  0x4f   : > { %s4597_s27 = scalar_lea.vmem %s4921_s26, 48  ;;  %s4735_s11 = smov [#allocation2]  }
  0x50   : > { %p4598_p8 = scmp.ne.s32.totalorder %s4921_s26, %s4597_s27  ;;  %s4602_s24 = sshll.u32 %s4735_s11, 4  ;;  %s4603_s24 = int_to_ptr.vmem [resolvable:$false] %s4602_s24 }
  0x51   : > { %s4604_s14 = scalar_lea.vmem %s4603_s24, 96  ;;  %p4605_p7 = scmp.lt.s32.totalorder %s4921_s26, %s4603_s24 }
  0x52   : > { %p4600_p9 = pnand %p4598_p8, %p4584_p12  ;;  %p4606_p13 = scmp.lt.s32.totalorder %s4604_s14, %s4597_s27 }
  0x54   : > { %p4601_p10 = pneg %p4600_p9  ;;  %p4607_p2 = por %p4606_p13, %p4605_p7 }
  0x56   : > { %p4608_p3 = pnand %p4607_p2, %p4601_p10 }
  0x58   : > { %4611 = shalt.err (!%p4608_p3)
}
  0x59   : > { %4281 = dma.hbm_to_vmem [thread:$0]  (!%p4908_p11), %s4919_s25, 48, %s4921_s26, %s473_s28  }
  0x5a   : > { %s3780_s0 = sshll.u32 %s4905_s29, 7  ;;  %s506_s12 = sand.u32 1, %s4730_s18  }
  0x5b   : > { %s510_s13 = scalar_lea.vmem [#allocation5], %s3780_s0  ;;  %s3976_s2 = sshll.u32 %s4726_s17, 11 }
  0x5c   : > { %s517_s11 = sshll.u32 %s510_s13, 4  ;;  %s6259_s5 = sld [smem:[#allocation24_spill]]  ;;  %s4952_s11 = int_to_ptr.vmem [resolvable:$true] %s517_s11 }
  0x5d   : > { %s4959_s23 = scalar_lea.sflag [#allocation6], %s506_s12 }
  0x62   : > { %s4957_s14 = scalar_lea.hbm %s6259_s5, %s3976_s2  ;;  %s4617_s26 = scalar_lea.hbm %s6259_s5, 4096 }
  0x63   : > { %s4612_s15 = scalar_lea.hbm %s4957_s14, 2048  ;;  %p4618_p4 = scmp.lt.u32.totalorder %s4957_s14, %s6259_s5 }
  0x64   : > { %p4613_p0 = scmp.ne.s32.totalorder %s4957_s14, %s4612_s15  ;;  %p4619_p5 = scmp.lt.u32.totalorder %s4617_s26, %s4612_s15 }
  0x65   : > { %p4621_p9 = scmp.lt.u32.totalorder %s4612_s15, %s4957_s14 }
  0x66   : > { %p4615_p6 = pnand %p4613_p0, %p4584_p12  ;;  %p4620_p8 = por %p4619_p5, %p4618_p4 }
  0x68   : > { %p4616_p1 = pneg %p4615_p6  ;;  %p4622_p10 = por %p4621_p9, %p4620_p8 }
  0x6a   : > { %p4623_p7 = pnand %p4622_p10, %p4616_p1 }
  0x6c   : > { %4626 = shalt.err (!%p4623_p7)
}
  0x6d   : > { %s4627_s2 = scalar_lea.vmem %s4952_s11, 2048  ;;  %s4736_s12 = smov [#allocation5]  }
  0x6e   : > { %p4628_p13 = scmp.ne.s32.totalorder %s4952_s11, %s4627_s2  ;;  %s4632_s13 = sshll.u32 %s4736_s12, 4  ;;  %s4633_s13 = int_to_ptr.vmem [resolvable:$false] %s4632_s13 }
  0x6f   : > { %s4634_s27 = scalar_lea.vmem %s4633_s13, 4096  ;;  %p4635_p0 = scmp.lt.s32.totalorder %s4952_s11, %s4633_s13 }
  0x70   : > { %p4630_p2 = pnand %p4628_p13, %p4584_p12  ;;  %p4636_p6 = scmp.lt.s32.totalorder %s4634_s27, %s4627_s2 }
  0x72   : > { %p4631_p3 = pneg %p4630_p2  ;;  %p4637_p4 = por %p4636_p6, %p4635_p0 }
  0x74   : > { %p4638_p5 = pnand %p4637_p4, %p4631_p3 }
  0x76   : > { %4641 = shalt.err (!%p4638_p5)
}
  0x77   : > { %s4737_s15 = smov 64   ;;  %s4738_s24 = smov 4  }
  0x78   : > { %4284 = dma.hbm_to_vmem [thread:$0]  (!%p4908_p11), %s4957_s14, 2048, %s4952_s11, %s4959_s23, %s4737_s15, %s4737_s15, %s4738_s24  }
  0x79   : > { %p6260_p12 = scmp.ne.s32.totalorder %s6252_s21, 0 }
  0x7b   : > { %559 = sbr.rel (%p6260_p12) target bundleno = 2463 (0x99f), region = 76 }
  0x82   : > { %s561_s25 = sand.u32 1, %s4714_s30   ;;  %p6261_p1 = scmp.ne.s32.totalorder %s6251_s20, 0 }
  0x83   : > { %s4260_s29 = smul.u32 3, %s561_s25  ;;  %s562_s26 = scalar_lea.sflag [#allocation3], %s561_s25 }
  0x85   : > { %s4988_s28 = scalar_lea.vmem [#allocation2], %s4260_s29 }
  0x86   : > { %4693 = dma.done.wait (%p6261_p1), %s562_s26, 48  }
  0x87   : > { %4695 = vsyncadd (%p6261_p1), %s562_s26, 4294967248  ;;  %s570_s0 = sand.u32 1, %s4854_s19   ;;  %s3784_s22 = sshll.u32 %s561_s25, 7 }
  0x88   : > { %s571_s23 = scalar_lea.sflag [#allocation6], %s570_s0  ;;  %s4995_s11 = scalar_lea.vmem [#allocation5], %s3784_s22 }
  0x89   : > { %4697 = dma.done.wait (%p6261_p1), %s571_s23, 2048  }
  0x8a   : > { %4699 = vsyncadd (%p6261_p1), %s571_s23, 4294965248  ;;  %p6262_p11 = scmp.eq.s32.totalorder %s4854_s19, 0 }
  0x8c   : > { %4701 = dma.done.wait (%p6262_p11), [#allocation6], 4096   ;;  %p6263_p8 = pmov %p6262_p11 }
  0x8d   : > { %p663_p9 = scmp.lt.s32.totalorder %s4722_s16, 1  ;;  %s6264_s3 = sld [smem:[#allocation23_spill]] }
  0x8e   : > { %4703 = vsyncadd (%p6263_p8), [#allocation6], 4294963200  ;;  %s6265_s1 = sld [smem:[#allocation21_spill]]  ;;  %p3790_p10 = scmp.ne.s32.totalorder %s4722_s16, 0 }
  0x8f   : > { %s5007_s21 = scalar_select %p663_p9, %s4722_s16, 1 }
  0x90   : > { %697 = sbr.rel (%p3790_p10) target bundleno = 155 (0x9b), region = 92  ;;  %s6266_s23 = sld [smem:[#allocation20_spill]] (!%p3790_p10) }
  0x91   : > { %s4261_s20 = smul.u32 192, %s5007_s21  ;;  %s3977_s14 = sshll.u32 %s5007_s21, 7 }
  0x92   : > { %s3789_s27 = sshll.u32 %s5007_s21, 1 }
  0x93   : > { %s5014_s13 = scalar_lea.vmem %s6264_s3, %s3977_s14  ;;  %s5025_s0 = scalar_lea.vmem %s6211_s4, %s3789_s27 }
  0x94   : > { %s5020_s25 = scalar_lea.vmem %s6265_s1, %s4261_s20  ;;  %s682_s14 = scalar_lea.vmem %s6214_s7, %s5007_s21 }
  0x95   : > { %s685_s3 = scalar_lea.vmem %s6215_s8, %s5007_s21 }
  0x96   : > { %v698_v0 = vld [vmem:[%s6266_s23] sm:$0xff] (!%p3790_p10)  ;;  %v699_v1 = vld [vmem:[%s6266_s23 + $0x8] sm:$0xff] (!%p3790_p10)  ;;  %v700_v2 = vld [vmem:[%s6266_s23 + $0x10] sm:$0xff] (!%p3790_p10) }
  0x97   : > { %706 = vst [vmem:[#allocation8] sm:$0xff] %v698_v0  ;;  %707 = vst [vmem:[#allocation8 + $0x8] sm:$0xff] %v699_v1  ;;  %v701_v3 = vld [vmem:[%s6266_s23 + $0x18] sm:$0xff]  ;;  %v702_v4 = vld [vmem:[%s6266_s23 + $0x20] sm:$0xff] }
  0x98   : > { %708 = vst [vmem:[#allocation8 + $0x10] sm:$0xff] %v700_v2  ;;  %v703_v5 = vld [vmem:[%s6266_s23 + $0x28] sm:$0xff]  ;;  %709 = vst [vmem:[#allocation8 + $0x18] sm:$0xff] %v701_v3  ;;  %v704_v6 = vld [vmem:[%s6266_s23 + $0x30] sm:$0xff] }
  0x99   : > { %710 = vst [vmem:[#allocation8 + $0x20] sm:$0xff] %v702_v4  ;;  %711 = vst [vmem:[#allocation8 + $0x28] sm:$0xff] %v703_v5  ;;  %v705_v7 = vld [vmem:[%s6266_s23 + $0x38] sm:$0xff] }
  0x9a   : > { %712 = vst [vmem:[#allocation8 + $0x30] sm:$0xff] %v704_v6  ;;  %713 = vst [vmem:[#allocation8 + $0x38] sm:$0xff] %v705_v7 }
  0x9b PF: > { %v4354_v8 = vld [vmem:[%s5020_s25 + $0x4] ss:$12 sps:$4 sm:$0xff]   ;;  %v4356_v9 = vld [vmem:[%s5020_s25] ss:$12 sps:$4 sm:$0xff]   ;;  %v6235_v10 = vmov 0   ;;  %s6267_s15 = sld [smem:[#allocation25_spill]]  ;;  %v760_v56 = vlaneseq  ;;  %s6279_s2 = scalar_lea.vmem %s6216_s9, %s5007_s21 }
  0x9c   : > { %935 = vmatprep.mubr.bf16.mxu0 %v6235_v10  ;;  %903 = vmatprep.subr.bf16.mxu0 %v4354_v8  ;;  %v4357_v11 = vld [vmem:[%s5020_s25 + $0x1c] ss:$12 sps:$4 sm:$0xff]   ;;  %v4359_v12 = vld [vmem:[%s5020_s25 + $0x18] ss:$12 sps:$4 sm:$0xff]   ;;  %v4360_v13 = vld [vmem:[%s5020_s25 + $0x34] ss:$12 sps:$4 sm:$0xff]   ;;  %s6280_s12 = scalar_lea.vmem %s6217_s10, %s5007_s21 }
  0x9d   : > { %904 = vmatpush1.bf16.msra.mxu0 %v4356_v9  ;;  %v4362_v14 = vld [vmem:[%s5020_s25 + $0x30] ss:$12 sps:$4 sm:$0xff]   ;;  %v4363_v15 = vld [vmem:[%s5020_s25 + $0x4c] ss:$12 sps:$4 sm:$0xff]   ;;  %v4365_v17 = vld [vmem:[%s5020_s25 + $0x48] ss:$12 sps:$4 sm:$0xff]  }
  0x9e   : > { %905 = vmatprep.subr.bf16.mxu0 %v4357_v11  ;;  %v4366_v19 = vld [vmem:[%s5020_s25 + $0x64] ss:$12 sps:$4 sm:$0xff]   ;;  %v4368_v21 = vld [vmem:[%s5020_s25 + $0x60] ss:$12 sps:$4 sm:$0xff]   ;;  %v4369_v22 = vld [vmem:[%s5020_s25 + $0x7c] ss:$12 sps:$4 sm:$0xff]  }
  0x9f   : > { %v4371_v23 = vld [vmem:[%s5020_s25 + $0x78] ss:$12 sps:$4 sm:$0xff]   ;;  %v4372_v24 = vld [vmem:[%s5020_s25 + $0x94] ss:$12 sps:$4 sm:$0xff]   ;;  %v4374_v25 = vld [vmem:[%s5020_s25 + $0x90] ss:$12 sps:$4 sm:$0xff]  }
  0xa0   : > { %v4375_v26 = vld [vmem:[%s5020_s25 + $0xac] ss:$12 sps:$4 sm:$0xff]   ;;  %v4377_v27 = vld [vmem:[%s5020_s25 + $0xa8] ss:$12 sps:$4 sm:$0xff]   ;;  %v717_v29 = vld [vmem:[#allocation8 + $0x18] sm:$0xff]  ;;  %v5136_v58 = vshrl.u32 %v760_v56, 7 }
  0xa1   : > { %906 = vmatpush1.bf16.msra.mxu0 %v4359_v12  ;;  %v716_v28 = vld [vmem:[#allocation8 + $0x10] sm:$0xff]  ;;  %v718_v31 = vld [vmem:[#allocation8 + $0x20] sm:$0xff]  ;;  %v719_v32 = vld [vmem:[#allocation8 + $0x28] sm:$0xff]  ;;  %s6268_s20 = smov %s6267_s15  ;;  %s4741_s30 = smov 16   ;;  %vm2233_vm0 = vcmask 523264  }
  0xa2   : > { %907 = vmatprep.subr.bf16.mxu0 %v4360_v13  ;;  %v714_v16 = vld [vmem:[#allocation8] sm:$0xff]  ;;  %v715_v18 = vld [vmem:[#allocation8 + $0x8] sm:$0xff]  ;;  %v723_v30 = vpack.c.bf16 %v717_v29, %v716_v28  ;;  %v724_v33 = vpack.c.bf16 %v719_v32, %v718_v31  ;;  %v720_v34 = vld [vmem:[#allocation8 + $0x30] sm:$0xff]  ;;  %6269 = vst [vmem:[#allocation18_spill] sm:$0xff] %v5136_v58  ;;  %v6234_v63 = vsub.s32 0, %v5136_v58  ;;  %v6233_v2 = vsub.s32 1, %v5136_v58 }
  0xa3   : > { %v722_v20 = vpack.c.bf16 %v715_v18, %v714_v16  ;;  %v721_v35 = vld [vmem:[#allocation8 + $0x38] sm:$0xff]  ;;  %v4378_v37 = vld [vmem:[%s5020_s25 + $0x8] ss:$12 sps:$4 sm:$0xff]   ;;  %s4744_s16 = smov 64   ;;  %s4745_s29 = smov 112  }
  0xa4   : > { %v725_v36 = vpack.c.bf16 %v721_v35, %v720_v34  ;;  %4202 = vmatprep.subr.bf16.mxu1 %v4378_v37  ;;  %v4379_v38 = vld [vmem:[%s5020_s25 + $0x20] ss:$12 sps:$4 sm:$0xff]   ;;  %v4380_v39 = vld [vmem:[%s5020_s25 + $0x38] ss:$12 sps:$4 sm:$0xff]   ;;  %v4381_v40 = vld [vmem:[%s5020_s25 + $0x50] ss:$12 sps:$4 sm:$0xff]  }
  0xa5   : > { %908 = vmatpush1.bf16.msra.mxu0 %v4362_v14  ;;  %4218 = vmatprep.mubr.bf16.mxu1 %v722_v20  ;;  %v4382_v41 = vld [vmem:[%s5020_s25 + $0x68] ss:$12 sps:$4 sm:$0xff]   ;;  %v4383_v42 = vld [vmem:[%s5020_s25 + $0x80] ss:$12 sps:$4 sm:$0xff]   ;;  %v4384_v43 = vld [vmem:[%s5020_s25 + $0x98] ss:$12 sps:$4 sm:$0xff]  }
  0xa6   : > { %909 = vmatprep.subr.bf16.mxu0 %v4363_v15  ;;  %4203 = vmatpush3.bf16.msra.mxu1 %v4378_v37  ;;  %v4385_v44 = vld [vmem:[%s5020_s25 + $0xb0] ss:$12 sps:$4 sm:$0xff]   ;;  %v4386_v45 = vld [vmem:[%s6267_s15 + $0xc0] sm:$0xff]   ;;  %v4388_v47 = vld [vmem:[%s6268_s20 + $0xc8] sm:$0xff]   ;;  %s4742_s15 = smov 32   ;;  %s4743_s25 = smov 80  }
  0xa7   : > { %4204 = vmatprep.subr.bf16.mxu1 %v4379_v38  ;;  %v4387_v46 = vld [vmem:[%s6268_s20 + $0x80] sm:$0xff]   ;;  %v4389_v48 = vld [vmem:[%s6268_s20 + $0x88] sm:$0xff]   ;;  %v4390_v49 = vld [vmem:[%s6268_s20 + $0xd0] sm:$0xff]   ;;  %s4746_s26 = smov 96   ;;  %p4288_p7 = scmp.eq.s32.totalorder %s4854_s19, 1 }
  0xa8   : > { %v4391_v50 = vld [vmem:[%s6268_s20 + $0x90] sm:$0xff]   ;;  %v4392_v51 = vld [vmem:[%s6268_s20 + $0xd8] sm:$0xff]   ;;  %v4394_v53 = vld [vmem:[%s6268_s20 + $0xe0] sm:$0xff]  }
  0xa9   : > { %910 = vmatpush1.bf16.msra.mxu0 %v4365_v17  ;;  %v4393_v52 = vld [vmem:[%s6268_s20 + $0x98] sm:$0xff]   ;;  %v4395_v54 = vld [vmem:[%s6268_s20 + $0x40] sm:$0xff]   ;;  %v4398_v59 = vld [vmem:[%s6268_s20 + $0xe8] sm:$0xff]  }
  0xaa   : > { %911 = vmatprep.subr.bf16.mxu0 %v4366_v19  ;;  %4205 = vmatpush3.bf16.msra.mxu1 %v4379_v38  ;;  %v4396_v55 = vld [vmem:[%s6268_s20 + $0xa0] sm:$0xff]   ;;  %v4399_v60 = vld [vmem:[%s6268_s20 + $0x48] sm:$0xff]   ;;  %v4402_v0 = vld [vmem:[%s6268_s20 + $0xf0] sm:$0xff]  }
  0xab   : > { %4206 = vmatprep.subr.bf16.mxu1 %v4380_v39  ;;  %v4397_v57 = vld [vmem:[%s6268_s20] sm:$0xff]   ;;  %v4400_v61 = vld [vmem:[%s6268_s20 + $0xa8] sm:$0xff]   ;;  %v4403_v3 = vld [vmem:[%s6268_s20 + $0x50] sm:$0xff]  }
  0xac   : > { %v4401_v62 = vld [vmem:[%s6268_s20 + $0x8] sm:$0xff]   ;;  %v5155_v1 = vld [vmem:[%s4988_s28] sm:$0x7]  ;;  %v4404_v4 = vld [vmem:[%s6268_s20 + $0xb0] sm:$0xff]   ;;  %s4740_s28 = smov 48  }
  0xad   : > { %912 = vmatpush1.bf16.msra.mxu0 %v4368_v21  ;;  %v4405_v5 = vld [vmem:[%s6268_s20 + $0x10] sm:$0xff]   ;;  %v5170_v6 = vrot.slane %v5155_v1, %v6234_v63  ;;  %v4406_v7 = vld [vmem:[%s6268_s20 + $0xf8] sm:$0xff]   ;;  %v5178_v8 = vrot.slane %v5155_v1, %v6233_v2  ;;  %v4410_v18 = vld [vmem:[%s6268_s20 + $0x60] sm:$0xff]  }
  0xae   : > { %913 = vmatprep.subr.bf16.mxu0 %v4369_v22  ;;  %4207 = vmatpush3.bf16.msra.mxu1 %v4380_v39  ;;  %v4407_v9 = vld [vmem:[%s6268_s20 + $0x58] sm:$0xff]   ;;  %v4411_v22 = vld [vmem:[%s6268_s20 + $0x20] sm:$0xff]   ;;  %v4414_v35 = vld [vmem:[%s6268_s20 + $0x70] sm:$0xff]  }
  0xaf   : > { %4208 = vmatprep.subr.bf16.mxu1 %v4381_v40  ;;  %v4408_v11 = vld [vmem:[%s6268_s20 + $0xb8] sm:$0xff]   ;;  %v4415_v39 = vld [vmem:[%s6268_s20 + $0x30] sm:$0xff]  }
  0xb0   : > { %v4409_v12 = vld [vmem:[%s6268_s20 + $0x18] sm:$0xff]  }
  0xb1   : > { %914 = vmatpush1.bf16.msra.mxu0 %v4371_v23 }
  0xb2   : > { %915 = vmatprep.subr.bf16.mxu0 %v4372_v24  ;;  %4209 = vmatpush3.bf16.msra.mxu1 %v4381_v40 }
  0xb3   : > { %4210 = vmatprep.subr.bf16.mxu1 %v4382_v41 }
  0xb5   : > { %916 = vmatpush1.bf16.msra.mxu0 %v4374_v25  ;;  %v4412_v25 = vld [vmem:[%s6268_s20 + $0x68] sm:$0xff]  }
  0xb6   : > { %917 = vmatprep.subr.bf16.mxu0 %v4375_v26  ;;  %4211 = vmatpush3.bf16.msra.mxu1 %v4382_v41  ;;  %v4413_v26 = vld [vmem:[%s6268_s20 + $0x28] sm:$0xff]  }
  0xb7   : > { %4212 = vmatprep.subr.bf16.mxu1 %v4383_v42 }
  0xb9   : > { %918 = vmatpush1.bf16.msra.mxu0 %v4377_v27 }
  0xba   : > { %4213 = vmatpush3.bf16.msra.mxu1 %v4383_v42  ;;  %3990 = vmatprep.subr.bf16.mxu0 %v4395_v54 }
  0xbb   : > { %4214 = vmatprep.subr.bf16.mxu1 %v4384_v43 }
  0xbc   : > { %936 = vmatmul.mubr.bf16.vlgmr.msra.gmra.mrb[0].mxu0 %v722_v20 }
  0xbd   : > { %945 = vmatprep.mubr.bf16.mxu0 %v6235_v10  ;;  %3991 = vmatpush3.bf16.msra.mxu0 %v4397_v57 }
  0xbe   : > { %4215 = vmatpush3.bf16.msra.mxu1 %v4384_v43  ;;  %3992 = vmatprep.subr.bf16.mxu0 %v4399_v60  ;;  %v4416_v43 = vld [vmem:[%s6268_s20 + $0x78] sm:$0xff]  }
  0xbf   : > { %4216 = vmatprep.subr.bf16.mxu1 %v4385_v44 }
  0xc1   : > { %3993 = vmatpush3.bf16.msra.mxu0 %v4401_v62 }
  0xc2   : > { %4217 = vmatpush3.bf16.msra.mxu1 %v4385_v44  ;;  %3994 = vmatprep.subr.bf16.mxu0 %v4403_v3  ;;  %v4417_v44 = vld [vmem:[%s6268_s20 + $0x38] sm:$0xff]  }
  0xc3   : > { %4030 = vmatprep.subr.bf16.mxu1 %v4386_v45 }
  0xc4   : > { %946 = vmatmul.mubr.bf16.gmra.mrb[4].mxu0 %v723_v30 }
  0xc5   : > { %955 = vmatprep.mubr.bf16.mxu0 %v6235_v10  ;;  %4219 = vmatmul.mubr.bf16.vlgmr.msra.gmra.mrb[0].mxu1 %v723_v30 }
  0xc6   : > { %4222 = vmatprep.mubr.bf16.mxu1 %v724_v33  ;;  %4031 = vmatpush3.bf16.msra.mxu1 %v4387_v46 }
  0xc7   : > { %4032 = vmatprep.subr.bf16.mxu1 %v4388_v47  ;;  %3995 = vmatpush3.bf16.msra.mxu0 %v4405_v5 }
  0xc8   : > { %3996 = vmatprep.subr.bf16.mxu0 %v4407_v9 }
  0xca   : > { %4033 = vmatpush3.bf16.msra.mxu1 %v4389_v48 }
  0xcb   : > { %4034 = vmatprep.subr.bf16.mxu1 %v4390_v49  ;;  %3997 = vmatpush3.bf16.msra.mxu0 %v4409_v12 }
  0xcc   : > { %956 = vmatmul.mubr.bf16.gmra.mrb[8].mxu0 %v724_v33  ;;  %3998 = vmatprep.subr.bf16.mxu0 %v4410_v18 }
  0xcd   : > { %965 = vmatprep.mubr.bf16.mxu0 %v6235_v10  ;;  %4223 = vmatmul.mubr.bf16.gmra.mrb[4].mxu1 %v725_v36 }
  0xce   : > { %4035 = vmatpush3.bf16.msra.mxu1 %v4391_v50 }
  0xcf   : > { %4036 = vmatprep.subr.bf16.mxu1 %v4392_v51  ;;  %3999 = vmatpush3.bf16.msra.mxu0 %v4411_v22 }
  0xd0   : > { %4000 = vmatprep.subr.bf16.mxu0 %v4412_v25 }
  0xd2   : > { %4037 = vmatpush3.bf16.msra.mxu1 %v4393_v52 }
  0xd3   : > { %4038 = vmatprep.subr.bf16.mxu1 %v4394_v53  ;;  %4001 = vmatpush3.bf16.msra.mxu0 %v4413_v26 }
  0xd4   : > { %966 = vmatmul.mubr.bf16.gmra.mrb[12].mxu0 %v725_v36  ;;  %4002 = vmatprep.subr.bf16.mxu0 %v4414_v35 }
  0xd6   : > { %4039 = vmatpush3.bf16.msra.mxu1 %v4396_v55 }
  0xd7   : > { %4040 = vmatprep.subr.bf16.mxu1 %v4398_v59  ;;  %4003 = vmatpush3.bf16.msra.mxu0 %v4415_v39  ;;  %v770_v39 = vsub.s32 2, %v5136_v58 }
  0xd8   : > { %4004 = vmatprep.subr.bf16.mxu0 %v4416_v43 }
  0xda   : > { %4041 = vmatpush3.bf16.msra.mxu1 %v4400_v61 }
  0xdb   : > { %4042 = vmatprep.subr.bf16.mxu1 %v4402_v0  ;;  %4005 = vmatpush3.bf16.msra.mxu0 %v4417_v44 }
  0xde   : > { %4043 = vmatpush3.bf16.msra.mxu1 %v4404_v4 }
  0xdf   : > { %4044 = vmatprep.subr.bf16.mxu1 %v4406_v7 }
  0xe2   : > { %4045 = vmatpush3.bf16.msra.mxu1 %v4408_v11 }
 0x18f   : > { %v937_v13 = vpop.f32.mrb[0].mxu0 }
 0x190   : > { %v938_v14 = vadd.f32 %v937_v13, %v5170_v6  ;;  %v939_v15 = vpop.f32.mrb[1].mxu0 }
 0x191   : > { %v5191_v16 = vadd.f32 %v939_v15, %v5178_v8  ;;  %v941_v17 = vpop.f32.mrb[2].mxu0  ;;  %v4422_v15 = vld [vmem:[%s6268_s20 + $0x1c0] sm:$0xff]  }
 0x192   : > { %v5196_v19 = vmul.f32 0.25, %v938_v14  ;;  %v942_v20 = vadd.f32 %v941_v17, %v5170_v6  ;;  %v943_v21 = vpop.f32.mrb[3].mxu0  ;;  %4110 = vmatprep.subr.bf16.mxu1 %v4422_v15  ;;  %v4439_v15 = vld [vmem:[%s6268_s20 + $0x1a0] sm:$0xff]  }
 0x193   : > { %v5203_v23 = vadd.f32 %v943_v21, %v5178_v8  ;;  %1105 = vrot.lane.b32.xlu1 %v5191_v16, %s4740_s28  ;;  %1057 = vrot.lane.b32.xlu0 %v5191_v16, %s4741_s30 }
 0x194   : > { %v5209_v24 = vmul.f32 0.25, %v942_v20  ;;  %v5219_v27 = vmul.f32 %v5196_v19, %v5191_v16 }
 0x196   : > { %v5223_v28 = vmul.f32 %v5209_v24, %v5203_v23 }
 0x197   : > { %1107 = vrot.lane.b32.xlu1 %v5203_v23, %s4740_s28  ;;  %1081 = vrot.lane.b32.xlu0 %v5191_v16, %s4742_s15  ;;  %v947_v29 = vpop.f32.mrb[4].mxu0 }
 0x198   : > { %v948_v30 = vadd.f32 %v947_v29, %v5170_v6  ;;  %v949_v31 = vpop.f32.mrb[5].mxu0  ;;  %v1225_v32 = vpack.c.bf16 %v5223_v28, %v5219_v27 }
 0x199   : > { %v5233_v33 = vadd.f32 %v949_v31, %v5178_v8  ;;  %v951_v34 = vpop.f32.mrb[6].mxu0  ;;  %v4423_v31 = vld [vmem:[%s6268_s20 + $0x180] sm:$0xff]  }
 0x19a   : > { %v5238_v36 = vmul.f32 0.25, %v948_v30  ;;  %v952_v37 = vadd.f32 %v951_v34, %v5170_v6  ;;  %v953_v38 = vpop.f32.mrb[7].mxu0  ;;  %v4426_v34 = vld [vmem:[%s6268_s20 + $0x1c8] sm:$0xff]  }
 0x19b   : > { %1083 = vrot.lane.b32.xlu1 %v5203_v23, %s4742_s15  ;;  %1153 = vrot.lane.b32.xlu0 %v5191_v16, %s4743_s25  ;;  %v5249_v40 = vadd.f32 %v953_v38, %v5178_v8  ;;  %v4427_v38 = vld [vmem:[%s6268_s20 + $0x188] sm:$0xff]  }
 0x19c   : > { %v5251_v41 = vmul.f32 0.25, %v952_v37  ;;  %v5255_v42 = vmul.f32 %v5238_v36, %v5233_v33 }
 0x19e   : > { %v5265_v45 = vmul.f32 %v5251_v41, %v5249_v40 }
 0x19f   : > { %1155 = vrot.lane.b32.xlu1 %v5203_v23, %s4743_s25  ;;  %1129 = vrot.lane.b32.xlu0 %v5191_v16, %s4744_s16  ;;  %v957_v46 = vpop.f32.mrb[8].mxu0 }
 0x1a0   : > { %v958_v47 = vadd.f32 %v957_v46, %v5170_v6  ;;  %v959_v48 = vpop.f32.mrb[9].mxu0  ;;  %v1233_v49 = vpack.c.bf16 %v5265_v45, %v5255_v42  ;;  %v4431_v46 = vld [vmem:[%s6268_s20 + $0x190] sm:$0xff]   ;;  %v4432_v42 = vld [vmem:[%s6268_s20 + $0x160] sm:$0xff]  }
 0x1a1   : > { %v5275_v50 = vadd.f32 %v959_v48, %v5178_v8  ;;  %v961_v51 = vpop.f32.mrb[10].mxu0  ;;  %v4434_v48 = vld [vmem:[%s6268_s20 + $0x1d8] sm:$0xff]  }
 0x1a2   : > { %v5277_v52 = vmul.f32 0.25, %v958_v47  ;;  %v962_v53 = vadd.f32 %v961_v51, %v5170_v6  ;;  %v963_v54 = vpop.f32.mrb[11].mxu0  ;;  %v5420_v47 = vrot.slane %v5155_v1, %v770_v39  ;;  %v4421_v39 = vld [vmem:[%s6268_s20 + $0x108] sm:$0xff]  }
 0x1a3   : > { %1131 = vrot.lane.b32.xlu1 %v5203_v23, %s4744_s16  ;;  %1201 = vrot.lane.b32.xlu0 %v5191_v16, %s4745_s29  ;;  %v964_v55 = vadd.f32 %v963_v54, %v5178_v8 }
 0x1a4   : > { %v5285_v56 = vmul.f32 0.25, %v962_v53  ;;  %v5289_v57 = vmul.f32 %v5277_v52, %v5275_v50 }
 0x1a6   : > { %v5292_v59 = vmul.f32 %v5285_v56, %v964_v55 }
 0x1a7   : > { %1203 = vrot.lane.b32.xlu1 %v5203_v23, %s4745_s29  ;;  %1177 = vrot.lane.b32.xlu0 %v5191_v16, %s4746_s26  ;;  %v967_v60 = vpop.f32.mrb[12].mxu0 }
 0x1a8   : > { %v968_v61 = vadd.f32 %v967_v60, %v5170_v6  ;;  %v969_v62 = vpop.f32.mrb[13].mxu0  ;;  %v1241_v0 = vpack.c.bf16 %v5292_v59, %v5289_v57 }
 0x1a9   : > { %v970_v3 = vadd.f32 %v969_v62, %v5178_v8  ;;  %v971_v4 = vpop.f32.mrb[14].mxu0 }
 0x1aa   : > { %v5302_v5 = vmul.f32 0.25, %v968_v61  ;;  %v972_v7 = vadd.f32 %v971_v4, %v5170_v6  ;;  %v973_v9 = vpop.f32.mrb[15].mxu0  ;;  %v4438_v61 = vld [vmem:[%s6268_s20 + $0x1e0] sm:$0xff]  }
 0x1ab   : > { %1179 = vrot.lane.b32.xlu1 %v5203_v23, %s4746_s26  ;;  %1059 = vrot.lane.b32.xlu0 %v5203_v23, %s4741_s30  ;;  %v974_v11 = vadd.f32 %v973_v9, %v5178_v8  ;;  %v4418_v8 = vld [vmem:[%s6268_s20 + $0x140] sm:$0xff]  }
 0x1ac   : > { %v5310_v12 = vmul.f32 0.25, %v972_v7  ;;  %v5313_v13 = vmul.f32 %v5302_v5, %v970_v3  ;;  %4070 = vmatprep.subr.bf16.mxu0 %v4418_v8 }
 0x1ae   : > { %v5316_v14 = vmul.f32 %v5310_v12, %v974_v11 }
 0x1af   : > { %1063 = vrot.lane.b32.xlu1 %v5249_v40, %s4741_s30  ;;  %1061 = vrot.lane.b32.xlu0 %v5233_v33, %s4741_s30 }
 0x1b0   : > { %v1249_v6 = vpack.c.bf16 %v5316_v14, %v5313_v13 }
 0x1b3   : > { %1111 = vrot.lane.b32.xlu1 %v5249_v40, %s4740_s28  ;;  %1109 = vrot.lane.b32.xlu0 %v5233_v33, %s4740_s28 }
 0x1b7   : > { %1087 = vrot.lane.b32.xlu1 %v5249_v40, %s4742_s15  ;;  %1085 = vrot.lane.b32.xlu0 %v5233_v33, %s4742_s15 }
 0x1bb   : > { %1159 = vrot.lane.b32.xlu1 %v5249_v40, %s4743_s25  ;;  %1157 = vrot.lane.b32.xlu0 %v5233_v33, %s4743_s25 }
 0x1bf   : > { %1135 = vrot.lane.b32.xlu1 %v5249_v40, %s4744_s16  ;;  %1133 = vrot.lane.b32.xlu0 %v5233_v33, %s4744_s16 }
 0x1c3   : > { %1207 = vrot.lane.b32.xlu1 %v5249_v40, %s4745_s29  ;;  %1205 = vrot.lane.b32.xlu0 %v5233_v33, %s4745_s29 }
 0x1c7   : > { %1183 = vrot.lane.b32.xlu1 %v5249_v40, %s4746_s26  ;;  %1181 = vrot.lane.b32.xlu0 %v5233_v33, %s4746_s26  ;;  %v4430_v40 = vld [vmem:[%s6268_s20 + $0x1d0] sm:$0xff]  }
 0x1cb   : > { %1067 = vrot.lane.b32.xlu1 %v964_v55, %s4741_s30  ;;  %1065 = vrot.lane.b32.xlu0 %v5275_v50, %s4741_s30 }
 0x1cf   : > { %1115 = vrot.lane.b32.xlu1 %v964_v55, %s4740_s28  ;;  %1113 = vrot.lane.b32.xlu0 %v5275_v50, %s4740_s28 }
 0x1d3   : > { %1091 = vrot.lane.b32.xlu1 %v964_v55, %s4742_s15  ;;  %1089 = vrot.lane.b32.xlu0 %v5275_v50, %s4742_s15 }
 0x1d7   : > { %1071 = vrot.lane.b32.xlu1 %v974_v11, %s4741_s30  ;;  %1069 = vrot.lane.b32.xlu0 %v970_v3, %s4741_s30 }
 0x1db   : > { %1119 = vrot.lane.b32.xlu1 %v974_v11, %s4740_s28  ;;  %1117 = vrot.lane.b32.xlu0 %v970_v3, %s4740_s28 }
 0x1df   : > { %1095 = vrot.lane.b32.xlu1 %v974_v11, %s4742_s15  ;;  %1093 = vrot.lane.b32.xlu0 %v970_v3, %s4742_s15 }
 0x1e3   : > { %1163 = vrot.lane.b32.xlu1 %v964_v55, %s4743_s25  ;;  %1161 = vrot.lane.b32.xlu0 %v5275_v50, %s4743_s25 }
 0x1e7   : > { %1139 = vrot.lane.b32.xlu1 %v964_v55, %s4744_s16  ;;  %1137 = vrot.lane.b32.xlu0 %v5275_v50, %s4744_s16 }
 0x1eb   : > { %1211 = vrot.lane.b32.xlu1 %v964_v55, %s4745_s29  ;;  %1209 = vrot.lane.b32.xlu0 %v5275_v50, %s4745_s29 }
 0x1ef   : > { %1187 = vrot.lane.b32.xlu1 %v964_v55, %s4746_s26  ;;  %1185 = vrot.lane.b32.xlu0 %v5275_v50, %s4746_s26  ;;  %v4220_v50 = vpop.f32.mrb[0].mxu1  ;;  %v4435_v55 = vld [vmem:[%s6268_s20 + $0x198] sm:$0xff]  }
 0x1f0   : > { %v1010_v54 = vpop.f32.mrb[1].mxu1  ;;  %v5441_v7 = vadd.f32 %v4220_v50, %v5420_v47 }
 0x1f1   : > { %v5433_v60 = vadd.f32 %v1010_v54, %v5420_v47  ;;  %v4221_v1 = vpop.f32.mrb[2].mxu1 }
 0x1f2   : > { %v1013_v62 = vpop.f32.mrb[3].mxu1 }
 0x1f3   : > { %1167 = vrot.lane.b32.xlu1 %v974_v11, %s4743_s25  ;;  %1165 = vrot.lane.b32.xlu0 %v970_v3, %s4743_s25  ;;  %v5444_v9 = vadd.f32 %v1013_v62, %v5420_v47  ;;  %v4448_v62 = vld [vmem:[%s6268_s20 + $0x1f8] sm:$0xff]  }
 0x1f7   : > { %1143 = vrot.lane.b32.xlu1 %v974_v11, %s4744_s16  ;;  %1141 = vrot.lane.b32.xlu0 %v970_v3, %s4744_s16 }
 0x1fb   : > { %1215 = vrot.lane.b32.xlu1 %v974_v11, %s4745_s29  ;;  %1213 = vrot.lane.b32.xlu0 %v970_v3, %s4745_s29 }
 0x1ff   : > { %1191 = vrot.lane.b32.xlu1 %v974_v11, %s4746_s26  ;;  %1189 = vrot.lane.b32.xlu0 %v970_v3, %s4746_s26 }
 0x203   : > { %2546 = vrot.lane.b32.xlu0 %v5433_v60, %s4741_s30  ;;  %2548 = vrot.lane.b32.xlu1 %v5444_v9, %s4741_s30 }
 0x205   : > { %v1106_v16 = vpop.permute.xlu1 %1105  ;;  %v1058_v17 = vpop.permute.xlu0 %1057 }
 0x206   : > { %v1121_v21 = vmul.f32 %v1106_v16, %v5196_v19  ;;  %v1073_v11 = vmul.f32 %v1058_v17, %v5196_v19  ;;  %v4442_v17 = vld [vmem:[%s6268_s20 + $0x1e8] sm:$0xff]  }
 0x207   : > { %2550 = vrot.lane.b32.xlu0 %v5441_v7, %s4741_s30 }
 0x209   : > { %v1108_v18 = vpop.permute.xlu1 %1107  ;;  %v1082_v20 = vpop.permute.xlu0 %1081 }
 0x20a   : > { %v1122_v22 = vmul.f32 %v1108_v18, %v5209_v24  ;;  %v1097_v29 = vmul.f32 %v1082_v20, %v5196_v19  ;;  %v4419_v18 = vld [vmem:[%s6268_s20 + $0x100] sm:$0xff]   ;;  %v5461_v20 = vpop.f32.mrb[4].mxu1 }
 0x20b   : > { %2578 = vrot.lane.b32.xlu0 %v5433_v60, %s4742_s15 }
 0x20c   : > { %v1228_v23 = vpack.c.bf16 %v1122_v22, %v1121_v21 }
 0x20d   : > { %v1084_v25 = vpop.permute.xlu1 %1083  ;;  %v5391_v26 = vpop.permute.xlu0 %1153 }
 0x20e   : > { %v1098_v30 = vmul.f32 %v1084_v25, %v5209_v24  ;;  %1866 = vmatprep.mubr.bf16.mxu1 %v1228_v23  ;;  %v4420_v23 = vld [vmem:[%s6268_s20 + $0x148] sm:$0xff]   ;;  %v5467_v25 = vadd.f32 %v4221_v1, %v5420_v47 }
 0x20f   : > { %2582 = vrot.lane.b32.xlu0 %v5441_v7, %s4742_s15 }
 0x210   : > { %v1227_v33 = vpack.c.bf16 %v1098_v30, %v1097_v29  ;;  %2552 = vrot.lane.b32.xlu1 %v5467_v25, %s4741_s30 }
 0x211   : > { %v5401_v35 = vpop.permute.xlu1 %1155  ;;  %v5403_v37 = vpop.permute.xlu0 %1129 }
 0x212   : > { %1867 = vmatmul.mubr.bf16.vlgmr.msra.gmra.mrb[8].mxu1 %v1227_v33  ;;  %v4443_v33 = vld [vmem:[%s6268_s20 + $0x1a8] sm:$0xff]   ;;  %v1170_v57 = vmul.f32 %v5401_v35, %v5209_v24  ;;  %v1145_v14 = vmul.f32 %v5403_v37, %v5196_v19  ;;  %v5668_v37 = vadd.f32 %v5461_v20, %v5420_v47 }
 0x213   : > { %4111 = vmatpush3.bf16.msra.mxu1 %v4423_v31  ;;  %v5473_v31 = vpop.f32.mrb[5].mxu1  ;;  %2610 = vrot.lane.b32.xlu0 %v5433_v60, %s4740_s28 }
 0x214   : > { %4112 = vmatprep.subr.bf16.mxu1 %v4426_v34  ;;  %v4225_v34 = vpop.f32.mrb[6].mxu1  ;;  %2580 = vrot.lane.b32.xlu1 %v5444_v9, %s4742_s15  ;;  %v5650_v13 = vadd.f32 %v5473_v31, %v5420_v47 }
 0x215   : > { %v5412_v43 = vpop.permute.xlu1 %1131  ;;  %v5414_v44 = vpop.permute.xlu0 %1201  ;;  %v5488_v27 = vadd.f32 %v4225_v34, %v5420_v47 }
 0x216   : > { %v5490_v28 = vpop.f32.mrb[7].mxu1 }
 0x217   : > { %4113 = vmatpush3.bf16.msra.mxu1 %v4427_v38  ;;  %2614 = vrot.lane.b32.xlu0 %v5441_v7, %s4740_s28  ;;  %v5662_v31 = vadd.f32 %v5490_v28, %v5420_v47 }
 0x218   : > { %4114 = vmatprep.subr.bf16.mxu1 %v4430_v40  ;;  %v4446_v40 = vld [vmem:[%s6268_s20 + $0x1f0] sm:$0xff]   ;;  %2584 = vrot.lane.b32.xlu1 %v5467_v25, %s4742_s15 }
 0x219   : > { %v5425_v51 = vpop.permute.xlu1 %1203  ;;  %v5427_v53 = vpop.permute.xlu0 %1177 }
 0x21a   : > { %v1193_v47 = vmul.f32 %v5427_v53, %v5196_v19 }
 0x21b   : > { %4115 = vmatpush3.bf16.msra.mxu1 %v4431_v46  ;;  %2642 = vrot.lane.b32.xlu0 %v5433_v60, %s4744_s16 }
 0x21c   : > { %4116 = vmatprep.subr.bf16.mxu1 %v4434_v48  ;;  %v4424_v48 = vld [vmem:[%s6268_s20 + $0x150] sm:$0xff]   ;;  %2612 = vrot.lane.b32.xlu1 %v5444_v9, %s4740_s28 }
 0x21d   : > { %v5438_v3 = vpop.permute.xlu1 %1179  ;;  %v1060_v4 = vpop.permute.xlu0 %1059 }
 0x21e   : > { %v1074_v8 = vmul.f32 %v1060_v4, %v5209_v24 }
 0x21f   : > { %4117 = vmatpush3.bf16.msra.mxu1 %v4435_v55  ;;  %v4447_v55 = vld [vmem:[%s6268_s20 + $0x1b0] sm:$0xff]   ;;  %2646 = vrot.lane.b32.xlu0 %v5441_v7, %s4744_s16 }
 0x220   : > { %v1226_v16 = vpack.c.bf16 %v1074_v8, %v1073_v11  ;;  %4118 = vmatprep.subr.bf16.mxu1 %v4438_v61  ;;  %v4425_v61 = vld [vmem:[%s6268_s20 + $0x110] sm:$0xff]   ;;  %v4428_v8 = vld [vmem:[%s6268_s20 + $0x158] sm:$0xff]   ;;  %2616 = vrot.lane.b32.xlu1 %v5467_v25, %s4740_s28 }
 0x221   : > { %v1064_v21 = vpop.permute.xlu1 %1063  ;;  %v1062_v22 = vpop.permute.xlu0 %1061 }
 0x222   : > { %v1076_v29 = vmul.f32 %v1064_v21, %v5251_v41  ;;  %v1075_v30 = vmul.f32 %v1062_v22, %v5238_v36  ;;  %1801 = vmatprep.mubr.bf16.mxu0 %v1226_v16  ;;  %v4429_v21 = vld [vmem:[%s6268_s20 + $0x118] sm:$0xff]  }
 0x223   : > { %1802 = vmatmul.mubr.bf16.vlgmr.msra.gmra.mrb[16].mxu0 %v1225_v32  ;;  %4119 = vmatpush3.bf16.msra.mxu1 %v4439_v15 }
 0x224   : > { %v1234_v38 = vpack.c.bf16 %v1076_v29, %v1075_v30  ;;  %4071 = vmatpush3.bf16.msra.mxu0 %v4419_v18  ;;  %4120 = vmatprep.subr.bf16.mxu1 %v4442_v17  ;;  %v4449_v18 = vld [vmem:[%s6268_s20 + $0x1b8] sm:$0xff]   ;;  %v4433_v30 = vld [vmem:[%s6268_s20 + $0x120] sm:$0xff]  }
 0x225   : > { %v1112_v32 = vpop.permute.xlu1 %1111  ;;  %v1110_v46 = vpop.permute.xlu0 %1109  ;;  %4072 = vmatprep.subr.bf16.mxu0 %v4420_v23  ;;  %2644 = vrot.lane.b32.xlu1 %v5444_v9, %s4744_s16 }
 0x226   : > { %v1124_v50 = vmul.f32 %v1112_v32, %v5251_v41  ;;  %v1123_v54 = vmul.f32 %v1110_v46, %v5238_v36  ;;  %1809 = vmatprep.mubr.bf16.mxu0 %v1234_v38  ;;  %v4436_v38 = vld [vmem:[%s6268_s20 + $0x168] sm:$0xff]   ;;  %2674 = vrot.lane.b32.xlu0 %v5433_v60, %s4743_s25 }
 0x227   : > { %4121 = vmatpush3.bf16.msra.mxu1 %v4443_v33  ;;  %v4437_v46 = vld [vmem:[%s6268_s20 + $0x128] sm:$0xff]  }
 0x228   : > { %v1236_v1 = vpack.c.bf16 %v1124_v50, %v1123_v54  ;;  %4073 = vmatpush3.bf16.msra.mxu0 %v4421_v39  ;;  %4122 = vmatprep.subr.bf16.mxu1 %v4446_v40  ;;  %v4440_v54 = vld [vmem:[%s6268_s20 + $0x170] sm:$0xff]  }
 0x229   : > { %v1088_v4 = vpop.permute.xlu1 %1087  ;;  %v1086_v11 = vpop.permute.xlu0 %1085  ;;  %4074 = vmatprep.subr.bf16.mxu0 %v4424_v48  ;;  %2648 = vrot.lane.b32.xlu1 %v5467_v25, %s4744_s16 }
 0x22a   : > { %v1100_v15 = vmul.f32 %v1088_v4, %v5251_v41  ;;  %v1099_v16 = vmul.f32 %v1086_v11, %v5238_v36  ;;  %1874 = vmatprep.mubr.bf16.mxu1 %v1236_v1  ;;  %2678 = vrot.lane.b32.xlu0 %v5441_v7, %s4743_s25 }
 0x22b   : > { %1810 = vmatmul.mubr.bf16.gmra.mrb[20].mxu0 %v1233_v49  ;;  %4123 = vmatpush3.bf16.msra.mxu1 %v4447_v55 }
 0x22c   : > { %v1235_v17 = vpack.c.bf16 %v1100_v15, %v1099_v16  ;;  %4075 = vmatpush3.bf16.msra.mxu0 %v4425_v61  ;;  %4124 = vmatprep.subr.bf16.mxu1 %v4448_v62  ;;  %v4441_v62 = vld [vmem:[%s6268_s20 + $0x130] sm:$0xff]  }
 0x22d   : > { %v1160_v22 = vpop.permute.xlu1 %1159  ;;  %v1158_v23 = vpop.permute.xlu0 %1157  ;;  %4076 = vmatprep.subr.bf16.mxu0 %v4428_v8  ;;  %v4444_v8 = vld [vmem:[%s6268_s20 + $0x178] sm:$0xff]   ;;  %2676 = vrot.lane.b32.xlu1 %v5444_v9, %s4743_s25 }
 0x22e   : > { %v5534_v45 = vmul.f32 %v1160_v22, %v5251_v41  ;;  %v5537_v49 = vmul.f32 %v1158_v23, %v5238_v36  ;;  %1875 = vmatmul.mubr.bf16.gmra.mrb[12].mxu1 %v1235_v17  ;;  %v4445_v17 = vld [vmem:[%s6268_s20 + $0x138] sm:$0xff]   ;;  %2706 = vrot.lane.b32.xlu0 %v5433_v60, %s4746_s26 }
 0x22f   : > { %4125 = vmatpush3.bf16.msra.mxu1 %v4449_v18 }
 0x230   : > { %v1238_v29 = vpack.c.bf16 %v5534_v45, %v5537_v49  ;;  %4077 = vmatpush3.bf16.msra.mxu0 %v4429_v21 }
 0x231   : > { %v1136_v33 = vpop.permute.xlu1 %1135  ;;  %v1134_v34 = vpop.permute.xlu0 %1133  ;;  %4078 = vmatprep.subr.bf16.mxu0 %v4432_v42  ;;  %2680 = vrot.lane.b32.xlu1 %v5467_v25, %s4743_s25 }
 0x232   : > { %v5552_v39 = vmul.f32 %v1136_v33, %v5251_v41  ;;  %v5555_v40 = vmul.f32 %v1134_v34, %v5238_v36  ;;  %2710 = vrot.lane.b32.xlu0 %v5441_v7, %s4746_s26 }
 0x234   : > { %v1237_v32 = vpack.c.bf16 %v5552_v39, %v5555_v40  ;;  %4079 = vmatpush3.bf16.msra.mxu0 %v4433_v30 }
 0x235   : > { %v1208_v48 = vpop.permute.xlu1 %1207  ;;  %v1206_v50 = vpop.permute.xlu0 %1205  ;;  %4080 = vmatprep.subr.bf16.mxu0 %v4436_v38  ;;  %2708 = vrot.lane.b32.xlu1 %v5444_v9, %s4746_s26 }
 0x236   : > { %v5570_v55 = vmul.f32 %v1208_v48, %v5251_v41  ;;  %v5573_v1 = vmul.f32 %v1206_v50, %v5238_v36  ;;  %2738 = vrot.lane.b32.xlu0 %v5433_v60, %s4745_s29 }
 0x238   : > { %v1240_v61 = vpack.c.bf16 %v5570_v55, %v5573_v1  ;;  %4081 = vmatpush3.bf16.msra.mxu0 %v4437_v46 }
 0x239   : > { %v1184_v4 = vpop.permute.xlu1 %1183  ;;  %v1182_v11 = vpop.permute.xlu0 %1181  ;;  %4082 = vmatprep.subr.bf16.mxu0 %v4440_v54  ;;  %2712 = vrot.lane.b32.xlu1 %v5467_v25, %s4746_s26 }
 0x23a   : > { %v5588_v15 = vmul.f32 %v1184_v4, %v5251_v41  ;;  %v5591_v16 = vmul.f32 %v1182_v11, %v5238_v36  ;;  %2742 = vrot.lane.b32.xlu0 %v5441_v7, %s4745_s29 }
 0x23c   : > { %v1239_v18 = vpack.c.bf16 %v5588_v15, %v5591_v16  ;;  %4083 = vmatpush3.bf16.msra.mxu0 %v4441_v62 }
 0x23d   : > { %v1068_v21 = vpop.permute.xlu1 %1067  ;;  %v1066_v22 = vpop.permute.xlu0 %1065  ;;  %4084 = vmatprep.subr.bf16.mxu0 %v4444_v8  ;;  %v1169_v8 = vmul.f32 %v5391_v26, %v5196_v19  ;;  %2740 = vrot.lane.b32.xlu1 %v5444_v9, %s4745_s29 }
 0x23e   : > { %v1078_v36 = vmul.f32 %v1068_v21, %v5285_v56  ;;  %v1077_v41 = vmul.f32 %v1066_v22, %v5277_v52  ;;  %2554 = vrot.lane.b32.xlu0 %v5650_v13, %s4741_s30 }
 0x240   : > { %v1242_v23 = vpack.c.bf16 %v1078_v36, %v1077_v41  ;;  %4085 = vmatpush3.bf16.msra.mxu0 %v4445_v17  ;;  %v1230_v36 = vpack.c.bf16 %v1170_v57, %v1169_v8 }
 0x241   : > { %v1116_v42 = vpop.permute.xlu1 %1115  ;;  %v1114_v30 = vpop.permute.xlu0 %1113  ;;  %2744 = vrot.lane.b32.xlu1 %v5467_v25, %s4745_s29 }
 0x242   : > { %v1126_v33 = vmul.f32 %v1116_v42, %v5285_v56  ;;  %v1125_v34 = vmul.f32 %v1114_v30, %v5277_v52  ;;  %1817 = vmatprep.mubr.bf16.mxu0 %v1242_v23  ;;  %v1146_v23 = vmul.f32 %v5412_v43, %v5209_v24  ;;  %v1218_v42 = vmul.f32 %v5425_v51, %v5209_v24 }
 0x243   : > { %1818 = vmatmul.mubr.bf16.gmra.mrb[24].mxu0 %v1241_v0  ;;  %2558 = vrot.lane.b32.xlu0 %v5668_v37, %s4741_s30 }
 0x244   : > { %v1244_v38 = vpack.c.bf16 %v1126_v33, %v1125_v34  ;;  %v1229_v51 = vpack.c.bf16 %v1146_v23, %v1145_v14  ;;  %v2049_v14 = vld [vmem:[#allocation7 + $0x40] sm:$0xff] }
 0x245   : > { %v1092_v46 = vpop.permute.xlu1 %1091  ;;  %v1090_v48 = vpop.permute.xlu0 %1089  ;;  %2556 = vrot.lane.b32.xlu1 %v5662_v31, %s4741_s30 }
 0x246   : > { %v1102_v50 = vmul.f32 %v1092_v46, %v5285_v56  ;;  %v1101_v54 = vmul.f32 %v1090_v48, %v5277_v52  ;;  %1882 = vmatprep.mubr.bf16.mxu1 %v1244_v38 }
 0x247   : > { %2586 = vrot.lane.b32.xlu0 %v5650_v13, %s4742_s15 }
 0x248   : > { %v1243_v62 = vpack.c.bf16 %v1102_v50, %v1101_v54 }
 0x249   : > { %v1072_v4 = vpop.permute.xlu1 %1071  ;;  %v1070_v11 = vpop.permute.xlu0 %1069  ;;  %2560 = vrot.lane.b32.xlu1 %v5488_v27, %s4741_s30 }
 0x24a   : > { %v1080_v59 = vmul.f32 %v1072_v4, %v5310_v12  ;;  %v1079_v0 = vmul.f32 %v1070_v11, %v5302_v5  ;;  %1883 = vmatmul.mubr.bf16.gmra.mrb[16].mxu1 %v1243_v62 }
 0x24b   : > { %2590 = vrot.lane.b32.xlu0 %v5668_v37, %s4742_s15 }
 0x24c   : > { %v1250_v17 = vpack.c.bf16 %v1080_v59, %v1079_v0 }
 0x24d   : > { %v1120_v21 = vpop.permute.xlu1 %1119  ;;  %v1118_v22 = vpop.permute.xlu0 %1117  ;;  %2588 = vrot.lane.b32.xlu1 %v5662_v31, %s4742_s15 }
 0x24e   : > { %v1128_v35 = vmul.f32 %v1120_v21, %v5310_v12  ;;  %v1127_v41 = vmul.f32 %v1118_v22, %v5302_v5  ;;  %1825 = vmatprep.mubr.bf16.mxu0 %v1250_v17 }
 0x24f   : > { %1826 = vmatmul.mubr.bf16.gmra.mrb[28].mxu0 %v1249_v6  ;;  %v1217_v6 = vmul.f32 %v5414_v44, %v5196_v19  ;;  %v1194_v44 = vmul.f32 %v5438_v3, %v5209_v24  ;;  %2618 = vrot.lane.b32.xlu0 %v5650_v13, %s4740_s28 }
 0x250   : > { %v1252_v26 = vpack.c.bf16 %v1128_v35, %v1127_v41  ;;  %1931 = vmatprep.mubr.bf16.mxu0 %v1230_v36 }
 0x251   : > { %v1096_v30 = vpop.permute.xlu1 %1095  ;;  %v1094_v33 = vpop.permute.xlu0 %1093  ;;  %v1232_v46 = vpack.c.bf16 %v1218_v42, %v1217_v6  ;;  %v1231_v24 = vpack.c.bf16 %v1194_v44, %v1193_v47  ;;  %2592 = vrot.lane.b32.xlu1 %v5488_v27, %s4742_s15  ;;  %v2053_v6 = vld [vmem:[#allocation7 + $0x60] sm:$0xff]  ;;  %v5760_v47 = vld [vmem:[#allocation7 + $0x30] sm:$0xff]  ;;  %s6270_s15 = sld [smem:[#allocation27_spill]] }
 0x252   : > { %v1104_v34 = vmul.f32 %v1096_v30, %v5310_v12  ;;  %v1103_v38 = vmul.f32 %v1094_v33, %v5302_v5  ;;  %1890 = vmatprep.mubr.bf16.mxu1 %v1252_v26  ;;  %v2069_v44 = vld [vmem:[#allocation7 + $0xe0] sm:$0xff] }
 0x253   : > { %2622 = vrot.lane.b32.xlu0 %v5668_v37, %s4740_s28 }
 0x254   : > { %v1251_v43 = vpack.c.bf16 %v1104_v34, %v1103_v38 }
 0x255   : > { %v1164_v48 = vpop.permute.xlu1 %1163  ;;  %v1162_v50 = vpop.permute.xlu0 %1161  ;;  %2620 = vrot.lane.b32.xlu1 %v5662_v31, %s4740_s28 }
 0x256   : > { %v1174_v54 = vmul.f32 %v1164_v48, %v5285_v56  ;;  %v1173_v62 = vmul.f32 %v1162_v50, %v5277_v52  ;;  %1891 = vmatmul.mubr.bf16.gmra.mrb[20].mxu1 %v1251_v43  ;;  %v3888_v43 = vcombine.high %v2049_v14, %v2053_v6  ;;  %v2061_v48 = vld [vmem:[#allocation7 + $0xa0] sm:$0xff] }
 0x257   : > { %1932 = vmatmul.mubr.bf16.vlgmr.msra.gmra.mrb[32].mxu0 %v1229_v51  ;;  %1996 = vmatprep.mubr.bf16.mxu1 %v1232_v46  ;;  %v3887_v51 = vcombine.low %v2049_v14, %v2053_v6  ;;  %v2057_v46 = vld [vmem:[#allocation7 + $0x80] sm:$0xff] }
 0x258   : > { %v1246_v4 = vpack.c.bf16 %v1174_v54, %v1173_v62  ;;  %1939 = vmatprep.mubr.bf16.mxu0 %v1238_v29  ;;  %2650 = vrot.lane.b32.xlu0 %v5650_v13, %s4744_s16  ;;  %v3896_v50 = vcombine.high %v2057_v46, %v2061_v48  ;;  %v3895_v54 = vcombine.low %v2057_v46, %v2061_v48  ;;  %v2065_v62 = vld [vmem:[#allocation7 + $0xc0] sm:$0xff] }
 0x259   : > { %v1140_v28 = vpop.permute.xlu1 %1139  ;;  %v1138_v11 = vpop.permute.xlu0 %1137  ;;  %2624 = vrot.lane.b32.xlu1 %v5488_v27, %s4740_s28 }
 0x25a   : > { %v1150_v20 = vmul.f32 %v1140_v28, %v5285_v56  ;;  %v1149_v57 = vmul.f32 %v1138_v11, %v5277_v52  ;;  %v3903_v28 = vcombine.low %v2065_v62, %v2069_v44  ;;  %v5758_v11 = vld [vmem:[#allocation7 + $0x10] sm:$0xff] }
 0x25c   : > { %v1245_v3 = vpack.c.bf16 %v1150_v20, %v1149_v57  ;;  %2654 = vrot.lane.b32.xlu0 %v5668_v37, %s4744_s16  ;;  %v3884_v20 = vcombine.high %v5758_v11, %v5760_v47  ;;  %v3883_v57 = vcombine.low %v5758_v11, %v5760_v47 }
 0x25d   : > { %v1212_v59 = vpop.permute.xlu1 %1211  ;;  %v1210_v45 = vpop.permute.xlu0 %1209  ;;  %2652 = vrot.lane.b32.xlu1 %v5662_v31, %s4744_s16 }
 0x25e   : > { %v1222_v49 = vmul.f32 %v1212_v59, %v5285_v56  ;;  %v1221_v29 = vmul.f32 %v1210_v45, %v5277_v52  ;;  %1997 = vmatmul.mubr.bf16.vlgmr.msra.gmra.mrb[24].mxu1 %v1231_v24  ;;  %v5766_v24 = vld [vmem:[#allocation7 + $0x8] sm:$0xff] }
 0x25f   : > { %1940 = vmatmul.mubr.bf16.gmra.mrb[36].mxu0 %v1237_v32  ;;  %2004 = vmatprep.mubr.bf16.mxu1 %v1240_v61 }
 0x260   : > { %v1248_v19 = vpack.c.bf16 %v1222_v49, %v1221_v29  ;;  %1947 = vmatprep.mubr.bf16.mxu0 %v1246_v4  ;;  %2682 = vrot.lane.b32.xlu0 %v5650_v13, %s4743_s25  ;;  %v3904_v4 = vcombine.high %v2065_v62, %v2069_v44 }
 0x261   : > { %v1188_v53 = vpop.permute.xlu1 %1187  ;;  %v1186_v0 = vpop.permute.xlu0 %1185  ;;  %2656 = vrot.lane.b32.xlu1 %v5488_v27, %s4744_s16 }
 0x262   : > { %v1198_v8 = vmul.f32 %v1188_v53, %v5285_v56  ;;  %v1197_v17 = vmul.f32 %v1186_v0, %v5277_v52 }
 0x264   : > { %v1247_v39 = vpack.c.bf16 %v1198_v8, %v1197_v17  ;;  %2686 = vrot.lane.b32.xlu0 %v5668_v37, %s4743_s25 }
 0x265   : > { %v1168_v40 = vpop.permute.xlu1 %1167  ;;  %v1166_v32 = vpop.permute.xlu0 %1165  ;;  %2684 = vrot.lane.b32.xlu1 %v5662_v31, %s4743_s25 }
 0x266   : > { %v1176_v55 = vmul.f32 %v1168_v40, %v5310_v12  ;;  %v1175_v1 = vmul.f32 %v1166_v32, %v5302_v5  ;;  %2005 = vmatmul.mubr.bf16.gmra.mrb[28].mxu1 %v1239_v18 }
 0x267   : > { %1948 = vmatmul.mubr.bf16.gmra.mrb[40].mxu0 %v1245_v3  ;;  %2012 = vmatprep.mubr.bf16.mxu1 %v1248_v19  ;;  %v5768_v3 = vld [vmem:[#allocation7 + $0x28] sm:$0xff] }
 0x268   : > { %v1254_v52 = vpack.c.bf16 %v1176_v55, %v1175_v1  ;;  %2714 = vrot.lane.b32.xlu0 %v5650_v13, %s4746_s26  ;;  %v3881_v59 = vcombine.low %v5766_v24, %v5768_v3  ;;  %v3882_v45 = vcombine.high %v5766_v24, %v5768_v3 }
 0x269   : > { %v1144_v56 = vpop.permute.xlu1 %1143  ;;  %v1142_v61 = vpop.permute.xlu0 %1141  ;;  %2688 = vrot.lane.b32.xlu1 %v5488_v27, %s4743_s25  ;;  %s6271_s25 = smov %s6270_s15 }
 0x26a   : > { %v1152_v21 = vmul.f32 %v1144_v56, %v5310_v12  ;;  %v1151_v22 = vmul.f32 %v1142_v61, %v5302_v5  ;;  %1955 = vmatprep.mubr.bf16.mxu0 %v1254_v52 }
 0x26c   : > { %v1253_v15 = vpack.c.bf16 %v1152_v21, %v1151_v22  ;;  %2718 = vrot.lane.b32.xlu0 %v5668_v37, %s4746_s26 }
 0x26d   : > { %v1216_v16 = vpop.permute.xlu1 %1215  ;;  %v1214_v18 = vpop.permute.xlu0 %1213  ;;  %2716 = vrot.lane.b32.xlu1 %v5662_v31, %s4746_s26 }
 0x26e   : > { %v1224_v36 = vmul.f32 %v1216_v16, %v5310_v12  ;;  %v1223_v35 = vmul.f32 %v1214_v18, %v5302_v5  ;;  %2013 = vmatmul.mubr.bf16.gmra.mrb[32].mxu1 %v1247_v39 }
 0x26f   : > { %1956 = vmatmul.mubr.bf16.gmra.mrb[44].mxu0 %v1253_v15 }
 0x270   : > { %v1256_v41 = vpack.c.bf16 %v1224_v36, %v1223_v35  ;;  %2278 = vmatprep.mubr.bf16.mxu0 %v6235_v10  ;;  %2746 = vrot.lane.b32.xlu0 %v5650_v13, %s4745_s29 }
 0x271   : > { %v1192_v26 = vpop.permute.xlu1 %1191  ;;  %v1190_v23 = vpop.permute.xlu0 %1189  ;;  %2720 = vrot.lane.b32.xlu1 %v5488_v27, %s4746_s26 }
 0x272   : > { %v1200_v42 = vmul.f32 %v1192_v26, %v5310_v12  ;;  %v1199_v30 = vmul.f32 %v1190_v23, %v5302_v5  ;;  %2020 = vmatprep.mubr.bf16.mxu1 %v1256_v41  ;;  %v2041_v5 = vld [vmem:[#allocation7] sm:$0xff] }
 0x273   : > { %v2045_v12 = vld [vmem:[#allocation7 + $0x20] sm:$0xff] }
 0x274   : > { %v1255_v33 = vpack.c.bf16 %v1200_v42, %v1199_v30  ;;  %2750 = vrot.lane.b32.xlu0 %v5668_v37, %s4745_s29  ;;  %v3880_v34 = vcombine.high %v2041_v5, %v2045_v12  ;;  %v3879_v38 = vcombine.low %v2041_v5, %v2045_v12 }
 0x275   : > { %2748 = vrot.lane.b32.xlu1 %v5662_v31, %s4745_s29 }
 0x276   : > { %2021 = vmatmul.mubr.bf16.gmra.mrb[36].mxu1 %v1255_v33  ;;  %4250 = vmatprep.subr.bf16.mxu1 %v3880_v34 }
 0x277   : > { %2298 = vmatprep.mubr.bf16.mxu1 %v6235_v10  ;;  %2246 = vmatprep.subr.bf16.mxu0 %v3880_v34 }
 0x278   : > { %4254 = vmatpush1.bf16.msra.mxu1 %v3879_v38  ;;  %2247 = vmatpush1.bf16.msra.mxu0 %v3879_v38 }
 0x279   : > { %2752 = vrot.lane.b32.xlu1 %v5488_v27, %s4745_s29  ;;  %2248 = vmatprep.subr.bf16.mxu0 %v3888_v43 }
 0x27a   : > { %4251 = vmatprep.subr.bf16.mxu1 %v3888_v43 }
 0x27c   : > { %2249 = vmatpush1.bf16.msra.mxu0 %v3887_v51  ;;  %4255 = vmatpush1.bf16.msra.mxu1 %v3887_v51 }
 0x27d   : > { %2250 = vmatprep.subr.bf16.mxu0 %v3896_v50  ;;  %4252 = vmatprep.subr.bf16.mxu1 %v3896_v50 }
 0x280   : > { %2251 = vmatpush1.bf16.msra.mxu0 %v3895_v54  ;;  %4256 = vmatpush1.bf16.msra.mxu1 %v3895_v54 }
 0x281   : > { %2252 = vmatprep.subr.bf16.mxu0 %v3904_v4  ;;  %4253 = vmatprep.subr.bf16.mxu1 %v3904_v4 }
 0x284   : > { %2253 = vmatpush1.bf16.msra.mxu0 %v3903_v28  ;;  %4257 = vmatpush1.bf16.msra.mxu1 %v3903_v28 }
 0x285   : > { %2392 = vmatprep.subr.bf16.mxu0 %v3884_v20  ;;  %2319 = vmatprep.subr.bf16.mxu1 %v3882_v45 }
 0x2e5   : > { %v4046_v49 = vpop.f32.mrb[8].mxu1 }
 0x2e6   : > { %v4047_v29 = vpop.f32.mrb[9].mxu1 }
 0x2e7   : > { %v4048_v19 = vadd.f32 %v4047_v29, %v4046_v49  ;;  %v4049_v53 = vpop.f32.mrb[10].mxu1 }
 0x2e8   : > { %v4050_v0 = vpop.f32.mrb[11].mxu1 }
 0x2e9   : > { %v4051_v8 = vadd.f32 %v4050_v0, %v4049_v53 }
 0x2f6   : > { %v4006_v17 = vpop.f32.mrb[16].mxu0 }
 0x2f7   : > { %v4007_v39 = vpop.f32.mrb[17].mxu0 }
 0x2f8   : > { %v4008_v40 = vadd.f32 %v4007_v39, %v4006_v17  ;;  %v4009_v32 = vpop.f32.mrb[18].mxu0 }
 0x2f9   : > { %v4010_v55 = vpop.f32.mrb[19].mxu0 }
 0x2fa   : > { %v1869_v1 = vadd.f32 %v4048_v19, %v4008_v40  ;;  %v4011_v52 = vadd.f32 %v4010_v55, %v4009_v32 }
 0x2fc   : > { %v1872_v56 = vadd.f32 %v4051_v8, %v4011_v52 }
 0x2fe   : > { %v4012_v61 = vpop.f32.mrb[20].mxu0 }
 0x2ff   : > { %v4013_v21 = vpop.f32.mrb[21].mxu0 }
 0x300   : > { %v4014_v22 = vadd.f32 %v4013_v21, %v4012_v61  ;;  %v4015_v15 = vpop.f32.mrb[22].mxu0 }
 0x301   : > { %v4016_v16 = vpop.f32.mrb[23].mxu0  ;;  %v4052_v18 = vpop.f32.mrb[12].mxu1 }
 0x302   : > { %v4017_v36 = vadd.f32 %v4016_v16, %v4015_v15  ;;  %v4053_v35 = vpop.f32.mrb[13].mxu1 }
 0x303   : > { %v4054_v41 = vadd.f32 %v4053_v35, %v4052_v18  ;;  %v4055_v26 = vpop.f32.mrb[14].mxu1 }
 0x304   : > { %v4056_v23 = vpop.f32.mrb[15].mxu1 }
 0x305   : > { %v1877_v42 = vadd.f32 %v4054_v41, %v4014_v22  ;;  %v4057_v30 = vadd.f32 %v4056_v23, %v4055_v26 }
 0x307   : > { %v1880_v33 = vadd.f32 %v4057_v30, %v4017_v36 }
 0x316   : > { %v4018_v5 = vpop.f32.mrb[24].mxu0 }
 0x317   : > { %v4019_v12 = vpop.f32.mrb[25].mxu0 }
 0x318   : > { %v4020_v34 = vadd.f32 %v4019_v12, %v4018_v5  ;;  %v4021_v38 = vpop.f32.mrb[26].mxu0 }
 0x319   : > { %v4022_v14 = vpop.f32.mrb[27].mxu0 }
 0x31a   : > { %v4023_v6 = vadd.f32 %v4022_v14, %v4021_v38 }
 0x31d   : > { %v4058_v43 = vpop.f32.mrb[16].mxu1 }
 0x31e   : > { %v4059_v51 = vpop.f32.mrb[17].mxu1 }
 0x31f   : > { %v4060_v46 = vadd.f32 %v4059_v51, %v4058_v43  ;;  %v4061_v48 = vpop.f32.mrb[18].mxu1 }
 0x320   : > { %v4062_v50 = vpop.f32.mrb[19].mxu1 }
 0x321   : > { %v1885_v54 = vadd.f32 %v4060_v46, %v4020_v34  ;;  %v4063_v62 = vadd.f32 %v4062_v50, %v4061_v48 }
 0x322   : > { %v4024_v44 = vpop.f32.mrb[28].mxu0 }
 0x323   : > { %v1888_v4 = vadd.f32 %v4063_v62, %v4023_v6  ;;  %v4025_v28 = vpop.f32.mrb[29].mxu0 }
 0x324   : > { %v4026_v20 = vadd.f32 %v4025_v28, %v4024_v44  ;;  %v4027_v45 = vpop.f32.mrb[30].mxu0 }
 0x325   : > { %v4028_v49 = vpop.f32.mrb[31].mxu0 }
 0x326   : > { %v4029_v29 = vadd.f32 %v4028_v49, %v4027_v45 }
 0x329   : > { %v4064_v19 = vpop.f32.mrb[20].mxu1 }
 0x32a   : > { %v4065_v53 = vpop.f32.mrb[21].mxu1  ;;  %v4086_v0 = vpop.f32.mrb[32].mxu0 }
 0x32b   : > { %v4066_v8 = vadd.f32 %v4065_v53, %v4064_v19  ;;  %v4067_v17 = vpop.f32.mrb[22].mxu1  ;;  %v4087_v39 = vpop.f32.mrb[33].mxu0 }
 0x32c   : > { %v4088_v40 = vadd.f32 %v4087_v39, %v4086_v0  ;;  %v4068_v32 = vpop.f32.mrb[23].mxu1  ;;  %v4089_v55 = vpop.f32.mrb[34].mxu0  ;;  %v2051_v39 = vld [vmem:[#allocation7 + $0x50] sm:$0xff] }
 0x32d   : > { %v5774_v52 = vadd.f32 %v4066_v8, %v4026_v20  ;;  %v4069_v61 = vadd.f32 %v4068_v32, %v4067_v17  ;;  %v4090_v21 = vpop.f32.mrb[35].mxu0 }
 0x32e   : > { %v1934_v22 = vadd.f32 %v4088_v40, %v1869_v1  ;;  %v4091_v15 = vadd.f32 %v4090_v21, %v4089_v55  ;;  %v2055_v40 = vld [vmem:[#allocation7 + $0x70] sm:$0xff] }
 0x32f   : > { %v5776_v16 = vadd.f32 %v4069_v61, %v4029_v29 }
 0x330   : > { %v1937_v18 = vadd.f32 %v4091_v15, %v1872_v56 }
 0x331   : > { %v4126_v36 = vpop.f32.mrb[24].mxu1 }
 0x332   : > { %v4092_v35 = vpop.f32.mrb[36].mxu0  ;;  %v4127_v41 = vpop.f32.mrb[25].mxu1 }
 0x333   : > { %v4128_v26 = vadd.f32 %v4127_v41, %v4126_v36  ;;  %v4093_v23 = vpop.f32.mrb[37].mxu0  ;;  %v4129_v30 = vpop.f32.mrb[26].mxu1 }
 0x334   : > { %v4094_v5 = vadd.f32 %v4093_v23, %v4092_v35  ;;  %v4095_v12 = vpop.f32.mrb[38].mxu0  ;;  %v4130_v34 = vpop.f32.mrb[27].mxu1 }
 0x335   : > { %v1999_v38 = vadd.f32 %v4128_v26, %v1934_v22  ;;  %v4131_v14 = vadd.f32 %v4130_v34, %v4129_v30  ;;  %v4096_v6 = vpop.f32.mrb[39].mxu0  ;;  %v3892_v26 = vcombine.high %v2051_v39, %v2055_v40 }
 0x336   : > { %v1942_v43 = vadd.f32 %v4094_v5, %v1877_v42  ;;  %v4097_v51 = vadd.f32 %v4096_v6, %v4095_v12  ;;  %v2059_v5 = vld [vmem:[#allocation7 + $0x90] sm:$0xff]  ;;  %v3891_v6 = vcombine.low %v2051_v39, %v2055_v40 }
 0x337   : > { %v2002_v46 = vadd.f32 %v4131_v14, %v1937_v18  ;;  %4498 = vtanh.f32 %v1999_v38  ;;  %v2063_v12 = vld [vmem:[#allocation7 + $0xb0] sm:$0xff] }
 0x338   : > { %v1945_v1 = vadd.f32 %v4097_v51, %v1880_v33  ;;  %v3900_v51 = vcombine.high %v2059_v5, %v2063_v12  ;;  %v3899_v11 = vcombine.low %v2059_v5, %v2063_v12 }
 0x339   : > { %4500 = vtanh.f32 %v2002_v46  ;;  %v4132_v48 = vpop.f32.mrb[28].mxu1 }
 0x33a   : > { %v4098_v56 = vpop.f32.mrb[40].mxu0  ;;  %v4133_v50 = vpop.f32.mrb[29].mxu1 }
 0x33b   : > { %v4134_v62 = vadd.f32 %v4133_v50, %v4132_v48  ;;  %v4099_v44 = vpop.f32.mrb[41].mxu0  ;;  %v4135_v28 = vpop.f32.mrb[30].mxu1 }
 0x33c   : > { %v4100_v20 = vadd.f32 %v4099_v44, %v4098_v56  ;;  %v4101_v45 = vpop.f32.mrb[42].mxu0  ;;  %v4136_v49 = vpop.f32.mrb[31].mxu1 }
 0x33d   : > { %v2007_v29 = vadd.f32 %v4134_v62, %v1942_v43  ;;  %v4137_v19 = vadd.f32 %v4136_v49, %v4135_v28  ;;  %v4102_v53 = vpop.f32.mrb[43].mxu0 }
 0x33e   : > { %v1950_v0 = vadd.f32 %v4100_v20, %v1885_v54  ;;  %v4103_v8 = vadd.f32 %v4102_v53, %v4101_v45 }
 0x33f   : > { %v2010_v42 = vadd.f32 %v4137_v19, %v1945_v1  ;;  %4502 = vtanh.f32 %v2007_v29  ;;  %v2071_v1 = vld [vmem:[#allocation7 + $0xf0] sm:$0xff]  ;;  %v2050_v29 = vld [vmem:[#allocation7 + $0x48] sm:$0xff] }
 0x340   : > { %v1953_v17 = vadd.f32 %v4103_v8, %v1888_v4  ;;  %v2054_v19 = vld [vmem:[#allocation7 + $0x68] sm:$0xff] }
 0x341   : > { %4504 = vtanh.f32 %v2010_v42  ;;  %v4138_v33 = vpop.f32.mrb[32].mxu1  ;;  %v4499_v32 = vpop.eup %4498  ;;  %v3890_v42 = vcombine.high %v2050_v29, %v2054_v19  ;;  %v3889_v39 = vcombine.low %v2050_v29, %v2054_v19 }
 0x342   : > { %v4104_v55 = vpop.f32.mrb[44].mxu0  ;;  %v4139_v61 = vpop.f32.mrb[33].mxu1 }
 0x343   : > { %v4501_v21 = vpop.eup %4500  ;;  %v4140_v22 = vadd.f32 %v4139_v61, %v4138_v33  ;;  %v4105_v15 = vpop.f32.mrb[45].mxu0  ;;  %v2062_v33 = vld [vmem:[#allocation7 + $0xa8] sm:$0xff] }
 0x344   : > { %v4141_v18 = vpop.f32.mrb[34].mxu1  ;;  %v5778_v36 = vpack.c.bf16 %v4501_v21, %v4499_v32  ;;  %v4106_v35 = vadd.f32 %v4105_v15, %v4104_v55  ;;  %v4107_v54 = vpop.f32.mrb[46].mxu0  ;;  %v2066_v32 = vld [vmem:[#allocation7 + $0xc8] sm:$0xff] }
 0x345   : > { %v4142_v41 = vpop.f32.mrb[35].mxu1  ;;  %v2015_v23 = vadd.f32 %v4140_v22, %v1950_v0  ;;  %v4108_v30 = vpop.f32.mrb[47].mxu0  ;;  %v2070_v55 = vld [vmem:[#allocation7 + $0xe8] sm:$0xff] }
 0x346   : > { %v4143_v4 = vadd.f32 %v4142_v41, %v4141_v18  ;;  %v1958_v34 = vadd.f32 %v4106_v35, %v5774_v52  ;;  %v4109_v38 = vadd.f32 %v4108_v30, %v4107_v54  ;;  %3911 = vmatmul.mubr.msk.bf16.vlgmr.msra.gmra.mrb[48].mxu0 %vm2233_vm0, %v5778_v36  ;;  %v2067_v52 = vld [vmem:[#allocation7 + $0xd0] sm:$0xff]  ;;  %v3906_v18 = vcombine.high %v2066_v32, %v2070_v55  ;;  %v2044_v35 = vld [vmem:[#allocation7 + $0x18] sm:$0xff] }
 0x347   : > { %2393 = vmatpush1.bf16.msra.mxu0 %v3883_v57  ;;  %2288 = vmatprep.mubr.bf16.mxu0 %v6235_v10  ;;  %4506 = vtanh.f32 %v2015_v23  ;;  %v3908_v28 = vcombine.high %v2067_v52, %v2071_v1  ;;  %v3907_v49 = vcombine.low %v2067_v52, %v2071_v1  ;;  %v2048_v54 = vld [vmem:[#allocation7 + $0x38] sm:$0xff]  ;;  %v3905_v24 = vcombine.low %v2066_v32, %v2070_v55 }
 0x348   : > { %v2018_v14 = vadd.f32 %v4143_v4, %v1953_v17  ;;  %v1961_v43 = vadd.f32 %v4109_v38, %v5776_v16  ;;  %2394 = vmatprep.subr.bf16.mxu0 %v3892_v26  ;;  %v2058_v17 = vld [vmem:[#allocation7 + $0x88] sm:$0xff]  ;;  %v3886_v3 = vcombine.high %v2044_v35, %v2048_v54  ;;  %v2056_v41 = vld [vmem:[#allocation7 + $0x78] sm:$0xff]  ;;  %v3885_v26 = vcombine.low %v2044_v35, %v2048_v54 }
 0x349   : > { %v4144_v46 = vpop.f32.mrb[36].mxu1  ;;  %v4503_v48 = vpop.eup %4502  ;;  %v3898_v40 = vcombine.high %v2058_v17, %v2062_v33  ;;  %v3897_v22 = vcombine.low %v2058_v17, %v2062_v33  ;;  %v2060_v4 = vld [vmem:[#allocation7 + $0x98] sm:$0xff] }
 0x34a   : > { %4508 = vtanh.f32 %v2018_v14  ;;  %v4145_v56 = vpop.f32.mrb[37].mxu1  ;;  %v2064_v30 = vld [vmem:[#allocation7 + $0xb8] sm:$0xff] }
 0x34b   : > { %v4505_v50 = vpop.eup %4504  ;;  %v4146_v62 = vadd.f32 %v4145_v56, %v4144_v46  ;;  %v4147_v44 = vpop.f32.mrb[38].mxu1  ;;  %2395 = vmatpush1.bf16.msra.mxu0 %v3891_v6  ;;  %v3902_v12 = vcombine.high %v2060_v4, %v2064_v30  ;;  %v2072_v38 = vld [vmem:[#allocation7 + $0xf8] sm:$0xff]  ;;  %v3901_v14 = vcombine.low %v2060_v4, %v2064_v30  ;;  %v4451_v56 = vld [vmem:[%s6271_s25 + $0x8] sm:$0xff]  }
 0x34c   : > { %v4148_v47 = vpop.f32.mrb[39].mxu1  ;;  %v5788_v57 = vpack.c.bf16 %v4505_v50, %v4503_v48  ;;  %2396 = vmatprep.subr.bf16.mxu0 %v3900_v51  ;;  %v2547_v51 = vpop.permute.xlu0 %2546  ;;  %v4452_v50 = vld [vmem:[%s6271_s25 + $0x10] sm:$0xff]  }
 0x34d   : > { %v2023_v20 = vadd.f32 %v4146_v62, %v1958_v34  ;;  %v4149_v16 = vadd.f32 %v4148_v47, %v4147_v44  ;;  %v2068_v34 = vld [vmem:[#allocation7 + $0xd8] sm:$0xff]  ;;  %v2549_v46 = vpop.permute.xlu1 %2548 }
 0x34e   : > { %3912 = vmatmul.mubr.msk.bf16.gmra.mrb[52].mxu0 %vm2233_vm0, %v5788_v57  ;;  %v3910_v6 = vcombine.high %v2068_v34, %v2072_v38 }
 0x34f   : > { %v2026_v45 = vadd.f32 %v4149_v16, %v1961_v43  ;;  %2397 = vmatpush1.bf16.msra.mxu0 %v3899_v11  ;;  %2424 = vmatprep.mubr.bf16.mxu0 %v6235_v10  ;;  %4510 = vtanh.f32 %v2023_v20  ;;  %v3909_v43 = vcombine.low %v2068_v34, %v2072_v38  ;;  %v4453_v11 = vld [vmem:[%s6271_s25 + $0x18] sm:$0xff]   ;;  %v4455_v20 = vld [vmem:[%s6271_s25 + $0x28] sm:$0xff]  }
 0x350   : > { %2398 = vmatprep.subr.bf16.mxu0 %v3908_v28  ;;  %v5835_v52 = vpop.permute.xlu0 %2550  ;;  %v4454_v28 = vld [vmem:[%s6271_s25 + $0x20] sm:$0xff]  }
 0x351   : > { %4512 = vtanh.f32 %v2026_v45  ;;  %v4507_v53 = vpop.eup %4506  ;;  %v5840_v1 = vpop.permute.xlu1 %2552 }
 0x353   : > { %2399 = vmatpush1.bf16.msra.mxu0 %v3907_v49  ;;  %v4456_v49 = vld [vmem:[%s6271_s25 + $0x30] sm:$0xff]  }
 0x354   : > { %v4509_v0 = vpop.eup %4508  ;;  %v5842_v48 = vpop.permute.xlu0 %2578 }
 0x355   : > { %v5793_v8 = vpack.c.bf16 %v4509_v0, %v4507_v53  ;;  %v5850_v62 = vpop.permute.xlu1 %2580  ;;  %v4457_v53 = vld [vmem:[%s6271_s25 + $0x38] sm:$0xff]  }
 0x356   : > { %3919 = vmatmul.mubr.msk.bf16.vlgmr.msra.gmra.mrb[56].mxu0 %vm2233_vm0, %v5778_v36 }
 0x357   : > { %3913 = vmatmul.mubr.msk.bf16.vlgmr.msra.gmra.mrb[40].mxu1 %vm2233_vm0, %v5793_v8  ;;  %2434 = vmatprep.mubr.bf16.mxu0 %v6235_v10 }
 0x358   : > { %2320 = vmatpush1.bf16.msra.mxu1 %v3881_v59  ;;  %2308 = vmatprep.mubr.bf16.mxu1 %v6235_v10  ;;  %v2052_v59 = vld [vmem:[#allocation7 + $0x58] sm:$0xff]  ;;  %v5852_v44 = vpop.permute.xlu0 %2582 }
 0x359   : > { %2321 = vmatprep.subr.bf16.mxu1 %v3890_v42  ;;  %v4511_v61 = vpop.eup %4510  ;;  %v3894_v23 = vcombine.high %v2052_v59, %v2056_v41  ;;  %v3893_v5 = vcombine.low %v2052_v59, %v2056_v41  ;;  %v5857_v47 = vpop.permute.xlu1 %2584 }
 0x35b   : > { %v4513_v21 = vpop.eup %4512 }
 0x35c   : > { %2322 = vmatpush1.bf16.msra.mxu1 %v3889_v39  ;;  %v2040_v15 = vpack.c.bf16 %v4513_v21, %v4511_v61 }
 0x35d   : > { %2323 = vmatprep.subr.bf16.mxu1 %v3898_v40  ;;  %v5867_v16 = vpop.permute.xlu1 %2612 }
 0x35e   : > { %3920 = vmatmul.mubr.msk.bf16.gmra.mrb[60].mxu0 %vm2233_vm0, %v5788_v57 }
 0x35f   : > { %3914 = vmatmul.mubr.msk.bf16.gmra.mrb[44].mxu1 %vm2233_vm0, %v2040_v15  ;;  %2444 = vmatprep.mubr.bf16.mxu0 %v6235_v10 }
 0x360   : > { %2324 = vmatpush1.bf16.msra.mxu1 %v3897_v22  ;;  %2351 = vmatprep.mubr.bf16.mxu1 %v6235_v10 }
 0x361   : > { %2325 = vmatprep.subr.bf16.mxu1 %v3906_v18  ;;  %v5874_v29 = vpop.permute.xlu1 %2616 }
 0x364   : > { %2326 = vmatpush1.bf16.msra.mxu1 %v3905_v24 }
 0x365   : > { %2465 = vmatprep.subr.bf16.mxu1 %v3886_v3  ;;  %v5881_v0 = vpop.permute.xlu1 %2644 }
 0x366   : > { %3921 = vmatmul.mubr.msk.bf16.gmra.mrb[64].mxu0 %vm2233_vm0, %v5793_v8 }
 0x367   : > { %3915 = vmatmul.mubr.msk.bf16.vlgmr.msra.gmra.mrb[48].mxu1 %vm2233_vm0, %v5778_v36  ;;  %2454 = vmatprep.mubr.bf16.mxu0 %v6235_v10 }
 0x368   : > { %2466 = vmatpush1.bf16.msra.mxu1 %v3885_v26  ;;  %2361 = vmatprep.mubr.bf16.mxu1 %v6235_v10 }
 0x369   : > { %2467 = vmatprep.subr.bf16.mxu1 %v3894_v23  ;;  %v5885_v42 = vpop.permute.xlu1 %2648 }
 0x36c   : > { %2468 = vmatpush1.bf16.msra.mxu1 %v3893_v5 }
 0x36d   : > { %2469 = vmatprep.subr.bf16.mxu1 %v3902_v12  ;;  %v5889_v33 = vpop.permute.xlu1 %2676 }
 0x36e   : > { %3922 = vmatmul.mubr.msk.bf16.gmra.mrb[68].mxu0 %vm2233_vm0, %v2040_v15 }
 0x36f   : > { %3916 = vmatmul.mubr.msk.bf16.gmra.mrb[52].mxu1 %vm2233_vm0, %v5788_v57 }
 0x370   : > { %2371 = vmatprep.mubr.bf16.mxu1 %v6235_v10  ;;  %2470 = vmatpush1.bf16.msra.mxu1 %v3901_v14 }
 0x371   : > { %2471 = vmatprep.subr.bf16.mxu1 %v3910_v6  ;;  %v5893_v40 = vpop.permute.xlu1 %2680 }
 0x374   : > { %2472 = vmatpush1.bf16.msra.mxu1 %v3909_v43 }
 0x375   : > { %v5897_v55 = vpop.permute.xlu1 %2708 }
 0x377   : > { %3917 = vmatmul.mubr.msk.bf16.gmra.mrb[56].mxu1 %vm2233_vm0, %v5793_v8 }
 0x378   : > { %2381 = vmatprep.mubr.bf16.mxu1 %v6235_v10 }
 0x379   : > { %v5901_v21 = vpop.permute.xlu1 %2712 }
 0x37f   : > { %3918 = vmatmul.mubr.msk.bf16.gmra.mrb[60].mxu1 %vm2233_vm0, %v2040_v15 }
 0x380   : > { %2497 = vmatprep.mubr.bf16.mxu1 %v6235_v10 }
 0x387   : > { %3923 = vmatmul.mubr.msk.bf16.vlgmr.msra.gmra.mrb[64].mxu1 %vm2233_vm0, %v5778_v36  ;;  %v4450_v36 = vld [vmem:[%s6270_s15] sm:$0xff]  }
 0x388   : > { %2507 = vmatprep.mubr.bf16.mxu1 %v6235_v10  ;;  %4226 = vmatprep.subr.bf16.mxu0 %v4450_v36 }
 0x389   : > { %4227 = vmatpush3.bf16.msra.mxu0 %v4450_v36 }
 0x38a   : > { %4228 = vmatprep.subr.bf16.mxu0 %v4451_v56 }
 0x38d   : > { %4229 = vmatpush3.bf16.msra.mxu0 %v4451_v56 }
 0x38e   : > { %4230 = vmatprep.subr.bf16.mxu0 %v4452_v50 }
 0x38f   : > { %3924 = vmatmul.mubr.msk.bf16.gmra.mrb[68].mxu1 %vm2233_vm0, %v5788_v57  ;;  %v5859_v57 = vpop.permute.xlu0 %2610 }
 0x390   : > { %2517 = vmatprep.mubr.bf16.mxu1 %v6235_v10 }
 0x391   : > { %4231 = vmatpush3.bf16.msra.mxu0 %v4452_v50 }
 0x392   : > { %4232 = vmatprep.subr.bf16.mxu0 %v4453_v11 }
 0x393   : > { %v5869_v45 = vpop.permute.xlu0 %2614 }
 0x395   : > { %4233 = vmatpush3.bf16.msra.mxu0 %v4453_v11 }
 0x396   : > { %4234 = vmatprep.subr.bf16.mxu0 %v4454_v28 }
 0x397   : > { %3925 = vmatmul.mubr.msk.bf16.gmra.mrb[72].mxu1 %vm2233_vm0, %v5793_v8  ;;  %v5876_v19 = vpop.permute.xlu0 %2642 }
 0x398   : > { %2527 = vmatprep.mubr.bf16.mxu1 %v6235_v10 }
 0x399   : > { %4235 = vmatpush3.bf16.msra.mxu0 %v4454_v28 }
 0x39a   : > { %4236 = vmatprep.subr.bf16.mxu0 %v4455_v20 }
 0x39b   : > { %v5883_v8 = vpop.permute.xlu0 %2646 }
 0x39d   : > { %4237 = vmatpush3.bf16.msra.mxu0 %v4455_v20 }
 0x39e   : > { %4238 = vmatprep.subr.bf16.mxu0 %v4456_v49 }
 0x39f   : > { %3926 = vmatmul.mubr.msk.bf16.gmra.mrb[76].mxu1 %vm2233_vm0, %v2040_v15  ;;  %v5887_v17 = vpop.permute.xlu0 %2674  ;;  %v5905_v15 = vpop.permute.xlu1 %2740 }
 0x3a0   : > { %3174 = vmatprep.mubr.bf16.mxu1 %v6235_v10 }
 0x3a1   : > { %4239 = vmatpush3.bf16.msra.mxu0 %v4456_v49 }
 0x3a2   : > { %4240 = vmatprep.subr.bf16.mxu0 %v4457_v53 }
 0x3a3   : > { %v5891_v39 = vpop.permute.xlu0 %2678  ;;  %v5909_v35 = vpop.permute.xlu1 %2744 }
 0x3a4   : > { %6272 = vst [vmem:[#allocation19_spill] sm:$0xff] %v5909_v35 }
 0x3a5   : > { %4241 = vmatpush3.bf16.msra.mxu0 %v4457_v53 }
 0x3a7   : > { %v5895_v32 = vpop.permute.xlu0 %2706  ;;  %v2557_v41 = vpop.permute.xlu1 %2556 }
 0x3ab   : > { %v5899_v61 = vpop.permute.xlu0 %2710  ;;  %v2561_v14 = vpop.permute.xlu1 %2560 }
 0x3af   : > { %v5903_v22 = vpop.permute.xlu0 %2738 }
 0x3b3   : > { %v5907_v18 = vpop.permute.xlu0 %2742 }
 0x3b7   : > { %v2555_v54 = vpop.permute.xlu0 %2554 }
 0x3bb   : > { %v2559_v4 = vpop.permute.xlu0 %2558 }
 0x3bf   : > { %v5913_v43 = vpop.permute.xlu0 %2586 }
 0x3c3   : > { %v5925_v49 = vpop.permute.xlu0 %2590 }
 0x419   : > { %v2280_v24 = vpop.f32.mrb[48].mxu0 }
 0x41a   : > { %v2538_v3 = vmul.f32 %v2280_v24, %v5433_v60  ;;  %v2282_v59 = vpop.f32.mrb[49].mxu0 }
 0x41b   : > { %v2562_v26 = vmul.f32 %v2547_v51, %v2282_v59  ;;  %v2284_v23 = vpop.f32.mrb[50].mxu0 }
 0x41c   : > { %v2539_v30 = vmul.f32 %v2284_v23, %v5444_v9  ;;  %v2286_v5 = vpop.f32.mrb[51].mxu0 }
 0x41d   : > { %v2570_v12 = vadd.f32 %v2562_v26, %v2538_v3  ;;  %v2563_v34 = vmul.f32 %v2549_v46, %v2286_v5  ;;  %v5923_v46 = vpop.permute.xlu1 %2588 }
 0x41f   : > { %v2571_v38 = vadd.f32 %v2563_v34, %v2539_v30 }
 0x421   : > { %v2290_v6 = vpop.f32.mrb[52].mxu0 }
 0x422   : > { %v2540_v36 = vmul.f32 %v2290_v6, %v5441_v7  ;;  %v2292_v56 = vpop.f32.mrb[53].mxu0 }
 0x423   : > { %v2564_v60 = vmul.f32 %v5835_v52, %v2292_v56  ;;  %v2294_v50 = vpop.f32.mrb[54].mxu0  ;;  %v5935_v56 = vpop.permute.xlu0 %2618 }
 0x424   : > { %v2541_v51 = vmul.f32 %v2294_v50, %v5467_v25  ;;  %v2296_v11 = vpop.f32.mrb[55].mxu0 }
 0x425   : > { %v5918_v28 = vadd.f32 %v2564_v60, %v2540_v36  ;;  %v2565_v9 = vmul.f32 %v5840_v1, %v2296_v11  ;;  %v5933_v36 = vpop.permute.xlu1 %2592 }
 0x427   : > { %v5921_v20 = vadd.f32 %v2565_v9, %v2541_v51 }
 0x429   : > { %v2426_v24 = vpop.f32.mrb[56].mxu0 }
 0x42a   : > { %v2300_v53 = vpop.f32.mrb[40].mxu1  ;;  %v2428_v52 = vpop.f32.mrb[57].mxu0 }
 0x42b   : > { %v2542_v7 = vmul.f32 %v2300_v53, %v5650_v13  ;;  %v2302_v3 = vpop.f32.mrb[41].mxu1  ;;  %v2430_v25 = vpop.f32.mrb[58].mxu0 }
 0x42c   : > { %v2566_v59 = vmul.f32 %v2555_v54, %v2302_v3  ;;  %v2304_v26 = vpop.f32.mrb[42].mxu1  ;;  %v2432_v5 = vpop.f32.mrb[59].mxu0 }
 0x42d   : > { %v2543_v23 = vmul.f32 %v2304_v26, %v5662_v31  ;;  %v2306_v30 = vpop.f32.mrb[43].mxu1 }
 0x42e   : > { %v5929_v1 = vadd.f32 %v2566_v59, %v2542_v7  ;;  %v2567_v34 = vmul.f32 %v2557_v41, %v2306_v30  ;;  %v5945_v30 = vpop.permute.xlu0 %2622 }
 0x430   : > { %v5931_v6 = vadd.f32 %v2567_v34, %v2543_v23  ;;  %v5943_v23 = vpop.permute.xlu1 %2620 }
 0x431   : > { %v2436_v13 = vpop.f32.mrb[60].mxu0 }
 0x432   : > { %v2310_v60 = vpop.f32.mrb[44].mxu1  ;;  %v2438_v51 = vpop.f32.mrb[61].mxu0 }
 0x433   : > { %v2544_v50 = vmul.f32 %v2310_v60, %v5668_v37  ;;  %v2312_v54 = vpop.f32.mrb[45].mxu1  ;;  %v2440_v31 = vpop.f32.mrb[62].mxu0 }
 0x434   : > { %v2568_v11 = vmul.f32 %v2559_v4, %v2312_v54  ;;  %v2314_v9 = vpop.f32.mrb[46].mxu1  ;;  %v2442_v3 = vpop.f32.mrb[63].mxu0 }
 0x435   : > { %v2545_v53 = vmul.f32 %v2314_v9, %v5488_v27  ;;  %v2316_v7 = vpop.f32.mrb[47].mxu1  ;;  %v5952_v58 = vpop.permute.xlu1 %2624 }
 0x436   : > { %v5939_v41 = vadd.f32 %v2568_v11, %v2544_v50  ;;  %v2569_v59 = vmul.f32 %v2561_v14, %v2316_v7  ;;  %v2658_v7 = vmul.f32 %v5876_v19, %v2426_v24 }
 0x438   : > { %v5941_v26 = vadd.f32 %v2569_v59, %v2545_v53 }
 0x439   : > { %v2446_v37 = vpop.f32.mrb[64].mxu0 }
 0x43a   : > { %v2353_v34 = vpop.f32.mrb[48].mxu1  ;;  %v2448_v54 = vpop.f32.mrb[65].mxu0 }
 0x43b   : > { %v2594_v60 = vmul.f32 %v5842_v48, %v2353_v34  ;;  %v2355_v4 = vpop.f32.mrb[49].mxu1  ;;  %v2450_v9 = vpop.f32.mrb[66].mxu0  ;;  %v2690_v34 = vmul.f32 %v5887_v17, %v2428_v52 }
 0x43c   : > { %v2626_v2 = vmul.f32 %v5859_v57, %v2355_v4  ;;  %v2357_v27 = vpop.f32.mrb[50].mxu1  ;;  %v2452_v11 = vpop.f32.mrb[67].mxu0  ;;  %v2659_v57 = vmul.f32 %v5881_v0, %v2430_v25 }
 0x43d   : > { %v2602_v63 = vadd.f32 %v2594_v60, %v2570_v12  ;;  %v2595_v50 = vmul.f32 %v5850_v62, %v2357_v27  ;;  %v2359_v14 = vpop.f32.mrb[51].mxu1  ;;  %v2651_v48 = vpop.permute.xlu0 %2650  ;;  %v2691_v62 = vmul.f32 %v5889_v33, %v2432_v5 }
 0x43e   : > { %v2627_v53 = vmul.f32 %v5867_v16, %v2359_v14  ;;  %v2653_v33 = vpop.permute.xlu1 %2652 }
 0x43f   : > { %v2634_v59 = vadd.f32 %v2626_v2, %v2602_v63  ;;  %v2603_v10 = vadd.f32 %v2595_v50, %v2571_v38 }
 0x441   : > { %v2666_v4 = vadd.f32 %v2658_v7, %v2634_v59  ;;  %v2635_v35 = vadd.f32 %v2627_v53, %v2603_v10  ;;  %v2456_v60 = vpop.f32.mrb[68].mxu0  ;;  %v2661_v53 = vmul.f32 %v5885_v42, %v2440_v31  ;;  %v2655_v59 = vpop.permute.xlu0 %2654 }
 0x442   : > { %v2363_v12 = vpop.f32.mrb[52].mxu1  ;;  %v2458_v19 = vpop.f32.mrb[69].mxu0 }
 0x443   : > { %v2667_v27 = vadd.f32 %v2659_v57, %v2635_v35  ;;  %v2596_v16 = vmul.f32 %v5852_v44, %v2363_v12  ;;  %v2365_v14 = vpop.f32.mrb[53].mxu1  ;;  %v5958_v63 = vadd.f32 %v2690_v34, %v2666_v4  ;;  %v2460_v24 = vpop.f32.mrb[70].mxu0  ;;  %v2660_v44 = vmul.f32 %v5883_v8, %v2436_v13 }
 0x444   : > { %v2628_v2 = vmul.f32 %v5869_v45, %v2365_v14  ;;  %v2367_v38 = vpop.f32.mrb[54].mxu1  ;;  %v2462_v52 = vpop.f32.mrb[71].mxu0  ;;  %v2692_v45 = vmul.f32 %v5891_v39, %v2438_v51  ;;  %v2693_v34 = vmul.f32 %v5893_v40, %v2442_v3  ;;  %v2662_v40 = vmul.f32 %v2651_v48, %v2446_v37 }
 0x445   : > { %v2604_v17 = vadd.f32 %v2596_v16, %v5918_v28  ;;  %v2597_v0 = vmul.f32 %v5857_v47, %v2367_v38  ;;  %v2369_v10 = vpop.f32.mrb[55].mxu1  ;;  %v5963_v25 = vadd.f32 %v2691_v62, %v2667_v27  ;;  %v2657_v8 = vpop.permute.xlu1 %2656  ;;  %v2663_v14 = vmul.f32 %v2653_v33, %v2450_v9 }
 0x446   : > { %v2629_v35 = vmul.f32 %v5874_v29, %v2369_v10  ;;  %v2683_v27 = vpop.permute.xlu0 %2682  ;;  %v2664_v33 = vmul.f32 %v2655_v59, %v2456_v60 }
 0x447   : > { %v2636_v5 = vadd.f32 %v2628_v2, %v2604_v17  ;;  %v2605_v50 = vadd.f32 %v2597_v0, %v5921_v20  ;;  %v2694_v16 = vmul.f32 %v2683_v27, %v2448_v54 }
 0x449   : > { %v2668_v7 = vadd.f32 %v2660_v44, %v2636_v5  ;;  %v2637_v28 = vadd.f32 %v2629_v35, %v2605_v50 }
 0x44a   : > { %v2373_v47 = vpop.f32.mrb[56].mxu1  ;;  %v2687_v50 = vpop.permute.xlu0 %2686 }
 0x44b   : > { %v2669_v57 = vadd.f32 %v2661_v53, %v2637_v28  ;;  %v2598_v4 = vmul.f32 %v5913_v43, %v2373_v47  ;;  %v2375_v12 = vpop.f32.mrb[57].mxu1  ;;  %v5972_v29 = vadd.f32 %v2692_v45, %v2668_v7  ;;  %v2696_v45 = vmul.f32 %v2687_v50, %v2458_v19 }
 0x44c   : > { %v2630_v13 = vmul.f32 %v5935_v56, %v2375_v12  ;;  %v2377_v20 = vpop.f32.mrb[58].mxu1  ;;  %v2685_v56 = vpop.permute.xlu1 %2684 }
 0x44d   : > { %v2606_v39 = vadd.f32 %v2598_v4, %v5929_v1  ;;  %v2599_v42 = vmul.f32 %v5923_v46, %v2377_v20  ;;  %v2379_v51 = vpop.f32.mrb[59].mxu1  ;;  %v5977_v31 = vadd.f32 %v2693_v34, %v2669_v57  ;;  %v2695_v0 = vmul.f32 %v2685_v56, %v2452_v11 }
 0x44e   : > { %v2631_v62 = vmul.f32 %v5943_v23, %v2379_v51  ;;  %v2715_v12 = vpop.permute.xlu0 %2714 }
 0x44f   : > { %v2638_v3 = vadd.f32 %v2630_v13, %v2606_v39  ;;  %v2607_v43 = vadd.f32 %v2599_v42, %v5931_v6 }
 0x450   : > { %v2689_v28 = vpop.permute.xlu1 %2688 }
 0x451   : > { %v2670_v2 = vadd.f32 %v2662_v40, %v2638_v3  ;;  %v2639_v38 = vadd.f32 %v2631_v62, %v2607_v43  ;;  %v2697_v47 = vmul.f32 %v2689_v28, %v2462_v52  ;;  %v6273_v3 = vld [vmem:[#allocation19_spill] sm:$0xff] }
 0x452   : > { %v2383_v17 = vpop.f32.mrb[60].mxu1  ;;  %v2719_v62 = vpop.permute.xlu0 %2718 }
 0x453   : > { %v2671_v1 = vadd.f32 %v2663_v14, %v2639_v38  ;;  %v2600_v46 = vmul.f32 %v5925_v49, %v2383_v17  ;;  %v2385_v10 = vpop.f32.mrb[61].mxu1  ;;  %v2702_v35 = vadd.f32 %v2694_v16, %v2670_v2  ;;  %v2665_v49 = vmul.f32 %v2657_v8, %v2460_v24 }
 0x454   : > { %v2632_v44 = vmul.f32 %v5945_v30, %v2385_v10  ;;  %v2387_v23 = vpop.f32.mrb[62].mxu1  ;;  %v2717_v13 = vpop.permute.xlu1 %2716 }
 0x455   : > { %v2608_v37 = vadd.f32 %v2600_v46, %v5939_v41  ;;  %v2601_v6 = vmul.f32 %v5933_v36, %v2387_v23  ;;  %v2389_v48 = vpop.f32.mrb[63].mxu1  ;;  %v2703_v54 = vadd.f32 %v2695_v0, %v2671_v1 }
 0x456   : > { %v2633_v9 = vmul.f32 %v5952_v58, %v2389_v48  ;;  %v2747_v2 = vpop.permute.xlu0 %2746 }
 0x457   : > { %v2640_v5 = vadd.f32 %v2632_v44, %v2608_v37  ;;  %v2609_v11 = vadd.f32 %v2601_v6, %v5941_v26 }
 0x459   : > { %v2672_v53 = vadd.f32 %v2664_v33, %v2640_v5  ;;  %v2641_v7 = vadd.f32 %v2633_v9, %v2609_v11 }
 0x45a   : > { %v2499_v30 = vpop.f32.mrb[64].mxu1  ;;  %v2751_v48 = vpop.permute.xlu0 %2750 }
 0x45b   : > { %v2673_v34 = vadd.f32 %v2665_v49, %v2641_v7  ;;  %v2722_v41 = vmul.f32 %v5895_v32, %v2499_v30  ;;  %v2501_v36 = vpop.f32.mrb[65].mxu1  ;;  %v2704_v57 = vadd.f32 %v2696_v45, %v2672_v53 }
 0x45c   : > { %v2754_v4 = vmul.f32 %v5903_v22, %v2501_v36  ;;  %v2503_v58 = vpop.f32.mrb[66].mxu1 }
 0x45d   : > { %v2730_v60 = vadd.f32 %v2722_v41, %v5958_v63  ;;  %v2723_v26 = vmul.f32 %v5897_v55, %v2503_v58  ;;  %v2505_v59 = vpop.f32.mrb[67].mxu1  ;;  %v2705_v19 = vadd.f32 %v2697_v47, %v2673_v34  ;;  %v4546_v41 = vld [vmem:[#allocation8] sm:$0xff] }
 0x45e   : > { %v2755_v24 = vmul.f32 %v5905_v15, %v2505_v59  ;;  %v4548_v59 = vld [vmem:[#allocation8 + $0x10] sm:$0xff] }
 0x45f   : > { %v2762_v8 = vadd.f32 %v2754_v4, %v2730_v60  ;;  %v2731_v52 = vadd.f32 %v2723_v26, %v5963_v25  ;;  %v2721_v25 = vpop.permute.xlu1 %2720  ;;  %v4547_v60 = vld [vmem:[#allocation8 + $0x8] sm:$0xff] }
 0x461   : > { %v2763_v20 = vadd.f32 %v2755_v24, %v2731_v52  ;;  %v4549_v24 = vld [vmem:[#allocation8 + $0x18] sm:$0xff]  ;;  %v4550_v52 = vld [vmem:[#allocation8 + $0x20] sm:$0xff] }
 0x462   : > { %v2509_v32 = vpop.f32.mrb[68].mxu1 }
 0x463   : > { %v2724_v39 = vmul.f32 %v5899_v61, %v2509_v32  ;;  %v2511_v42 = vpop.f32.mrb[69].mxu1  ;;  %v2770_v22 = vpack.c.bf16 %v2763_v20, %v2762_v8  ;;  %v2749_v1 = vpop.permute.xlu1 %2748 }
 0x464   : > { %v2756_v51 = vmul.f32 %v5907_v18, %v2511_v42  ;;  %v2513_v63 = vpop.f32.mrb[70].mxu1 }
 0x465   : > { %v2732_v55 = vadd.f32 %v2724_v39, %v5972_v29  ;;  %v2725_v40 = vmul.f32 %v5901_v21, %v2513_v63  ;;  %v2515_v15 = vpop.f32.mrb[71].mxu1  ;;  %4242 = vmatprep.mubr.bf16.mxu0 %v2770_v22  ;;  %v4551_v39 = vld [vmem:[#allocation8 + $0x28] sm:$0xff]  ;;  %v4552_v22 = vld [vmem:[#allocation8 + $0x30] sm:$0xff]  ;;  %v4553_v63 = vld [vmem:[#allocation8 + $0x38] sm:$0xff] }
 0x466   : > { %v2757_v43 = vmul.f32 %v6273_v3, %v2515_v15  ;;  %v4463_v15 = vld [vmem:[%s5014_s13 + $0x14] ss:$8 sps:$4 sm:$0xff]   ;;  %v4461_v3 = vld [vmem:[%s5014_s13 + $0x10] ss:$8 sps:$4 sm:$0xff]  }
 0x467   : > { %v2764_v27 = vadd.f32 %v2756_v51, %v2732_v55  ;;  %v2733_v16 = vadd.f32 %v2725_v40, %v5977_v31  ;;  %v2753_v50 = vpop.permute.xlu1 %2752  ;;  %v4458_v55 = vld [vmem:[%s5014_s13] ss:$8 sps:$4 sm:$0xff]   ;;  %v4460_v40 = vld [vmem:[%s5014_s13 + $0x4] ss:$8 sps:$4 sm:$0xff]  }
 0x468   : > { %3142 = vmatprep.subr.bf16.mxu1 %v4460_v40 }
 0x469   : > { %v2765_v14 = vadd.f32 %v2757_v43, %v2733_v16  ;;  %3143 = vmatpush1.bf16.msra.mxu1 %v4458_v55 }
 0x46a   : > { %v2519_v61 = vpop.f32.mrb[72].mxu1  ;;  %3144 = vmatprep.subr.bf16.mxu1 %v4463_v15 }
 0x46b   : > { %v2771_v38 = vpack.c.bf16 %v2765_v14, %v2764_v27  ;;  %v2726_v56 = vmul.f32 %v2715_v12, %v2519_v61  ;;  %v2521_v18 = vpop.f32.mrb[73].mxu1 }
 0x46c   : > { %v2758_v17 = vmul.f32 %v2747_v2, %v2521_v18  ;;  %v2523_v0 = vpop.f32.mrb[74].mxu1 }
 0x46d   : > { %v2734_v29 = vadd.f32 %v2726_v56, %v2702_v35  ;;  %v2727_v46 = vmul.f32 %v2717_v13, %v2523_v0  ;;  %v2525_v21 = vpop.f32.mrb[75].mxu1  ;;  %4243 = vmatmul.mubr.bf16.vlgmr.msra.gmra.mrb[72].mxu0 %v2771_v38  ;;  %3145 = vmatpush1.bf16.msra.mxu1 %v4461_v3 }
 0x46e   : > { %v2759_v10 = vmul.f32 %v2749_v1, %v2525_v21 }
 0x46f   : > { %v2766_v44 = vadd.f32 %v2758_v17, %v2734_v29  ;;  %v2735_v23 = vadd.f32 %v2727_v46, %v2703_v54 }
 0x471   : > { %v2767_v37 = vadd.f32 %v2759_v10, %v2735_v23 }
 0x472   : > { %v2529_v6 = vpop.f32.mrb[76].mxu1 }
 0x473   : > { %v2728_v31 = vmul.f32 %v2719_v62, %v2529_v6  ;;  %v2531_v9 = vpop.f32.mrb[77].mxu1  ;;  %v2772_v33 = vpack.c.bf16 %v2767_v37, %v2766_v44 }
 0x474   : > { %v2760_v5 = vmul.f32 %v2751_v48, %v2531_v9  ;;  %v2533_v11 = vpop.f32.mrb[78].mxu1 }
 0x475   : > { %v2736_v45 = vadd.f32 %v2728_v31, %v2704_v57  ;;  %v2729_v49 = vmul.f32 %v2721_v25, %v2533_v11  ;;  %v2535_v53 = vpop.f32.mrb[79].mxu1  ;;  %4246 = vmatprep.mubr.bf16.mxu0 %v2772_v33  ;;  %v4466_v31 = vld [vmem:[%s5014_s13 + $0x24] ss:$8 sps:$4 sm:$0xff]   ;;  %v4464_v11 = vld [vmem:[%s5014_s13 + $0x20] ss:$8 sps:$4 sm:$0xff]  }
 0x476   : > { %v2761_v35 = vmul.f32 %v2753_v50, %v2535_v53  ;;  %3146 = vmatprep.subr.bf16.mxu1 %v4466_v31 }
 0x477   : > { %v2768_v7 = vadd.f32 %v2760_v5, %v2736_v45  ;;  %v2737_v28 = vadd.f32 %v2729_v49, %v2705_v19  ;;  %3147 = vmatpush1.bf16.msra.mxu1 %v4464_v11 }
 0x479   : > { %v2769_v30 = vadd.f32 %v2761_v35, %v2737_v28  ;;  %v4469_v35 = vld [vmem:[%s5014_s13 + $0x34] ss:$8 sps:$4 sm:$0xff]  }
 0x47a   : > { %3148 = vmatprep.subr.bf16.mxu1 %v4469_v35 }
 0x47b   : > { %v2773_v47 = vpack.c.bf16 %v2769_v30, %v2768_v7  ;;  %v4467_v30 = vld [vmem:[%s5014_s13 + $0x30] ss:$8 sps:$4 sm:$0xff]  }
 0x47c   : > { %3149 = vmatpush1.bf16.msra.mxu1 %v4467_v30 }
 0x47d   : > { %4247 = vmatmul.mubr.bf16.gmra.mrb[76].mxu0 %v2773_v47 }
 0x540   : > { %v4244_v54 = vpop.f32.mrb[72].mxu0 }
 0x541   : > { %v2872_v34 = vpop.f32.mrb[73].mxu0  ;;  %v2905_v57 = vadd.f32 %v4548_v59, %v4244_v54  ;;  %v4472_v54 = vld [vmem:[%s5014_s13 + $0x44] ss:$8 sps:$4 sm:$0xff]  }
 0x542   : > { %v2903_v36 = vadd.f32 %v4546_v41, %v2872_v34  ;;  %v4245_v4 = vpop.f32.mrb[74].mxu0  ;;  %v4470_v34 = vld [vmem:[%s5014_s13 + $0x40] ss:$8 sps:$4 sm:$0xff]   ;;  %3150 = vmatprep.subr.bf16.mxu1 %v4472_v54  ;;  %v4475_v41 = vld [vmem:[%s5014_s13 + $0x54] ss:$8 sps:$4 sm:$0xff]  }
 0x543   : > { %v2875_v58 = vpop.f32.mrb[75].mxu0  ;;  %v2906_v12 = vadd.f32 %v4549_v24, %v4245_v4  ;;  %3151 = vmatpush1.bf16.msra.mxu1 %v4470_v34  ;;  %v4478_v4 = vld [vmem:[%s5014_s13 + $0x64] ss:$8 sps:$4 sm:$0xff]  }
 0x544   : > { %v2904_v26 = vadd.f32 %v4547_v60, %v2875_v58  ;;  %2913 = vadd.xlane.f32.xlu0 %v2903_v36  ;;  %3152 = vmatprep.subr.bf16.mxu1 %v4475_v41  ;;  %v4476_v58 = vld [vmem:[%s5014_s13 + $0x60] ss:$8 sps:$4 sm:$0xff]   ;;  %v4481_v60 = vld [vmem:[%s5014_s13 + $0x74] ss:$8 sps:$4 sm:$0xff]   ;;  %v6274_v41 = vmov 0  }
 0x545   : > { %v4482_v59 = vld [vmem:[%s4995_s11 + $0x40] sm:$0xff]   ;;  %v4484_v24 = vld [vmem:[%s4995_s11 + $0x48] sm:$0xff]  }
 0x546   : > { %2915 = vadd.xlane.f32.xlu1 %v2904_v26  ;;  %4162 = vmatprep.subr.bf16.mxu0 %v4482_v59 }
 0x548   : > { %2917 = vadd.xlane.f32.xlu0 %v2905_v57 }
 0x54c   : > { %2919 = vadd.xlane.f32.xlu0 %v2906_v12 }
 0x550   : > { %v4248_v19 = vpop.f32.mrb[76].mxu0 }
 0x551   : > { %v2888_v8 = vpop.f32.mrb[77].mxu0  ;;  %v2909_v51 = vadd.f32 %v4552_v22, %v4248_v19  ;;  %v4486_v19 = vld [vmem:[%s4995_s11 + $0x50] sm:$0xff]  }
 0x552   : > { %v2907_v13 = vadd.f32 %v4550_v52, %v2888_v8  ;;  %v4249_v20 = vpop.f32.mrb[78].mxu0  ;;  %v4487_v8 = vld [vmem:[%s4995_s11 + $0x10] sm:$0xff]   ;;  %v4488_v52 = vld [vmem:[%s4995_s11 + $0x58] sm:$0xff]  }
 0x553   : > { %v2891_v32 = vpop.f32.mrb[79].mxu0  ;;  %v2910_v62 = vadd.f32 %v4553_v63, %v4249_v20  ;;  %v4490_v20 = vld [vmem:[%s4995_s11 + $0x60] sm:$0xff]  }
 0x554   : > { %v2908_v42 = vadd.f32 %v4551_v39, %v2891_v32  ;;  %2921 = vadd.xlane.f32.xlu1 %v2907_v13  ;;  %v4491_v32 = vld [vmem:[%s4995_s11 + $0x20] sm:$0xff]   ;;  %v4492_v39 = vld [vmem:[%s4995_s11 + $0x68] sm:$0xff]  }
 0x556   : > { %2923 = vadd.xlane.f32.xlu0 %v2908_v42 }
 0x558   : > { %2925 = vadd.xlane.f32.xlu1 %v2909_v51 }
 0x55a   : > { %2927 = vadd.xlane.f32.xlu0 %v2910_v62 }
 0x5d1   : > { %v2914_v43 = vpop.xlane.xlu0 %2913 }
 0x5d2   : > { %v2930_v25 = vmul.f32 0.0078125, %v2914_v43 }
 0x5d3   : > { %v2916_v27 = vpop.xlane.xlu1 %2915 }
 0x5d4   : > { %v6003_v16 = vsub.f32 %v2903_v36, %v2930_v25  ;;  %v2931_v14 = vmul.f32 0.0078125, %v2916_v27  ;;  %v4473_v36 = vld [vmem:[%s5014_s13 + $0x50] ss:$8 sps:$4 sm:$0xff]  }
 0x5d5   : > { %v2918_v61 = vpop.xlane.xlu0 %2917  ;;  %3153 = vmatpush1.bf16.msra.mxu1 %v4473_v36 }
 0x5d6   : > { %v6005_v2 = vsub.f32 %v2904_v26, %v2931_v14  ;;  %v2932_v38 = vmul.f32 0.0078125, %v2918_v61  ;;  %v2946_v56 = vmul.f32 %v6003_v16, %v6003_v16  ;;  %3154 = vmatprep.subr.bf16.mxu1 %v4478_v4  ;;  %v4479_v26 = vld [vmem:[%s5014_s13 + $0x70] ss:$8 sps:$4 sm:$0xff]   ;;  %v3935_v61 = vld [vmem:[%s682_s14] ss:$0 sm:$0xff] }
 0x5d8   : > { %v6009_v18 = vsub.f32 %v2905_v57, %v2932_v38  ;;  %2954 = vadd.xlane.f32.xlu1 %v2946_v56  ;;  %v2947_v17 = vmul.f32 %v6005_v2, %v6005_v2  ;;  %v4483_v57 = vld [vmem:[%s4995_s11] sm:$0xff]  }
 0x5d9   : > { %v2920_v0 = vpop.xlane.xlu0 %2919  ;;  %3155 = vmatpush1.bf16.msra.mxu1 %v4476_v58  ;;  %4163 = vmatpush3.bf16.msra.mxu0 %v4483_v57 }
 0x5da   : > { %v2933_v1 = vmul.f32 0.0078125, %v2920_v0  ;;  %2956 = vadd.xlane.f32.xlu0 %v2947_v17  ;;  %v2948_v29 = vmul.f32 %v6009_v18, %v6009_v18  ;;  %3156 = vmatprep.subr.bf16.mxu1 %v4481_v60 }
 0x5db   : > { %4164 = vmatprep.subr.bf16.mxu0 %v4484_v24 }
 0x5dc   : > { %v6015_v46 = vsub.f32 %v2906_v12, %v2933_v1  ;;  %2958 = vadd.xlane.f32.xlu1 %v2948_v29  ;;  %v4485_v12 = vld [vmem:[%s4995_s11 + $0x8] sm:$0xff]  }
 0x5dd   : > { %3157 = vmatpush1.bf16.msra.mxu1 %v4479_v26  ;;  %4165 = vmatpush3.bf16.msra.mxu0 %v4485_v12 }
 0x5de   : > { %v2949_v21 = vmul.f32 %v6015_v46, %v6015_v46  ;;  %4166 = vmatprep.subr.bf16.mxu0 %v4486_v19 }
 0x5e0   : > { %2960 = vadd.xlane.f32.xlu0 %v2949_v21 }
 0x5e1   : > { %v2922_v10 = vpop.xlane.xlu1 %2921  ;;  %4167 = vmatpush3.bf16.msra.mxu0 %v4487_v8 }
 0x5e2   : > { %v2934_v44 = vmul.f32 0.0078125, %v2922_v10  ;;  %4168 = vmatprep.subr.bf16.mxu0 %v4488_v52 }
 0x5e3   : > { %v2924_v23 = vpop.xlane.xlu0 %2923 }
 0x5e4   : > { %v6019_v37 = vsub.f32 %v2907_v13, %v2934_v44  ;;  %v2935_v6 = vmul.f32 0.0078125, %v2924_v23  ;;  %v4489_v13 = vld [vmem:[%s4995_s11 + $0x18] sm:$0xff]  }
 0x5e5   : > { %v2926_v48 = vpop.xlane.xlu1 %2925  ;;  %4169 = vmatpush3.bf16.msra.mxu0 %v4489_v13 }
 0x5e6   : > { %v6022_v9 = vsub.f32 %v2908_v42, %v2935_v6  ;;  %v2936_v33 = vmul.f32 0.0078125, %v2926_v48  ;;  %v2950_v5 = vmul.f32 %v6019_v37, %v6019_v37  ;;  %4170 = vmatprep.subr.bf16.mxu0 %v4490_v20  ;;  %v3936_v6 = vld [vmem:[%s685_s3] ss:$0 sm:$0xff] }
 0x5e7   : > { %v2928_v50 = vpop.xlane.xlu0 %2927 }
 0x5e8   : > { %v6027_v45 = vsub.f32 %v2909_v51, %v2936_v33  ;;  %v2937_v49 = vmul.f32 0.0078125, %v2928_v50  ;;  %2962 = vadd.xlane.f32.xlu1 %v2950_v5  ;;  %v2951_v53 = vmul.f32 %v6022_v9, %v6022_v9 }
 0x5e9   : > { %4171 = vmatpush3.bf16.msra.mxu0 %v4491_v32 }
 0x5ea   : > { %v6032_v7 = vsub.f32 %v2910_v62, %v2937_v49  ;;  %2964 = vadd.xlane.f32.xlu0 %v2951_v53  ;;  %v2952_v28 = vmul.f32 %v6027_v45, %v6027_v45  ;;  %4172 = vmatprep.subr.bf16.mxu0 %v4492_v39 }
 0x5ec   : > { %2966 = vadd.xlane.f32.xlu1 %v2952_v28  ;;  %v2953_v47 = vmul.f32 %v6032_v7, %v6032_v7 }
 0x5ee   : > { %2968 = vadd.xlane.f32.xlu0 %v2953_v47 }
 0x665   : > { %v2955_v42 = vpop.xlane.xlu1 %2954 }
 0x666   : > { %v2970_v22 = vmul.f32 0.0078125, %v2955_v42  ;;  %v4494_v42 = vld [vmem:[%s4995_s11 + $0x70] sm:$0xff]  }
 0x667   : > { %v2957_v51 = vpop.xlane.xlu0 %2956 }
 0x668   : > { %v2978_v63 = vadd.f32 1e-05, %v2970_v22  ;;  %v2971_v62 = vmul.f32 0.0078125, %v2957_v51  ;;  %v4495_v22 = vld [vmem:[%s4995_s11 + $0x30] sm:$0xff]   ;;  %v4496_v51 = vld [vmem:[%s4995_s11 + $0x78] sm:$0xff]  }
 0x669   : > { %v2959_v55 = vpop.xlane.xlu1 %2958 }
 0x66a   : > { %4514 = vrsqrt.f32 %v2978_v63  ;;  %v2979_v40 = vadd.f32 1e-05, %v2971_v62  ;;  %v2972_v15 = vmul.f32 0.0078125, %v2959_v55  ;;  %v4497_v63 = vld [vmem:[%s4995_s11 + $0x38] sm:$0xff]   ;;  %v6275_v55 = vld [vmem:[#allocation18_spill] sm:$0xff] }
 0x66b   : > { %v3050_v62 = vld [vmem:[%s5025_s0] sm:$0x3]  ;;  %s6278_s0 = scalar_lea.vmem %s6213_s6, %s5007_s21  ;;  %s4747_s21 = smov [#allocation8]  }
 0x66c   : > { %4516 = vrsqrt.f32 %v2979_v40  ;;  %v2980_v3 = vadd.f32 1e-05, %v2972_v15  ;;  %v6276_v40 = vsub.s32 0, %v6275_v55  ;;  %s3582_s1 = sshll.u32 %s4747_s21, 4  ;;  %s3583_s1 = int_to_ptr.vmem [resolvable:$true] %s3582_s1 }
 0x66d   : > { %v2961_v43 = vpop.xlane.xlu0 %2960  ;;  %s4642_s5 = scalar_lea.vmem %s3583_s1, 1024  ;;  %p4649_p0 = scmp.lt.s32.totalorder %s3583_s1, %s3583_s1 }
 0x66e   : > { %4518 = vrsqrt.f32 %v2980_v3  ;;  %v2973_v25 = vmul.f32 0.0078125, %v2961_v43  ;;  %v3055_v15 = vrot.slane %v3050_v62, %v6276_v40  ;;  %v6277_v3 = vsub.s32 1, %v6275_v55  ;;  %p4643_p13 = scmp.ne.s32.totalorder %s3583_s1, %s4642_s5  ;;  %p4650_p6 = scmp.lt.s32.totalorder %s4642_s5, %s4642_s5 }
 0x670   : > { %v2981_v27 = vadd.f32 1e-05, %v2973_v25  ;;  %v3059_v43 = vrot.slane %v3050_v62, %v6277_v3  ;;  %p4644_p2 = pnand %p4643_p13, %p4288_p7  ;;  %p4651_p4 = por %p4650_p6, %p4649_p0 }
 0x672   : > { %4520 = vrsqrt.f32 %v2981_v27  ;;  %p4645_p3 = pneg %p4644_p2 }
 0x674   : > { %v4515_v14 = vpop.eup %4514  ;;  %p4652_p5 = pnand %p4651_p4, %p4645_p3 }
 0x675   : > { %v2994_v38 = vmul.f32 %v4515_v14, %v6003_v16  ;;  %v2963_v56 = vpop.xlane.xlu1 %2962 }
 0x676   : > { %v4517_v17 = vpop.eup %4516  ;;  %v2974_v0 = vmul.f32 0.0078125, %v2963_v56 }
 0x677   : > { %v3008_v1 = vmul.f32 %v3935_v61, %v2994_v38  ;;  %v2995_v29 = vmul.f32 %v4517_v17, %v6005_v2  ;;  %v2965_v21 = vpop.xlane.xlu0 %2964 }
 0x678   : > { %v4519_v10 = vpop.eup %4518  ;;  %v2982_v44 = vadd.f32 1e-05, %v2974_v0  ;;  %v2975_v23 = vmul.f32 0.0078125, %v2965_v21 }
 0x679   : > { %v3009_v48 = vmul.f32 %v3935_v61, %v2995_v29  ;;  %v2967_v31 = vpop.xlane.xlu1 %2966  ;;  %v6070_v11 = vadd.f32 %v3936_v6, %v3008_v1  ;;  %v2996_v2 = vmul.f32 %v4519_v10, %v6009_v18 }
 0x67a   : > { %4522 = vrsqrt.f32 %v2982_v44  ;;  %v2983_v33 = vadd.f32 1e-05, %v2975_v23  ;;  %v2976_v16 = vmul.f32 0.0078125, %v2967_v31 }
 0x67b   : > { %v2969_v5 = vpop.xlane.xlu0 %2968  ;;  %v6072_v50 = vadd.f32 %v3936_v6, %v3009_v48  ;;  %v3010_v54 = vmul.f32 %v3935_v61, %v2996_v2 }
 0x67c   : > { %v4521_v49 = vpop.eup %4520  ;;  %4524 = vrsqrt.f32 %v2983_v33  ;;  %v2984_v53 = vadd.f32 1e-05, %v2976_v16  ;;  %v2977_v35 = vmul.f32 0.0078125, %v2969_v5 }
 0x67d   : > { %v3030_v28 = vpack.c.bf16 %v6072_v50, %v6070_v11  ;;  %v2997_v30 = vmul.f32 %v4521_v49, %v6015_v46  ;;  %v6081_v18 = vadd.f32 %v3936_v6, %v3010_v54 }
 0x67e   : > { %4526 = vrsqrt.f32 %v2984_v53  ;;  %v2985_v47 = vadd.f32 1e-05, %v2977_v35 }
 0x67f   : > { %3175 = vmatmul.mubr.bf16.vlgmr.msra.gmra.mrb[80].mxu1 %v3030_v28  ;;  %v3011_v34 = vmul.f32 %v3935_v61, %v2997_v30 }
 0x680   : > { %4528 = vrsqrt.f32 %v2985_v47  ;;  %3184 = vmatprep.mubr.bf16.mxu1 %v6274_v41 }
 0x681   : > { %v6079_v36 = vadd.f32 %v3936_v6, %v3011_v34 }
 0x683   : > { %v3031_v58 = vpack.c.bf16 %v6079_v36, %v6081_v18 }
 0x684   : > { %v4523_v4 = vpop.eup %4522 }
 0x685   : > { %v2998_v60 = vmul.f32 %v4523_v4, %v6019_v37 }
 0x686   : > { %v4525_v26 = vpop.eup %4524 }
 0x687   : > { %3185 = vmatmul.mubr.bf16.gmra.mrb[84].mxu1 %v3031_v58  ;;  %v2999_v46 = vmul.f32 %v4525_v26, %v6022_v9  ;;  %v3012_v59 = vmul.f32 %v3935_v61, %v2998_v60 }
 0x688   : > { %v4527_v57 = vpop.eup %4526  ;;  %3194 = vmatprep.mubr.bf16.mxu1 %v6274_v41 }
 0x689   : > { %v3013_v24 = vmul.f32 %v3935_v61, %v2999_v46  ;;  %v6088_v19 = vadd.f32 %v3936_v6, %v3012_v59  ;;  %v3000_v52 = vmul.f32 %v4527_v57, %v6027_v45 }
 0x68a   : > { %v4529_v12 = vpop.eup %4528 }
 0x68b   : > { %v6090_v8 = vadd.f32 %v3936_v6, %v3013_v24  ;;  %v3001_v37 = vmul.f32 %v4529_v12, %v6032_v7  ;;  %v3014_v20 = vmul.f32 %v3935_v61, %v3000_v52  ;;  %v4493_v7 = vld [vmem:[%s4995_s11 + $0x28] sm:$0xff]  }
 0x68c   : > { %4173 = vmatpush3.bf16.msra.mxu0 %v4493_v7 }
 0x68d   : > { %v3032_v9 = vpack.c.bf16 %v6090_v8, %v6088_v19  ;;  %v3015_v13 = vmul.f32 %v3935_v61, %v3001_v37  ;;  %v6099_v39 = vadd.f32 %v3936_v6, %v3014_v20  ;;  %4174 = vmatprep.subr.bf16.mxu0 %v4494_v42 }
 0x68f   : > { %3195 = vmatmul.mubr.bf16.gmra.mrb[88].mxu1 %v3032_v9  ;;  %v6097_v32 = vadd.f32 %v3936_v6, %v3015_v13 }
 0x690   : > { %3204 = vmatprep.mubr.bf16.mxu1 %v6274_v41  ;;  %4175 = vmatpush3.bf16.msra.mxu0 %v4495_v22 }
 0x691   : > { %v3033_v45 = vpack.c.bf16 %v6097_v32, %v6099_v39  ;;  %4176 = vmatprep.subr.bf16.mxu0 %v4496_v51 }
 0x694   : > { %4177 = vmatpush3.bf16.msra.mxu0 %v4497_v63 }
 0x697   : > { %3205 = vmatmul.mubr.bf16.gmra.mrb[92].mxu1 %v3033_v45 }
 0x752   : > { %v3176_v25 = vpop.f32.mrb[80].mxu1 }
 0x753   : > { %v3177_v27 = vadd.f32 %v3176_v25, %v3055_v15  ;;  %v3178_v14 = vpop.f32.mrb[81].mxu1 }
 0x754   : > { %v3179_v61 = vadd.f32 %v3178_v14, %v3059_v43  ;;  %v3180_v38 = vpop.f32.mrb[82].mxu1 }
 0x755   : > { %v3181_v56 = vadd.f32 %v3180_v38, %v3055_v15  ;;  %v3182_v17 = vpop.f32.mrb[83].mxu1  ;;  %v3215_v1 = vmax.f32 %v3177_v27, 0.0 }
 0x756   : > { %v3183_v0 = vadd.f32 %v3182_v17, %v3059_v43  ;;  %v3216_v21 = vmax.f32 %v3179_v61, 0.0  ;;  %v3953_v61 = vld [vmem:[%s6278_s0] ss:$0 sm:$0xff] }
 0x757   : > { %v3217_v29 = vmax.f32 %v3181_v56, 0.0 }
 0x758   : > { %v3218_v10 = vmax.f32 %v3183_v0, 0.0 }
 0x759   : > { %v3231_v44 = vpack.c.bf16 %v3217_v29, %v3215_v1 }
 0x75a   : > { %v3232_v23 = vpack.c.bf16 %v3218_v10, %v3216_v21  ;;  %v3186_v6 = vpop.f32.mrb[84].mxu1 }
 0x75b   : > { %v3187_v48 = vadd.f32 %v3186_v6, %v3055_v15  ;;  %v3188_v31 = vpop.f32.mrb[85].mxu1 }
 0x75c   : > { %v3189_v33 = vadd.f32 %v3188_v31, %v3059_v43  ;;  %v3190_v16 = vpop.f32.mrb[86].mxu1  ;;  %3406 = vmatprep.mubr.bf16.mxu0 %v3232_v23 }
 0x75d   : > { %v3191_v5 = vadd.f32 %v3190_v16, %v3055_v15  ;;  %v3192_v2 = vpop.f32.mrb[87].mxu1  ;;  %3407 = vmatmul.mubr.bf16.vlgmr.msra.gmra.mrb[80].mxu0 %v3231_v44  ;;  %v3219_v53 = vmax.f32 %v3187_v48, 0.0 }
 0x75e   : > { %v3193_v49 = vadd.f32 %v3192_v2, %v3059_v43  ;;  %v3220_v28 = vmax.f32 %v3189_v33, 0.0 }
 0x75f   : > { %v3221_v35 = vmax.f32 %v3191_v5, 0.0 }
 0x760   : > { %v3222_v30 = vmax.f32 %v3193_v49, 0.0 }
 0x761   : > { %v3233_v47 = vpack.c.bf16 %v3221_v35, %v3219_v53 }
 0x762   : > { %v3234_v54 = vpack.c.bf16 %v3222_v30, %v3220_v28  ;;  %v3196_v34 = vpop.f32.mrb[88].mxu1 }
 0x763   : > { %v3197_v41 = vadd.f32 %v3196_v34, %v3055_v15  ;;  %v3198_v4 = vpop.f32.mrb[89].mxu1 }
 0x764   : > { %v3199_v58 = vadd.f32 %v3198_v4, %v3059_v43  ;;  %v3200_v60 = vpop.f32.mrb[90].mxu1  ;;  %3414 = vmatprep.mubr.bf16.mxu0 %v3234_v54 }
 0x765   : > { %v3201_v26 = vadd.f32 %v3200_v60, %v3055_v15  ;;  %v3202_v46 = vpop.f32.mrb[91].mxu1  ;;  %3415 = vmatmul.mubr.bf16.gmra.mrb[84].mxu0 %v3233_v47  ;;  %v3223_v57 = vmax.f32 %v3197_v41, 0.0 }
 0x766   : > { %v3203_v59 = vadd.f32 %v3202_v46, %v3059_v43  ;;  %v3224_v12 = vmax.f32 %v3199_v58, 0.0 }
 0x767   : > { %v3225_v24 = vmax.f32 %v3201_v26, 0.0 }
 0x768   : > { %v3226_v52 = vmax.f32 %v3203_v59, 0.0 }
 0x769   : > { %v3235_v37 = vpack.c.bf16 %v3225_v24, %v3223_v57 }
 0x76a   : > { %v3236_v9 = vpack.c.bf16 %v3226_v52, %v3224_v12  ;;  %v3206_v13 = vpop.f32.mrb[92].mxu1 }
 0x76b   : > { %v3207_v20 = vadd.f32 %v3206_v13, %v3055_v15  ;;  %v3208_v45 = vpop.f32.mrb[93].mxu1 }
 0x76c   : > { %v3209_v7 = vadd.f32 %v3208_v45, %v3059_v43  ;;  %v3210_v42 = vpop.f32.mrb[94].mxu1  ;;  %3422 = vmatprep.mubr.bf16.mxu0 %v3236_v9 }
 0x76d   : > { %v3211_v22 = vadd.f32 %v3210_v42, %v3055_v15  ;;  %v3212_v51 = vpop.f32.mrb[95].mxu1  ;;  %3423 = vmatmul.mubr.bf16.gmra.mrb[88].mxu0 %v3235_v37  ;;  %v3227_v62 = vmax.f32 %v3207_v20, 0.0 }
 0x76e   : > { %v3213_v63 = vadd.f32 %v3212_v51, %v3059_v43  ;;  %v3228_v40 = vmax.f32 %v3209_v7, 0.0 }
 0x76f   : > { %v3229_v55 = vmax.f32 %v3211_v22, 0.0 }
 0x770   : > { %v3230_v3 = vmax.f32 %v3213_v63, 0.0 }
 0x771   : > { %v3237_v25 = vpack.c.bf16 %v3229_v55, %v3227_v62 }
 0x772   : > { %v3238_v27 = vpack.c.bf16 %v3230_v3, %v3228_v40 }
 0x774   : > { %3430 = vmatprep.mubr.bf16.mxu0 %v3238_v27 }
 0x775   : > { %3431 = vmatmul.mubr.bf16.gmra.mrb[92].mxu0 %v3237_v25 }
 0x830   : > { %v4178_v14 = vpop.f32.mrb[80].mxu0 }
 0x831   : > { %v4179_v38 = vpop.f32.mrb[81].mxu0 }
 0x832   : > { %v4180_v56 = vadd.f32 %v4179_v38, %v4178_v14  ;;  %v4181_v15 = vpop.f32.mrb[82].mxu0 }
 0x833   : > { %v4182_v17 = vpop.f32.mrb[83].mxu0 }
 0x834   : > { %v3409_v0 = vadd.f32 %v4180_v56, %v3953_v61  ;;  %v4183_v43 = vadd.f32 %v4182_v17, %v4181_v15 }
 0x836   : > { %v3412_v1 = vadd.f32 %v4183_v43, %v3953_v61  ;;  %v3439_v29 = vadd.f32 %v3409_v0, %v6070_v11 }
 0x838   : > { %3449 = vadd.xlane.f32.xlu1 %v3439_v29  ;;  %v4184_v21 = vpop.f32.mrb[84].mxu0  ;;  %v3440_v10 = vadd.f32 %v3412_v1, %v6072_v50 }
 0x839   : > { %v4185_v44 = vpop.f32.mrb[85].mxu0 }
 0x83a   : > { %v4186_v23 = vadd.f32 %v4185_v44, %v4184_v21  ;;  %3451 = vadd.xlane.f32.xlu0 %v3440_v10  ;;  %v4187_v6 = vpop.f32.mrb[86].mxu0 }
 0x83b   : > { %v4188_v48 = vpop.f32.mrb[87].mxu0 }
 0x83c   : > { %v3417_v31 = vadd.f32 %v4186_v23, %v3953_v61  ;;  %v4189_v33 = vadd.f32 %v4188_v48, %v4187_v6 }
 0x83e   : > { %v3420_v16 = vadd.f32 %v4189_v33, %v3953_v61  ;;  %v3441_v5 = vadd.f32 %v3417_v31, %v6081_v18 }
 0x840   : > { %3453 = vadd.xlane.f32.xlu1 %v3441_v5  ;;  %v4190_v2 = vpop.f32.mrb[88].mxu0  ;;  %v3442_v49 = vadd.f32 %v3420_v16, %v6079_v36 }
 0x841   : > { %v4191_v53 = vpop.f32.mrb[89].mxu0 }
 0x842   : > { %v4192_v11 = vadd.f32 %v4191_v53, %v4190_v2  ;;  %3455 = vadd.xlane.f32.xlu0 %v3442_v49  ;;  %v4193_v35 = vpop.f32.mrb[90].mxu0  ;;  %v3970_v53 = vld [vmem:[%s6279_s2] ss:$0 sm:$0xff] }
 0x843   : > { %v4194_v28 = vpop.f32.mrb[91].mxu0 }
 0x844   : > { %v3425_v50 = vadd.f32 %v4192_v11, %v3953_v61  ;;  %v4195_v30 = vadd.f32 %v4194_v28, %v4193_v35 }
 0x846   : > { %v3428_v47 = vadd.f32 %v4195_v30, %v3953_v61  ;;  %v3443_v54 = vadd.f32 %v3425_v50, %v6088_v19  ;;  %v3971_v50 = vld [vmem:[%s6280_s12] ss:$0 sm:$0xff] }
 0x848   : > { %3457 = vadd.xlane.f32.xlu1 %v3443_v54  ;;  %v4196_v34 = vpop.f32.mrb[92].mxu0  ;;  %v3444_v41 = vadd.f32 %v3428_v47, %v6090_v8 }
 0x849   : > { %v4197_v4 = vpop.f32.mrb[93].mxu0 }
 0x84a   : > { %v4198_v18 = vadd.f32 %v4197_v4, %v4196_v34  ;;  %3459 = vadd.xlane.f32.xlu0 %v3444_v41  ;;  %v4199_v58 = vpop.f32.mrb[94].mxu0 }
 0x84b   : > { %v4200_v60 = vpop.f32.mrb[95].mxu0 }
 0x84c   : > { %v3433_v36 = vadd.f32 %v4198_v18, %v3953_v61  ;;  %v4201_v26 = vadd.f32 %v4200_v60, %v4199_v58 }
 0x84e   : > { %v3436_v46 = vadd.f32 %v4201_v26, %v3953_v61  ;;  %v3445_v59 = vadd.f32 %v3433_v36, %v6099_v39 }
 0x850   : > { %3461 = vadd.xlane.f32.xlu1 %v3445_v59  ;;  %v3446_v57 = vadd.f32 %v3436_v46, %v6097_v32 }
 0x852   : > { %3463 = vadd.xlane.f32.xlu0 %v3446_v57 }
 0x8c5   : > { %v3450_v24 = vpop.xlane.xlu1 %3449 }
 0x8c6   : > { %v3465_v19 = vmul.f32 0.0078125, %v3450_v24 }
 0x8c7   : > { %v3452_v12 = vpop.xlane.xlu0 %3451 }
 0x8c8   : > { %v3473_v52 = vsub.f32 %v3439_v29, %v3465_v19  ;;  %v3466_v37 = vmul.f32 0.0078125, %v3452_v12 }
 0x8ca   : > { %v3474_v8 = vsub.f32 %v3440_v10, %v3466_v37  ;;  %v3481_v9 = vmul.f32 %v3473_v52, %v3473_v52 }
 0x8cc   : > { %3489 = vadd.xlane.f32.xlu1 %v3481_v9  ;;  %v3482_v13 = vmul.f32 %v3474_v8, %v3474_v8 }
 0x8cd   : > { %v3454_v20 = vpop.xlane.xlu1 %3453 }
 0x8ce   : > { %v3467_v45 = vmul.f32 0.0078125, %v3454_v20  ;;  %3491 = vadd.xlane.f32.xlu0 %v3482_v13 }
 0x8cf   : > { %v3456_v7 = vpop.xlane.xlu0 %3455 }
 0x8d0   : > { %v6126_v42 = vsub.f32 %v3441_v5, %v3467_v45  ;;  %v3468_v39 = vmul.f32 0.0078125, %v3456_v7 }
 0x8d2   : > { %v6128_v22 = vsub.f32 %v3442_v49, %v3468_v39  ;;  %v3483_v32 = vmul.f32 %v6126_v42, %v6126_v42 }
 0x8d4   : > { %3493 = vadd.xlane.f32.xlu1 %v3483_v32  ;;  %v3484_v51 = vmul.f32 %v6128_v22, %v6128_v22 }
 0x8d5   : > { %v3458_v63 = vpop.xlane.xlu1 %3457 }
 0x8d6   : > { %v3469_v62 = vmul.f32 0.0078125, %v3458_v63  ;;  %3495 = vadd.xlane.f32.xlu0 %v3484_v51 }
 0x8d7   : > { %v3460_v55 = vpop.xlane.xlu0 %3459 }
 0x8d8   : > { %v6134_v40 = vsub.f32 %v3443_v54, %v3469_v62  ;;  %v3470_v3 = vmul.f32 0.0078125, %v3460_v55 }
 0x8da   : > { %v6136_v25 = vsub.f32 %v3444_v41, %v3470_v3  ;;  %v3485_v27 = vmul.f32 %v6134_v40, %v6134_v40 }
 0x8dc   : > { %3497 = vadd.xlane.f32.xlu1 %v3485_v27  ;;  %v3486_v14 = vmul.f32 %v6136_v25, %v6136_v25 }
 0x8dd   : > { %v3462_v61 = vpop.xlane.xlu1 %3461 }
 0x8de   : > { %v3471_v38 = vmul.f32 0.0078125, %v3462_v61  ;;  %3499 = vadd.xlane.f32.xlu0 %v3486_v14 }
 0x8df   : > { %v3464_v56 = vpop.xlane.xlu0 %3463 }
 0x8e0   : > { %v6142_v15 = vsub.f32 %v3445_v59, %v3471_v38  ;;  %v3472_v17 = vmul.f32 0.0078125, %v3464_v56 }
 0x8e2   : > { %v6144_v0 = vsub.f32 %v3446_v57, %v3472_v17  ;;  %v3487_v43 = vmul.f32 %v6142_v15, %v6142_v15 }
 0x8e4   : > { %3501 = vadd.xlane.f32.xlu1 %v3487_v43  ;;  %v3488_v1 = vmul.f32 %v6144_v0, %v6144_v0 }
 0x8e6   : > { %3503 = vadd.xlane.f32.xlu0 %v3488_v1 }
 0x959   : > { %v3490_v29 = vpop.xlane.xlu1 %3489 }
 0x95a   : > { %v3505_v21 = vmul.f32 0.0078125, %v3490_v29 }
 0x95b   : > { %v3492_v10 = vpop.xlane.xlu0 %3491 }
 0x95c   : > { %v3513_v44 = vadd.f32 1e-05, %v3505_v21  ;;  %v3506_v23 = vmul.f32 0.0078125, %v3492_v10 }
 0x95e   : > { %4530 = vrsqrt.f32 %v3513_v44  ;;  %v3514_v6 = vadd.f32 1e-05, %v3506_v23 }
 0x960   : > { %4532 = vrsqrt.f32 %v3514_v6 }
 0x961   : > { %v3494_v48 = vpop.xlane.xlu1 %3493 }
 0x962   : > { %v3507_v31 = vmul.f32 0.0078125, %v3494_v48 }
 0x963   : > { %v3496_v33 = vpop.xlane.xlu0 %3495 }
 0x964   : > { %v3515_v16 = vadd.f32 1e-05, %v3507_v31  ;;  %v3508_v5 = vmul.f32 0.0078125, %v3496_v33 }
 0x966   : > { %4534 = vrsqrt.f32 %v3515_v16  ;;  %v3516_v2 = vadd.f32 1e-05, %v3508_v5 }
 0x968   : > { %v4531_v49 = vpop.eup %4530  ;;  %4536 = vrsqrt.f32 %v3516_v2 }
 0x969   : > { %v3529_v11 = vmul.f32 %v4531_v49, %v3473_v52  ;;  %v3498_v35 = vpop.xlane.xlu1 %3497 }
 0x96a   : > { %v4533_v28 = vpop.eup %4532  ;;  %v3509_v30 = vmul.f32 0.0078125, %v3498_v35 }
 0x96b   : > { %v3543_v47 = vmul.f32 %v3970_v53, %v3529_v11  ;;  %v3530_v54 = vmul.f32 %v4533_v28, %v3474_v8  ;;  %v3500_v34 = vpop.xlane.xlu0 %3499 }
 0x96c   : > { %v3517_v41 = vadd.f32 1e-05, %v3509_v30  ;;  %v3510_v4 = vmul.f32 0.0078125, %v3500_v34 }
 0x96d   : > { %v3557_v18 = vadd.f32 %v3971_v50, %v3543_v47  ;;  %v3544_v58 = vmul.f32 %v3970_v53, %v3530_v54 }
 0x96e   : > { %4538 = vrsqrt.f32 %v3517_v41  ;;  %v3518_v60 = vadd.f32 1e-05, %v3510_v4 }
 0x96f   : > { %3565 = vst [vmem:[#allocation8] sm:$0xff] %v3557_v18  ;;  %v3558_v36 = vadd.f32 %v3971_v50, %v3544_v58 }
 0x970   : > { %v4535_v26 = vpop.eup %4534  ;;  %4540 = vrsqrt.f32 %v3518_v60 }
 0x971   : > { %3566 = vst [vmem:[#allocation8 + $0x8] sm:$0xff] %v3558_v36  ;;  %v3531_v46 = vmul.f32 %v4535_v26, %v6126_v42  ;;  %v3502_v59 = vpop.xlane.xlu1 %3501 }
 0x972   : > { %v4537_v57 = vpop.eup %4536  ;;  %v3511_v24 = vmul.f32 0.0078125, %v3502_v59 }
 0x973   : > { %v3545_v19 = vmul.f32 %v3970_v53, %v3531_v46  ;;  %v3532_v12 = vmul.f32 %v4537_v57, %v6128_v22  ;;  %v3504_v52 = vpop.xlane.xlu0 %3503 }
 0x974   : > { %v3519_v37 = vadd.f32 1e-05, %v3511_v24  ;;  %v3512_v8 = vmul.f32 0.0078125, %v3504_v52 }
 0x975   : > { %v3559_v9 = vadd.f32 %v3971_v50, %v3545_v19  ;;  %v3546_v13 = vmul.f32 %v3970_v53, %v3532_v12 }
 0x976   : > { %4542 = vrsqrt.f32 %v3519_v37  ;;  %v3520_v20 = vadd.f32 1e-05, %v3512_v8 }
 0x977   : > { %3567 = vst [vmem:[#allocation8 + $0x10] sm:$0xff] %v3559_v9  ;;  %v3560_v45 = vadd.f32 %v3971_v50, %v3546_v13 }
 0x978   : > { %v4539_v7 = vpop.eup %4538  ;;  %4544 = vrsqrt.f32 %v3520_v20 }
 0x979   : > { %3568 = vst [vmem:[#allocation8 + $0x18] sm:$0xff] %v3560_v45  ;;  %v3533_v42 = vmul.f32 %v4539_v7, %v6134_v40 }
 0x97a   : > { %v4541_v39 = vpop.eup %4540 }
 0x97b   : > { %v3547_v32 = vmul.f32 %v3970_v53, %v3533_v42  ;;  %v3534_v51 = vmul.f32 %v4541_v39, %v6136_v25 }
 0x97d   : > { %v3561_v22 = vadd.f32 %v3971_v50, %v3547_v32  ;;  %v3548_v63 = vmul.f32 %v3970_v53, %v3534_v51 }
 0x97f   : > { %3569 = vst [vmem:[#allocation8 + $0x20] sm:$0xff] %v3561_v22  ;;  %v3562_v62 = vadd.f32 %v3971_v50, %v3548_v63 }
 0x980   : > { %v4543_v55 = vpop.eup %4542 }
 0x981   : > { %3570 = vst [vmem:[#allocation8 + $0x28] sm:$0xff] %v3562_v62  ;;  %v3535_v3 = vmul.f32 %v4543_v55, %v6142_v15 }
 0x982   : > { %v4545_v27 = vpop.eup %4544 }
 0x983   : > { %v3549_v14 = vmul.f32 %v3970_v53, %v3535_v3  ;;  %v3536_v61 = vmul.f32 %v4545_v27, %v6144_v0 }
 0x985   : > { %v3563_v40 = vadd.f32 %v3971_v50, %v3549_v14  ;;  %v3550_v38 = vmul.f32 %v3970_v53, %v3536_v61 }
 0x987   : > { %3571 = vst [vmem:[#allocation8 + $0x30] sm:$0xff] %v3563_v40  ;;  %v3564_v25 = vadd.f32 %v3971_v50, %v3550_v38 }
 0x989   : > { %3572 = vst [vmem:[#allocation8 + $0x38] sm:$0xff] %v3564_v25 }
 0x98a   : > { %4655 = shalt.err (!%p4652_p5)
}
 0x98b   : > { %s6281_s30 = sld [smem:[#allocation28_spill]] }
 0x991   : > { %s6282_s13 = smov %s6281_s30  ;;  %s4656_s15 = scalar_lea.hbm %s6281_s30, 1024 }
 0x992   : > { %p4657_p12 = scmp.ne.s32.totalorder %s6282_s13, %s4656_s15  ;;  %p4662_p8 = scmp.lt.u32.totalorder %s4656_s15, %s6282_s13 }
 0x994   : > { %p4658_p1 = pnand %p4657_p12, %p4288_p7 }
 0x996   : > { %p4659_p11 = pneg %p4658_p1 }
 0x998   : > { %p4664_p9 = pnand %p4662_p8, %p4659_p11 }
 0x99a   : > { %4667 = shalt.err (!%p4664_p9)
}
 0x99b   : > { %s4748_s11 = smov 128   ;;  %s4749_s0 = smov 8  }
 0x99c   : > { %4271 = dma.vmem_to_hbm [thread:$0]  (%p4288_p7), %s3583_s1, 1024, %s6282_s13, [#allocation4], %s4748_s11, %s4748_s11, %s4749_s0  }
 0x99d   : > { %4705 = dma.done.wait (%p4288_p7), [#allocation4], 1024  }
 0x99e   : > { %4707 = vsyncadd (%p4288_p7), [#allocation4], 4294966272 }
 0x99f PF: > { %s31_s18 = sadd.s32 1, %s4730_s18   ;;  %s6283_s29 = sld [smem:[#allocation13_spill]] }
 0x9a0   : > { %p28_p10 = scmp.ge.s32.totalorder %s31_s18, 4   ;;  %s6284_s30 = sld [smem:[#allocation14_spill]] }
 0x9a1   : > { %s6285_s15 = sld [smem:[#allocation17_spill]]  ;;  %s6286_s16 = sld [smem:[#allocation15_spill]] }
 0x9a2   : > { %s6287_s17 = sld [smem:[#allocation16_spill]]  ;;  %30 = sbr.rel (!%p28_p10) target bundleno = 17 (0x11), region = 162 }
 0x9a9   :  { %3598 = vsyncpa [#allocation3], 1 }
 0x9aa   :  { %3600 = vsyncpa [#allocation3 + $0x1], 1 }
 0x9ab   :  { %3601 = vsyncpa [#allocation6], 1 }
 0x9ac   :  { %3603 = vsyncpa [#allocation6 + $0x1], 1 }
 0x9ad   :  { %3604 = vsyncpa [#allocation4], 1 }
 0x9ae   :  { %3606 = vsyncpa [#allocation4 + $0x1], 1 }

</bundles_post_ra>
